<compile_context>
chip_gen: v7x
topology: tpu7x:2x2x1
jax: 0.10.0
libtpu: 0.0.40
codegen_flags: <defaults>
</compile_context>

<pallas_src>
import functools
import math

import jax
import jax.numpy as jnp
from jax.experimental import pallas as pl
from jax.experimental.pallas import tpu as pltpu


_VMEM_LIMIT = 32 * 1024 * 1024


# ----------------------------------------------------------------------------
# Tiled dense kernel: out = x @ w + b (bf16 operands, f32 accumulate).
# Used for the hoisted GRU input projections.
# ----------------------------------------------------------------------------
def _dense_kernel(x_ref, w_ref, b_ref, o_ref):
    o_ref[...] = (jnp.dot(x_ref[...], w_ref[...],
                          preferred_element_type=jnp.float32) + b_ref[...])


def _pick_block(dim, target, align):
    """Largest `align`-aligned divisor of `dim` that is <= target, or full dim."""
    if dim <= target:
        return dim
    cand = (target // align) * align
    while cand >= align:
        if dim % cand == 0:
            return cand
        cand -= align
    # TODO(synk): truly ragged dims would need a cdiv grid + masked remainder tile.
    return dim


def dense_forward(x_2d, w, b, *, bm_target=256, bn_target=512):
    """x_2d: (M, K), w: (K, N), b: (1, N) or (N,) -> (M, N) f32."""
    M, K = x_2d.shape
    N = w.shape[-1]
    bm = _pick_block(M, bm_target, 8)
    bn = _pick_block(N, bn_target, 128)
    return pl.pallas_call(
        _dense_kernel,
        out_shape=jax.ShapeDtypeStruct((M, N), jnp.float32),
        grid=(M // bm, N // bn),
        in_specs=[
            pl.BlockSpec((bm, K), lambda i, j: (i, 0)),
            pl.BlockSpec((K, bn), lambda i, j: (0, j)),
            pl.BlockSpec((1, bn), lambda i, j: (0, j)),
        ],
        out_specs=pl.BlockSpec((bm, bn), lambda i, j: (i, j)),
        compiler_params=pltpu.CompilerParams(
            dimension_semantics=("parallel", "parallel"),
            vmem_limit_bytes=_VMEM_LIMIT),
    )(x_2d.astype(jnp.bfloat16), w.astype(jnp.bfloat16),
      b.reshape(1, N).astype(jnp.float32))


# ----------------------------------------------------------------------------
# GRU recurrence kernels (single invocation, whole sequence resident in VMEM).
# gi_ref holds the pre-projected input gates (x @ W_ih + b_ih + b_hh[r,z]) in
# (T, B, 3H) layout; per step only the fused h @ W_hh (H, 3H) matmul runs.
# TODO(synk): for long T, chunk the T axis (grid / emit_pipeline) so gi streams
# instead of being fully resident (v5e 16 MiB / v7x 32 MiB scoped VMEM), and on
# v7x add a batch-parallel grid axis so both TensorCores are used.
# ----------------------------------------------------------------------------
def _gru_step(gi_t, h, whh_ref, b_n, H):
    # Fused gate matmul: one (B,H) x (H,3H) push; slices below are lane-aligned.
    gh = jnp.dot(h.astype(jnp.bfloat16), whh_ref[...],
                 preferred_element_type=jnp.float32)              # (B, 3H)
    r = jax.nn.sigmoid(gi_t[:, 0 * H:1 * H] + gh[:, 0 * H:1 * H])
    z = jax.nn.sigmoid(gi_t[:, 1 * H:2 * H] + gh[:, 1 * H:2 * H])
    n = jnp.tanh(gi_t[:, 2 * H:3 * H] + r * (gh[:, 2 * H:3 * H] + b_n))
    return (1.0 - z) * n + z * h


def _gru_encoder_kernel(gi_ref, h0_ref, whh_ref, bn_ref, hT_ref, *, unroll):
    T = gi_ref.shape[0]
    B, H = h0_ref.shape
    b_n = jnp.broadcast_to(bn_ref[...], (B, H))   # broadcast hoisted out of loop

    def step(t, h):
        return _gru_step(gi_ref[t], h, whh_ref, b_n, H)

    hT_ref[...] = jax.lax.fori_loop(0, T, step, h0_ref[...], unroll=unroll)


def _gru_decoder_kernel(gi_ref, h0_ref, wctx_ref, whh_ref, bn_ref,
                        wout_ref, bout_ref, logits_ref, hT_ref, *, unroll):
    T = gi_ref.shape[0]
    B, H = h0_ref.shape
    V = bout_ref.shape[-1]
    h0 = h0_ref[...]
    # Context contribution (constant over time): one (B,H) x (H,3H) matmul,
    # computed once in the prologue instead of a separate pallas_call.
    ctx_gi = jnp.dot(h0.astype(jnp.bfloat16), wctx_ref[...],
                     preferred_element_type=jnp.float32)          # (B, 3H)
    b_n = jnp.broadcast_to(bn_ref[...], (B, H))
    b_out = jnp.broadcast_to(bout_ref[...], (B, V))

    def step(t, h):
        h_new = _gru_step(gi_ref[t] + ctx_gi, h, whh_ref, b_n, H)
        # Fused vocab projection: dec_out never round-trips HBM.
        logits_ref[t] = (jnp.dot(h_new.astype(jnp.bfloat16), wout_ref[...],
                                 preferred_element_type=jnp.float32) + b_out)
        return h_new

    hT_ref[...] = jax.lax.fori_loop(0, T, step, h0, unroll=unroll)


def gru_encode(gi, h0, whh_bf16, b_n):
    """gi: (T, B, 3H) f32, h0: (B, H) f32 -> final hidden (B, H) f32."""
    T = gi.shape[0]
    unroll = True if T <= 32 else 8
    kernel = functools.partial(_gru_encoder_kernel, unroll=unroll)
    return pl.pallas_call(
        kernel,
        out_shape=jax.ShapeDtypeStruct(h0.shape, jnp.float32),
        compiler_params=pltpu.CompilerParams(vmem_limit_bytes=_VMEM_LIMIT),
    )(gi, h0, whh_bf16, b_n)


def gru_decode_project(gi, h0, wctx_bf16, whh_bf16, b_n, wout_bf16, b_out):
    """Decoder recurrence fused with the vocab projection.

    Returns (logits_time_major (T, B, V) f32, hT (B, H) f32).
    """
    T, B, _ = gi.shape
    V = wout_bf16.shape[-1]
    unroll = True if T <= 32 else 8
    kernel = functools.partial(_gru_decoder_kernel, unroll=unroll)
    return pl.pallas_call(
        kernel,
        out_shape=(jax.ShapeDtypeStruct((T, B, V), jnp.float32),
                   jax.ShapeDtypeStruct(h0.shape, jnp.float32)),
        compiler_params=pltpu.CompilerParams(vmem_limit_bytes=_VMEM_LIMIT),
    )(gi, h0, wctx_bf16, whh_bf16, b_n, wout_bf16, b_out)


# ----------------------------------------------------------------------------
# Bias folding: b_hh[r], b_hh[z] can be hoisted into the input projection;
# only b_hh[n] must stay inside the recurrence (it sits inside r * (h@W_n + b_n)).
# ----------------------------------------------------------------------------
def _fold_hh_bias(b_ih, b_hh):
    """b_ih, b_hh: (1, 3H) -> (folded (1, 3H), b_n (1, H))."""
    H = b_ih.shape[-1] // 3
    folded = jnp.concatenate(
        [b_ih[:, :2 * H] + b_hh[:, :2 * H], b_ih[:, 2 * H:]], axis=-1)
    return folded, b_hh[:, 2 * H:]


# ----------------------------------------------------------------------------
# Parameter init (deterministic, shapes follow the PyTorch module __init__).
# ----------------------------------------------------------------------------
def init_params(key, src_vocab, tgt_vocab, embed, hidden):
    ks = jax.random.split(key, 12)
    s = 1.0 / math.sqrt(hidden)

    def uni(k, shape):
        return jax.random.uniform(k, shape, jnp.float32, -s, s)

    return {
        # nn.Embedding defaults to N(0, 1)
        "enc_emb": jax.random.normal(ks[0], (src_vocab, embed), jnp.float32),
        "enc_wih": uni(ks[1], (embed, 3 * hidden)),
        "enc_whh": uni(ks[2], (hidden, 3 * hidden)),
        "enc_bih": uni(ks[3], (1, 3 * hidden)),
        "enc_bhh": uni(ks[4], (1, 3 * hidden)),
        "dec_emb": jax.random.normal(ks[5], (tgt_vocab, embed), jnp.float32),
        "dec_wih": uni(ks[6], (embed + hidden, 3 * hidden)),
        "dec_whh": uni(ks[7], (hidden, 3 * hidden)),
        "dec_bih": uni(ks[8], (1, 3 * hidden)),
        "dec_bhh": uni(ks[9], (1, 3 * hidden)),
        "dense_w": uni(ks[10], (hidden, tgt_vocab)),
        "dense_b": uni(ks[11], (tgt_vocab,)),
    }


# ----------------------------------------------------------------------------
# EncoderDecoder.forward
# ----------------------------------------------------------------------------
def encoder_decoder_forward(params, enc_X, dec_X):
    B = enc_X.shape[0]
    H = params["enc_whh"].shape[0]
    E = params["enc_emb"].shape[1]

    # ---- Encoder: embed -> hoisted input projection -> recurrence ----------
    # TODO(synk): embedding gather stays in XLA (jnp.take); a Pallas DMA gather
    # is not worth it at these sizes.
    emb = jnp.take(params["enc_emb"], enc_X, axis=0)             # (B, Ts, E)
    emb = jnp.transpose(emb, (1, 0, 2)).astype(jnp.float32)      # (Ts, B, E)
    Ts = emb.shape[0]

    enc_bias, enc_bn = _fold_hh_bias(params["enc_bih"], params["enc_bhh"])
    gi_enc = dense_forward(emb.reshape(Ts * B, E),
                           params["enc_wih"], enc_bias)          # (Ts*B, 3H)
    gi_enc = gi_enc.reshape(Ts, B, 3 * H)                        # no transpose

    h0 = jnp.zeros((B, H), jnp.float32)
    enc_state = gru_encode(gi_enc, h0,
                           params["enc_whh"].astype(jnp.bfloat16), enc_bn)

    # ---- decoder.init_state(enc_outputs) -> final hidden state -------------
    dec_state = enc_state                                        # (B, H)

    # ---- Decoder: hoisted input proj; context + vocab proj fused in-kernel --
    demb = jnp.take(params["dec_emb"], dec_X, axis=0)            # (B, Td, E)
    demb = jnp.transpose(demb, (1, 0, 2)).astype(jnp.float32)    # (Td, B, E)
    Td = demb.shape[0]

    dec_bias, dec_bn = _fold_hh_bias(params["dec_bih"], params["dec_bhh"])
    wih_emb = params["dec_wih"][:E]                              # (E, 3H)
    wih_ctx = params["dec_wih"][E:]                              # (H, 3H)

    gi_dec = dense_forward(demb.reshape(Td * B, E), wih_emb, dec_bias)
    gi_dec = gi_dec.reshape(Td, B, 3 * H)                        # (Td, B, 3H)

    logits_tm, dec_hT = gru_decode_project(
        gi_dec, dec_state,
        wih_ctx.astype(jnp.bfloat16),
        params["dec_whh"].astype(jnp.bfloat16), dec_bn,
        params["dense_w"].astype(jnp.bfloat16),
        params["dense_b"].reshape(1, -1))

    # TODO(synk): for large vocab, write logits directly in (B, Td, V) layout
    # via an output BlockSpec (grid over (Td, V-tiles)) instead of this
    # XLA transpose of the time-major logits.
    logits = jnp.transpose(logits_tm, (1, 0, 2))                 # (B, Td, V)
    return logits, dec_hT


# ----------------------------------------------------------------------------
# Pure-JAX f32 reference (lax.scan) for the correctness check.
# ----------------------------------------------------------------------------
def _gru_ref(x_tbe, h0, w_ih, w_hh, b_ih, b_hh):
    H = h0.shape[-1]

    def step(h, x):
        gi = x @ w_ih + b_ih
        gh = h @ w_hh + b_hh
        r = jax.nn.sigmoid(gi[:, :H] + gh[:, :H])
        z = jax.nn.sigmoid(gi[:, H:2 * H] + gh[:, H:2 * H])
        n = jnp.tanh(gi[:, 2 * H:] + r * gh[:, 2 * H:])
        h_new = (1.0 - z) * n + z * h
        return h_new, h_new

    hT, out = jax.lax.scan(step, h0, x_tbe)
    return out, hT


def _ref_forward(params, enc_X, dec_X):
    B = enc_X.shape[0]
    H = params["enc_whh"].shape[0]
    emb = jnp.transpose(jnp.take(params["enc_emb"], enc_X, axis=0), (1, 0, 2))
    _, enc_state = _gru_ref(emb, jnp.zeros((B, H), jnp.float32),
                            params["enc_wih"], params["enc_whh"],
                            params["enc_bih"], params["enc_bhh"])
    demb = jnp.transpose(jnp.take(params["dec_emb"], dec_X, axis=0), (1, 0, 2))
    Td = demb.shape[0]
    ctx = jnp.broadcast_to(enc_state[None], (Td, B, H))
    xcat = jnp.concatenate([demb, ctx], axis=-1)
    dec_out, dec_hT = _gru_ref(xcat, enc_state,
                               params["dec_wih"], params["dec_whh"],
                               params["dec_bih"], params["dec_bhh"])
    logits = dec_out @ params["dense_w"] + params["dense_b"]
    return jnp.transpose(logits, (1, 0, 2)), dec_hT


if __name__ == "__main__":
    # Small but vreg-friendly shapes: B=8 (sublanes), H=V=128 (lanes).
    B, Ts, Td = 8, 8, 8
    src_vocab, tgt_vocab = 128, 128
    embed, hidden = 32, 128

    key = jax.random.PRNGKey(0)
    kp, ke, kd = jax.random.split(key, 3)
    params = init_params(kp, src_vocab, tgt_vocab, embed, hidden)

    enc_X = jax.random.randint(ke, (B, Ts), 0, src_vocab, dtype=jnp.int32)
    dec_X = jax.random.randint(kd, (B, Td), 0, tgt_vocab, dtype=jnp.int32)

    logits, state = jax.jit(encoder_decoder_forward)(params, enc_X, dec_X)
    jax.block_until_ready((logits, state))

    ref_logits, ref_state = _ref_forward(params, enc_X, dec_X)
    assert logits.shape == (B, Td, tgt_vocab) and state.shape == (B, hidden)
    # Tolerances loosened vs. the all-f32 version: matmul operands are bf16
    # (accumulation stays f32, so the error is bounded but larger than 2e-3).
    assert jnp.allclose(logits, ref_logits, atol=2e-2, rtol=2e-2)
    assert jnp.allclose(state, ref_state, atol=2e-2, rtol=2e-2)

    print("KERNEL_OK")
</pallas_src>

<mosaic_0001>
module attributes {stable_mosaic.version = 11 : i64} {
  func.func @_dense_kernel(%arg0: i32, %arg1: i32, %arg2: memref<64x32xbf16, #tpu.memory_space<vmem>>, %arg3: memref<32x384xbf16, #tpu.memory_space<vmem>>, %arg4: memref<1x384xf32, #tpu.memory_space<vmem>>, %arg5: memref<64x384xf32, #tpu.memory_space<vmem>>) attributes {dimension_semantics = [#tpu.dimension_semantics<parallel>, #tpu.dimension_semantics<parallel>], iteration_bounds = array<i64: 1, 1>, scalar_prefetch = 0 : i64, scratch_operands = 0 : i64, tpu.core_type = #tpu.core_type<tc>, window_params = [{transform_indices = @transform_0, window_bounds = array<i64: 64, 32>}, {transform_indices = @transform_1, window_bounds = array<i64: 32, 384>}, {transform_indices = @transform_2, window_bounds = array<i64: 1, 384>}, {transform_indices = @transform_3, window_bounds = array<i64: 64, 384>}]} {
    %c0 = arith.constant 0 : index
    %c0_0 = arith.constant 0 : index
    %0 = vector.load %arg2[%c0, %c0_0] : memref<64x32xbf16, #tpu.memory_space<vmem>>, vector<64x32xbf16>
    %c0_1 = arith.constant 0 : index
    %c0_2 = arith.constant 0 : index
    %1 = vector.load %arg3[%c0_1, %c0_2] : memref<32x384xbf16, #tpu.memory_space<vmem>>, vector<32x384xbf16>
    %cst = arith.constant dense<0.000000e+00> : vector<64x384xf32>
    %2 = tpu.matmul %0, %1, %cst {dimension_numbers = #tpu.dot_dimension_numbers<[1], [0], [0], [1], [0, 0, 1, 1], [], []>} : vector<64x32xbf16>, vector<32x384xbf16>, vector<64x384xf32> -> vector<64x384xf32>
    %c0_3 = arith.constant 0 : index
    %c0_4 = arith.constant 0 : index
    %3 = vector.load %arg4[%c0_3, %c0_4] : memref<1x384xf32, #tpu.memory_space<vmem>>, vector<1x384xf32>
    %4 = vector.broadcast %3 : vector<1x384xf32> to vector<64x384xf32>
    %5 = arith.addf %2, %4 : vector<64x384xf32>
    %c0_5 = arith.constant 0 : index
    %c0_6 = arith.constant 0 : index
    %6 = vector.load %arg5[%c0_5, %c0_6] : memref<64x384xf32, #tpu.memory_space<vmem>>, vector<64x384xf32>
    tpu.vector_store %arg5[%c0_5, %c0_6], %5 {strides = array<i32>} : memref<64x384xf32, #tpu.memory_space<vmem>>, vector<64x384xf32>,
    return
  }
  func.func @transform_0(%arg0: i32, %arg1: i32) -> (i32, i32) {
    %c0_i32 = arith.constant 0 : i32
    %c0_i32_0 = arith.constant 0 : i32
    return %arg0, %c0_i32 : i32, i32
  }
  func.func @transform_1(%arg0: i32, %arg1: i32) -> (i32, i32) {
    %c0_i32 = arith.constant 0 : i32
    %c0_i32_0 = arith.constant 0 : i32
    return %c0_i32, %arg1 : i32, i32
  }
  func.func @transform_2(%arg0: i32, %arg1: i32) -> (i32, i32) {
    %c0_i32 = arith.constant 0 : i32
    %c0_i32_0 = arith.constant 0 : i32
    return %c0_i32, %arg1 : i32, i32
  }
  func.func @transform_3(%arg0: i32, %arg1: i32) -> (i32, i32) {
    %c0_i32 = arith.constant 0 : i32
    return %arg0, %arg1 : i32, i32
  }
}

module attributes {stable_mosaic.version = 11 : i64} {
  func.func @_gru_encoder_kernel(%arg0: memref<8x8x384xf32, #tpu.memory_space<vmem>>, %arg1: memref<8x128xf32, #tpu.memory_space<vmem>>, %arg2: memref<128x384xbf16, #tpu.memory_space<vmem>>, %arg3: memref<1x128xf32, #tpu.memory_space<vmem>>, %arg4: memref<8x128xf32, #tpu.memory_space<vmem>>) attributes {dimension_semantics = [], scalar_prefetch = 0 : i64, scratch_operands = 0 : i64, tpu.core_type = #tpu.core_type<tc>} {
    %c0 = arith.constant 0 : index
    %c0_0 = arith.constant 0 : index
    %0 = vector.load %arg3[%c0, %c0_0] : memref<1x128xf32, #tpu.memory_space<vmem>>, vector<1x128xf32>
    %1 = vector.shape_cast %0 : vector<1x128xf32> to vector<1x128xf32>
    %2 = vector.broadcast %1 : vector<1x128xf32> to vector<8x128xf32>
    %c0_1 = arith.constant 0 : index
    %c0_2 = arith.constant 0 : index
    %3 = vector.load %arg1[%c0_1, %c0_2] : memref<8x128xf32, #tpu.memory_space<vmem>>, vector<8x128xf32>
    %c0_i32 = arith.constant 0 : i32
    %4 = arith.index_cast %c0_i32 : i32 to index
    %c0_3 = arith.constant 0 : index
    %c0_4 = arith.constant 0 : index
    %5 = vector.load %arg0[%4, %c0_3, %c0_4] : memref<8x8x384xf32, #tpu.memory_space<vmem>>, vector<1x8x384xf32>
    %6 = vector.shape_cast %5 : vector<1x8x384xf32> to vector<8x384xf32>
    %7 = arith.truncf %3 : vector<8x128xf32> to vector<8x128xbf16>
    %c0_5 = arith.constant 0 : index
    %c0_6 = arith.constant 0 : index
    %8 = vector.load %arg2[%c0_5, %c0_6] : memref<128x384xbf16, #tpu.memory_space<vmem>>, vector<128x384xbf16>
    %cst = arith.constant dense<0.000000e+00> : vector<8x384xf32>
    %9 = tpu.matmul %7, %8, %cst {dimension_numbers = #tpu.dot_dimension_numbers<[1], [0], [0], [1], [0, 0, 1, 1], [], []>} : vector<8x128xbf16>, vector<128x384xbf16>, vector<8x384xf32> -> vector<8x384xf32>
    %10 = vector.extract_strided_slice %6 {offsets = [0, 0], sizes = [8, 128], strides = [1, 1]} : vector<8x384xf32> to vector<8x128xf32>
    %11 = vector.extract_strided_slice %9 {offsets = [0, 0], sizes = [8, 128], strides = [1, 1]} : vector<8x384xf32> to vector<8x128xf32>
    %12 = arith.addf %10, %11 : vector<8x128xf32>
    %13 = arith.negf %12 : vector<8x128xf32>
    %14 = math.exp %13 : vector<8x128xf32>
    %cst_7 = arith.constant 1.000000e+00 : f32
    %15 = vector.broadcast %cst_7 : f32 to vector<8x128xf32>
    %16 = arith.addf %15, %14 : vector<8x128xf32>
    %17 = arith.divf %15, %16 : vector<8x128xf32>
    %18 = vector.extract_strided_slice %6 {offsets = [0, 128], sizes = [8, 128], strides = [1, 1]} : vector<8x384xf32> to vector<8x128xf32>
    %19 = vector.extract_strided_slice %9 {offsets = [0, 128], sizes = [8, 128], strides = [1, 1]} : vector<8x384xf32> to vector<8x128xf32>
    %20 = arith.addf %18, %19 : vector<8x128xf32>
    %21 = arith.negf %20 : vector<8x128xf32>
    %22 = math.exp %21 : vector<8x128xf32>
    %cst_8 = arith.constant 1.000000e+00 : f32
    %23 = vector.broadcast %cst_8 : f32 to vector<8x128xf32>
    %24 = arith.addf %23, %22 : vector<8x128xf32>
    %25 = arith.divf %23, %24 : vector<8x128xf32>
    %26 = vector.extract_strided_slice %6 {offsets = [0, 256], sizes = [8, 128], strides = [1, 1]} : vector<8x384xf32> to vector<8x128xf32>
    %27 = vector.extract_strided_slice %9 {offsets = [0, 256], sizes = [8, 128], strides = [1, 1]} : vector<8x384xf32> to vector<8x128xf32>
    %28 = arith.addf %27, %2 : vector<8x128xf32>
    %29 = arith.mulf %17, %28 : vector<8x128xf32>
    %30 = arith.addf %26, %29 : vector<8x128xf32>
    %31 = math.tanh %30 : vector<8x128xf32>
    %cst_9 = arith.constant 1.000000e+00 : f32
    %32 = vector.broadcast %cst_9 : f32 to vector<8x128xf32>
    %33 = arith.subf %32, %25 : vector<8x128xf32>
    %34 = arith.mulf %33, %31 : vector<8x128xf32>
    %35 = arith.mulf %25, %3 : vector<8x128xf32>
    %36 = arith.addf %34, %35 : vector<8x128xf32>
    %c1_i32 = arith.constant 1 : i32
    %37 = arith.index_cast %c1_i32 : i32 to index
    %c0_10 = arith.constant 0 : index
    %c0_11 = arith.constant 0 : index
    %38 = vector.load %arg0[%37, %c0_10, %c0_11] : memref<8x8x384xf32, #tpu.memory_space<vmem>>, vector<1x8x384xf32>
    %39 = vector.shape_cast %38 : vector<1x8x384xf32> to vector<8x384xf32>
    %40 = arith.truncf %36 : vector<8x128xf32> to vector<8x128xbf16>
    %c0_12 = arith.constant 0 : index
    %c0_13 = arith.constant 0 : index
    %41 = vector.load %arg2[%c0_12, %c0_13] : memref<128x384xbf16, #tpu.memory_space<vmem>>, vector<128x384xbf16>
    %cst_14 = arith.constant dense<0.000000e+00> : vector<8x384xf32>
    %42 = tpu.matmul %40, %41, %cst_14 {dimension_numbers = #tpu.dot_dimension_numbers<[1], [0], [0], [1], [0, 0, 1, 1], [], []>} : vector<8x128xbf16>, vector<128x384xbf16>, vector<8x384xf32> -> vector<8x384xf32>
    %43 = vector.extract_strided_slice %39 {offsets = [0, 0], sizes = [8, 128], strides = [1, 1]} : vector<8x384xf32> to vector<8x128xf32>
    %44 = vector.extract_strided_slice %42 {offsets = [0, 0], sizes = [8, 128], strides = [1, 1]} : vector<8x384xf32> to vector<8x128xf32>
    %45 = arith.addf %43, %44 : vector<8x128xf32>
    %46 = arith.negf %45 : vector<8x128xf32>
    %47 = math.exp %46 : vector<8x128xf32>
    %cst_15 = arith.constant 1.000000e+00 : f32
    %48 = vector.broadcast %cst_15 : f32 to vector<8x128xf32>
    %49 = arith.addf %48, %47 : vector<8x128xf32>
    %50 = arith.divf %48, %49 : vector<8x128xf32>
    %51 = vector.extract_strided_slice %39 {offsets = [0, 128], sizes = [8, 128], strides = [1, 1]} : vector<8x384xf32> to vector<8x128xf32>
    %52 = vector.extract_strided_slice %42 {offsets = [0, 128], sizes = [8, 128], strides = [1, 1]} : vector<8x384xf32> to vector<8x128xf32>
    %53 = arith.addf %51, %52 : vector<8x128xf32>
    %54 = arith.negf %53 : vector<8x128xf32>
    %55 = math.exp %54 : vector<8x128xf32>
    %cst_16 = arith.constant 1.000000e+00 : f32
    %56 = vector.broadcast %cst_16 : f32 to vector<8x128xf32>
    %57 = arith.addf %56, %55 : vector<8x128xf32>
    %58 = arith.divf %56, %57 : vector<8x128xf32>
    %59 = vector.extract_strided_slice %39 {offsets = [0, 256], sizes = [8, 128], strides = [1, 1]} : vector<8x384xf32> to vector<8x128xf32>
    %60 = vector.extract_strided_slice %42 {offsets = [0, 256], sizes = [8, 128], strides = [1, 1]} : vector<8x384xf32> to vector<8x128xf32>
    %61 = arith.addf %60, %2 : vector<8x128xf32>
    %62 = arith.mulf %50, %61 : vector<8x128xf32>
    %63 = arith.addf %59, %62 : vector<8x128xf32>
    %64 = math.tanh %63 : vector<8x128xf32>
    %cst_17 = arith.constant 1.000000e+00 : f32
    %65 = vector.broadcast %cst_17 : f32 to vector<8x128xf32>
    %66 = arith.subf %65, %58 : vector<8x128xf32>
    %67 = arith.mulf %66, %64 : vector<8x128xf32>
    %68 = arith.mulf %58, %36 : vector<8x128xf32>
    %69 = arith.addf %67, %68 : vector<8x128xf32>
    %c2_i32 = arith.constant 2 : i32
    %70 = arith.index_cast %c2_i32 : i32 to index
    %c0_18 = arith.constant 0 : index
    %c0_19 = arith.constant 0 : index
    %71 = vector.load %arg0[%70, %c0_18, %c0_19] : memref<8x8x384xf32, #tpu.memory_space<vmem>>, vector<1x8x384xf32>
    %72 = vector.shape_cast %71 : vector<1x8x384xf32> to vector<8x384xf32>
    %73 = arith.truncf %69 : vector<8x128xf32> to vector<8x128xbf16>
    %c0_20 = arith.constant 0 : index
    %c0_21 = arith.constant 0 : index
    %74 = vector.load %arg2[%c0_20, %c0_21] : memref<128x384xbf16, #tpu.memory_space<vmem>>, vector<128x384xbf16>
    %cst_22 = arith.constant dense<0.000000e+00> : vector<8x384xf32>
    %75 = tpu.matmul %73, %74, %cst_22 {dimension_numbers = #tpu.dot_dimension_numbers<[1], [0], [0], [1], [0, 0, 1, 1], [], []>} : vector<8x128xbf16>, vector<128x384xbf16>, vector<8x384xf32> -> vector<8x384xf32>
    %76 = vector.extract_strided_slice %72 {offsets = [0, 0], sizes = [8, 128], strides = [1, 1]} : vector<8x384xf32> to vector<8x128xf32>
    %77 = vector.extract_strided_slice %75 {offsets = [0, 0], sizes = [8, 128], strides = [1, 1]} : vector<8x384xf32> to vector<8x128xf32>
    %78 = arith.addf %76, %77 : vector<8x128xf32>
    %79 = arith.negf %78 : vector<8x128xf32>
    %80 = math.exp %79 : vector<8x128xf32>
    %cst_23 = arith.constant 1.000000e+00 : f32
    %81 = vector.broadcast %cst_23 : f32 to vector<8x128xf32>
    %82 = arith.addf %81, %80 : vector<8x128xf32>
    %83 = arith.divf %81, %82 : vector<8x128xf32>
    %84 = vector.extract_strided_slice %72 {offsets = [0, 128], sizes = [8, 128], strides = [1, 1]} : vector<8x384xf32> to vector<8x128xf32>
    %85 = vector.extract_strided_slice %75 {offsets = [0, 128], sizes = [8, 128], strides = [1, 1]} : vector<8x384xf32> to vector<8x128xf32>
    %86 = arith.addf %84, %85 : vector<8x128xf32>
    %87 = arith.negf %86 : vector<8x128xf32>
    %88 = math.exp %87 : vector<8x128xf32>
    %cst_24 = arith.constant 1.000000e+00 : f32
    %89 = vector.broadcast %cst_24 : f32 to vector<8x128xf32>
    %90 = arith.addf %89, %88 : vector<8x128xf32>
    %91 = arith.divf %89, %90 : vector<8x128xf32>
    %92 = vector.extract_strided_slice %72 {offsets = [0, 256], sizes = [8, 128], strides = [1, 1]} : vector<8x384xf32> to vector<8x128xf32>
    %93 = vector.extract_strided_slice %75 {offsets = [0, 256], sizes = [8, 128], strides = [1, 1]} : vector<8x384xf32> to vector<8x128xf32>
    %94 = arith.addf %93, %2 : vector<8x128xf32>
    %95 = arith.mulf %83, %94 : vector<8x128xf32>
    %96 = arith.addf %92, %95 : vector<8x128xf32>
    %97 = math.tanh %96 : vector<8x128xf32>
    %cst_25 = arith.constant 1.000000e+00 : f32
    %98 = vector.broadcast %cst_25 : f32 to vector<8x128xf32>
    %99 = arith.subf %98, %91 : vector<8x128xf32>
    %100 = arith.mulf %99, %97 : vector<8x128xf32>
    %101 = arith.mulf %91, %69 : vector<8x128xf32>
    %102 = arith.addf %100, %101 : vector<8x128xf32>
    %c3_i32 = arith.constant 3 : i32
    %103 = arith.index_cast %c3_i32 : i32 to index
    %c0_26 = arith.constant 0 : index
    %c0_27 = arith.constant 0 : index
    %104 = vector.load %arg0[%103, %c0_26, %c0_27] : memref<8x8x384xf32, #tpu.memory_space<vmem>>, vector<1x8x384xf32>
    %105 = vector.shape_cast %104 : vector<1x8x384xf32> to vector<8x384xf32>
    %106 = arith.truncf %102 : vector<8x128xf32> to vector<8x128xbf16>
    %c0_28 = arith.constant 0 : index
    %c0_29 = arith.constant 0 : index
    %107 = vector.load %arg2[%c0_28, %c0_29] : memref<128x384xbf16, #tpu.memory_space<vmem>>, vector<128x384xbf16>
    %cst_30 = arith.constant dense<0.000000e+00> : vector<8x384xf32>
    %108 = tpu.matmul %106, %107, %cst_30 {dimension_numbers = #tpu.dot_dimension_numbers<[1], [0], [0], [1], [0, 0, 1, 1], [], []>} : vector<8x128xbf16>, vector<128x384xbf16>, vector<8x384xf32> -> vector<8x384xf32>
    %109 = vector.extract_strided_slice %105 {offsets = [0, 0], sizes = [8, 128], strides = [1, 1]} : vector<8x384xf32> to vector<8x128xf32>
    %110 = vector.extract_strided_slice %108 {offsets = [0, 0], sizes = [8, 128], strides = [1, 1]} : vector<8x384xf32> to vector<8x128xf32>
    %111 = arith.addf %109, %110 : vector<8x128xf32>
    %112 = arith.negf %111 : vector<8x128xf32>
    %113 = math.exp %112 : vector<8x128xf32>
    %cst_31 = arith.constant 1.000000e+00 : f32
    %114 = vector.broadcast %cst_31 : f32 to vector<8x128xf32>
    %115 = arith.addf %114, %113 : vector<8x128xf32>
    %116 = arith.divf %114, %115 : vector<8x128xf32>
    %117 = vector.extract_strided_slice %105 {offsets = [0, 128], sizes = [8, 128], strides = [1, 1]} : vector<8x384xf32> to vector<8x128xf32>
    %118 = vector.extract_strided_slice %108 {offsets = [0, 128], sizes = [8, 128], strides = [1, 1]} : vector<8x384xf32> to vector<8x128xf32>
    %119 = arith.addf %117, %118 : vector<8x128xf32>
    %120 = arith.negf %119 : vector<8x128xf32>
    %121 = math.exp %120 : vector<8x128xf32>
    %cst_32 = arith.constant 1.000000e+00 : f32
    %122 = vector.broadcast %cst_32 : f32 to vector<8x128xf32>
    %123 = arith.addf %122, %121 : vector<8x128xf32>
    %124 = arith.divf %122, %123 : vector<8x128xf32>
    %125 = vector.extract_strided_slice %105 {offsets = [0, 256], sizes = [8, 128], strides = [1, 1]} : vector<8x384xf32> to vector<8x128xf32>
    %126 = vector.extract_strided_slice %108 {offsets = [0, 256], sizes = [8, 128], strides = [1, 1]} : vector<8x384xf32> to vector<8x128xf32>
    %127 = arith.addf %126, %2 : vector<8x128xf32>
    %128 = arith.mulf %116, %127 : vector<8x128xf32>
    %129 = arith.addf %125, %128 : vector<8x128xf32>
    %130 = math.tanh %129 : vector<8x128xf32>
    %cst_33 = arith.constant 1.000000e+00 : f32
    %131 = vector.broadcast %cst_33 : f32 to vector<8x128xf32>
    %132 = arith.subf %131, %124 : vector<8x128xf32>
    %133 = arith.mulf %132, %130 : vector<8x128xf32>
    %134 = arith.mulf %124, %102 : vector<8x128xf32>
    %135 = arith.addf %133, %134 : vector<8x128xf32>
    %c4_i32 = arith.constant 4 : i32
    %136 = arith.index_cast %c4_i32 : i32 to index
    %c0_34 = arith.constant 0 : index
    %c0_35 = arith.constant 0 : index
    %137 = vector.load %arg0[%136, %c0_34, %c0_35] : memref<8x8x384xf32, #tpu.memory_space<vmem>>, vector<1x8x384xf32>
    %138 = vector.shape_cast %137 : vector<1x8x384xf32> to vector<8x384xf32>
    %139 = arith.truncf %135 : vector<8x128xf32> to vector<8x128xbf16>
    %c0_36 = arith.constant 0 : index
    %c0_37 = arith.constant 0 : index
    %140 = vector.load %arg2[%c0_36, %c0_37] : memref<128x384xbf16, #tpu.memory_space<vmem>>, vector<128x384xbf16>
    %cst_38 = arith.constant dense<0.000000e+00> : vector<8x384xf32>
    %141 = tpu.matmul %139, %140, %cst_38 {dimension_numbers = #tpu.dot_dimension_numbers<[1], [0], [0], [1], [0, 0, 1, 1], [], []>} : vector<8x128xbf16>, vector<128x384xbf16>, vector<8x384xf32> -> vector<8x384xf32>
    %142 = vector.extract_strided_slice %138 {offsets = [0, 0], sizes = [8, 128], strides = [1, 1]} : vector<8x384xf32> to vector<8x128xf32>
    %143 = vector.extract_strided_slice %141 {offsets = [0, 0], sizes = [8, 128], strides = [1, 1]} : vector<8x384xf32> to vector<8x128xf32>
    %144 = arith.addf %142, %143 : vector<8x128xf32>
    %145 = arith.negf %144 : vector<8x128xf32>
    %146 = math.exp %145 : vector<8x128xf32>
    %cst_39 = arith.constant 1.000000e+00 : f32
    %147 = vector.broadcast %cst_39 : f32 to vector<8x128xf32>
    %148 = arith.addf %147, %146 : vector<8x128xf32>
    %149 = arith.divf %147, %148 : vector<8x128xf32>
    %150 = vector.extract_strided_slice %138 {offsets = [0, 128], sizes = [8, 128], strides = [1, 1]} : vector<8x384xf32> to vector<8x128xf32>
    %151 = vector.extract_strided_slice %141 {offsets = [0, 128], sizes = [8, 128], strides = [1, 1]} : vector<8x384xf32> to vector<8x128xf32>
    %152 = arith.addf %150, %151 : vector<8x128xf32>
    %153 = arith.negf %152 : vector<8x128xf32>
    %154 = math.exp %153 : vector<8x128xf32>
    %cst_40 = arith.constant 1.000000e+00 : f32
    %155 = vector.broadcast %cst_40 : f32 to vector<8x128xf32>
    %156 = arith.addf %155, %154 : vector<8x128xf32>
    %157 = arith.divf %155, %156 : vector<8x128xf32>
    %158 = vector.extract_strided_slice %138 {offsets = [0, 256], sizes = [8, 128], strides = [1, 1]} : vector<8x384xf32> to vector<8x128xf32>
    %159 = vector.extract_strided_slice %141 {offsets = [0, 256], sizes = [8, 128], strides = [1, 1]} : vector<8x384xf32> to vector<8x128xf32>
    %160 = arith.addf %159, %2 : vector<8x128xf32>
    %161 = arith.mulf %149, %160 : vector<8x128xf32>
    %162 = arith.addf %158, %161 : vector<8x128xf32>
    %163 = math.tanh %162 : vector<8x128xf32>
    %cst_41 = arith.constant 1.000000e+00 : f32
    %164 = vector.broadcast %cst_41 : f32 to vector<8x128xf32>
    %165 = arith.subf %164, %157 : vector<8x128xf32>
    %166 = arith.mulf %165, %163 : vector<8x128xf32>
    %167 = arith.mulf %157, %135 : vector<8x128xf32>
    %168 = arith.addf %166, %167 : vector<8x128xf32>
    %c5_i32 = arith.constant 5 : i32
    %169 = arith.index_cast %c5_i32 : i32 to index
    %c0_42 = arith.constant 0 : index
    %c0_43 = arith.constant 0 : index
    %170 = vector.load %arg0[%169, %c0_42, %c0_43] : memref<8x8x384xf32, #tpu.memory_space<vmem>>, vector<1x8x384xf32>
    %171 = vector.shape_cast %170 : vector<1x8x384xf32> to vector<8x384xf32>
    %172 = arith.truncf %168 : vector<8x128xf32> to vector<8x128xbf16>
    %c0_44 = arith.constant 0 : index
    %c0_45 = arith.constant 0 : index
    %173 = vector.load %arg2[%c0_44, %c0_45] : memref<128x384xbf16, #tpu.memory_space<vmem>>, vector<128x384xbf16>
    %cst_46 = arith.constant dense<0.000000e+00> : vector<8x384xf32>
    %174 = tpu.matmul %172, %173, %cst_46 {dimension_numbers = #tpu.dot_dimension_numbers<[1], [0], [0], [1], [0, 0, 1, 1], [], []>} : vector<8x128xbf16>, vector<128x384xbf16>, vector<8x384xf32> -> vector<8x384xf32>
    %175 = vector.extract_strided_slice %171 {offsets = [0, 0], sizes = [8, 128], strides = [1, 1]} : vector<8x384xf32> to vector<8x128xf32>
    %176 = vector.extract_strided_slice %174 {offsets = [0, 0], sizes = [8, 128], strides = [1, 1]} : vector<8x384xf32> to vector<8x128xf32>
    %177 = arith.addf %175, %176 : vector<8x128xf32>
    %178 = arith.negf %177 : vector<8x128xf32>
    %179 = math.exp %178 : vector<8x128xf32>
    %cst_47 = arith.constant 1.000000e+00 : f32
    %180 = vector.broadcast %cst_47 : f32 to vector<8x128xf32>
    %181 = arith.addf %180, %179 : vector<8x128xf32>
    %182 = arith.divf %180, %181 : vector<8x128xf32>
    %183 = vector.extract_strided_slice %171 {offsets = [0, 128], sizes = [8, 128], strides = [1, 1]} : vector<8x384xf32> to vector<8x128xf32>
    %184 = vector.extract_strided_slice %174 {offsets = [0, 128], sizes = [8, 128], strides = [1, 1]} : vector<8x384xf32> to vector<8x128xf32>
    %185 = arith.addf %183, %184 : vector<8x128xf32>
    %186 = arith.negf %185 : vector<8x128xf32>
    %187 = math.exp %186 : vector<8x128xf32>
    %cst_48 = arith.constant 1.000000e+00 : f32
    %188 = vector.broadcast %cst_48 : f32 to vector<8x128xf32>
    %189 = arith.addf %188, %187 : vector<8x128xf32>
    %190 = arith.divf %188, %189 : vector<8x128xf32>
    %191 = vector.extract_strided_slice %171 {offsets = [0, 256], sizes = [8, 128], strides = [1, 1]} : vector<8x384xf32> to vector<8x128xf32>
    %192 = vector.extract_strided_slice %174 {offsets = [0, 256], sizes = [8, 128], strides = [1, 1]} : vector<8x384xf32> to vector<8x128xf32>
    %193 = arith.addf %192, %2 : vector<8x128xf32>
    %194 = arith.mulf %182, %193 : vector<8x128xf32>
    %195 = arith.addf %191, %194 : vector<8x128xf32>
    %196 = math.tanh %195 : vector<8x128xf32>
    %cst_49 = arith.constant 1.000000e+00 : f32
    %197 = vector.broadcast %cst_49 : f32 to vector<8x128xf32>
    %198 = arith.subf %197, %190 : vector<8x128xf32>
    %199 = arith.mulf %198, %196 : vector<8x128xf32>
    %200 = arith.mulf %190, %168 : vector<8x128xf32>
    %201 = arith.addf %199, %200 : vector<8x128xf32>
    %c6_i32 = arith.constant 6 : i32
    %202 = arith.index_cast %c6_i32 : i32 to index
    %c0_50 = arith.constant 0 : index
    %c0_51 = arith.constant 0 : index
    %203 = vector.load %arg0[%202, %c0_50, %c0_51] : memref<8x8x384xf32, #tpu.memory_space<vmem>>, vector<1x8x384xf32>
    %204 = vector.shape_cast %203 : vector<1x8x384xf32> to vector<8x384xf32>
    %205 = arith.truncf %201 : vector<8x128xf32> to vector<8x128xbf16>
    %c0_52 = arith.constant 0 : index
    %c0_53 = arith.constant 0 : index
    %206 = vector.load %arg2[%c0_52, %c0_53] : memref<128x384xbf16, #tpu.memory_space<vmem>>, vector<128x384xbf16>
    %cst_54 = arith.constant dense<0.000000e+00> : vector<8x384xf32>
    %207 = tpu.matmul %205, %206, %cst_54 {dimension_numbers = #tpu.dot_dimension_numbers<[1], [0], [0], [1], [0, 0, 1, 1], [], []>} : vector<8x128xbf16>, vector<128x384xbf16>, vector<8x384xf32> -> vector<8x384xf32>
    %208 = vector.extract_strided_slice %204 {offsets = [0, 0], sizes = [8, 128], strides = [1, 1]} : vector<8x384xf32> to vector<8x128xf32>
    %209 = vector.extract_strided_slice %207 {offsets = [0, 0], sizes = [8, 128], strides = [1, 1]} : vector<8x384xf32> to vector<8x128xf32>
    %210 = arith.addf %208, %209 : vector<8x128xf32>
    %211 = arith.negf %210 : vector<8x128xf32>
    %212 = math.exp %211 : vector<8x128xf32>
    %cst_55 = arith.constant 1.000000e+00 : f32
    %213 = vector.broadcast %cst_55 : f32 to vector<8x128xf32>
    %214 = arith.addf %213, %212 : vector<8x128xf32>
    %215 = arith.divf %213, %214 : vector<8x128xf32>
    %216 = vector.extract_strided_slice %204 {offsets = [0, 128], sizes = [8, 128], strides = [1, 1]} : vector<8x384xf32> to vector<8x128xf32>
    %217 = vector.extract_strided_slice %207 {offsets = [0, 128], sizes = [8, 128], strides = [1, 1]} : vector<8x384xf32> to vector<8x128xf32>
    %218 = arith.addf %216, %217 : vector<8x128xf32>
    %219 = arith.negf %218 : vector<8x128xf32>
    %220 = math.exp %219 : vector<8x128xf32>
    %cst_56 = arith.constant 1.000000e+00 : f32
    %221 = vector.broadcast %cst_56 : f32 to vector<8x128xf32>
    %222 = arith.addf %221, %220 : vector<8x128xf32>
    %223 = arith.divf %221, %222 : vector<8x128xf32>
    %224 = vector.extract_strided_slice %204 {offsets = [0, 256], sizes = [8, 128], strides = [1, 1]} : vector<8x384xf32> to vector<8x128xf32>
    %225 = vector.extract_strided_slice %207 {offsets = [0, 256], sizes = [8, 128], strides = [1, 1]} : vector<8x384xf32> to vector<8x128xf32>
    %226 = arith.addf %225, %2 : vector<8x128xf32>
    %227 = arith.mulf %215, %226 : vector<8x128xf32>
    %228 = arith.addf %224, %227 : vector<8x128xf32>
    %229 = math.tanh %228 : vector<8x128xf32>
    %cst_57 = arith.constant 1.000000e+00 : f32
    %230 = vector.broadcast %cst_57 : f32 to vector<8x128xf32>
    %231 = arith.subf %230, %223 : vector<8x128xf32>
    %232 = arith.mulf %231, %229 : vector<8x128xf32>
    %233 = arith.mulf %223, %201 : vector<8x128xf32>
    %234 = arith.addf %232, %233 : vector<8x128xf32>
    %c7_i32 = arith.constant 7 : i32
    %235 = arith.index_cast %c7_i32 : i32 to index
    %c0_58 = arith.constant 0 : index
    %c0_59 = arith.constant 0 : index
    %236 = vector.load %arg0[%235, %c0_58, %c0_59] : memref<8x8x384xf32, #tpu.memory_space<vmem>>, vector<1x8x384xf32>
    %237 = vector.shape_cast %236 : vector<1x8x384xf32> to vector<8x384xf32>
    %238 = arith.truncf %234 : vector<8x128xf32> to vector<8x128xbf16>
    %c0_60 = arith.constant 0 : index
    %c0_61 = arith.constant 0 : index
    %239 = vector.load %arg2[%c0_60, %c0_61] : memref<128x384xbf16, #tpu.memory_space<vmem>>, vector<128x384xbf16>
    %cst_62 = arith.constant dense<0.000000e+00> : vector<8x384xf32>
    %240 = tpu.matmul %238, %239, %cst_62 {dimension_numbers = #tpu.dot_dimension_numbers<[1], [0], [0], [1], [0, 0, 1, 1], [], []>} : vector<8x128xbf16>, vector<128x384xbf16>, vector<8x384xf32> -> vector<8x384xf32>
    %241 = vector.extract_strided_slice %237 {offsets = [0, 0], sizes = [8, 128], strides = [1, 1]} : vector<8x384xf32> to vector<8x128xf32>
    %242 = vector.extract_strided_slice %240 {offsets = [0, 0], sizes = [8, 128], strides = [1, 1]} : vector<8x384xf32> to vector<8x128xf32>
    %243 = arith.addf %241, %242 : vector<8x128xf32>
    %244 = arith.negf %243 : vector<8x128xf32>
    %245 = math.exp %244 : vector<8x128xf32>
    %cst_63 = arith.constant 1.000000e+00 : f32
    %246 = vector.broadcast %cst_63 : f32 to vector<8x128xf32>
    %247 = arith.addf %246, %245 : vector<8x128xf32>
    %248 = arith.divf %246, %247 : vector<8x128xf32>
    %249 = vector.extract_strided_slice %237 {offsets = [0, 128], sizes = [8, 128], strides = [1, 1]} : vector<8x384xf32> to vector<8x128xf32>
    %250 = vector.extract_strided_slice %240 {offsets = [0, 128], sizes = [8, 128], strides = [1, 1]} : vector<8x384xf32> to vector<8x128xf32>
    %251 = arith.addf %249, %250 : vector<8x128xf32>
    %252 = arith.negf %251 : vector<8x128xf32>
    %253 = math.exp %252 : vector<8x128xf32>
    %cst_64 = arith.constant 1.000000e+00 : f32
    %254 = vector.broadcast %cst_64 : f32 to vector<8x128xf32>
    %255 = arith.addf %254, %253 : vector<8x128xf32>
    %256 = arith.divf %254, %255 : vector<8x128xf32>
    %257 = vector.extract_strided_slice %237 {offsets = [0, 256], sizes = [8, 128], strides = [1, 1]} : vector<8x384xf32> to vector<8x128xf32>
    %258 = vector.extract_strided_slice %240 {offsets = [0, 256], sizes = [8, 128], strides = [1, 1]} : vector<8x384xf32> to vector<8x128xf32>
    %259 = arith.addf %258, %2 : vector<8x128xf32>
    %260 = arith.mulf %248, %259 : vector<8x128xf32>
    %261 = arith.addf %257, %260 : vector<8x128xf32>
    %262 = math.tanh %261 : vector<8x128xf32>
    %cst_65 = arith.constant 1.000000e+00 : f32
    %263 = vector.broadcast %cst_65 : f32 to vector<8x128xf32>
    %264 = arith.subf %263, %256 : vector<8x128xf32>
    %265 = arith.mulf %264, %262 : vector<8x128xf32>
    %266 = arith.mulf %256, %234 : vector<8x128xf32>
    %267 = arith.addf %265, %266 : vector<8x128xf32>
    %c8_i32 = arith.constant 8 : i32
    %c0_66 = arith.constant 0 : index
    %c0_67 = arith.constant 0 : index
    %268 = vector.load %arg4[%c0_66, %c0_67] : memref<8x128xf32, #tpu.memory_space<vmem>>, vector<8x128xf32>
    tpu.vector_store %arg4[%c0_66, %c0_67], %267 {strides = array<i32>} : memref<8x128xf32, #tpu.memory_space<vmem>>, vector<8x128xf32>,
    return
  }
}

module attributes {stable_mosaic.version = 11 : i64} {
  func.func @_gru_decoder_kernel(%arg0: memref<8x8x384xf32, #tpu.memory_space<vmem>>, %arg1: memref<8x128xf32, #tpu.memory_space<vmem>>, %arg2: memref<128x384xbf16, #tpu.memory_space<vmem>>, %arg3: memref<128x384xbf16, #tpu.memory_space<vmem>>, %arg4: memref<1x128xf32, #tpu.memory_space<vmem>>, %arg5: memref<128x128xbf16, #tpu.memory_space<vmem>>, %arg6: memref<1x128xf32, #tpu.memory_space<vmem>>, %arg7: memref<8x8x128xf32, #tpu.memory_space<vmem>>, %arg8: memref<8x128xf32, #tpu.memory_space<vmem>>) attributes {dimension_semantics = [], scalar_prefetch = 0 : i64, scratch_operands = 0 : i64, tpu.core_type = #tpu.core_type<tc>} {
    %c0 = arith.constant 0 : index
    %c0_0 = arith.constant 0 : index
    %0 = vector.load %arg1[%c0, %c0_0] : memref<8x128xf32, #tpu.memory_space<vmem>>, vector<8x128xf32>
    %1 = arith.truncf %0 : vector<8x128xf32> to vector<8x128xbf16>
    %c0_1 = arith.constant 0 : index
    %c0_2 = arith.constant 0 : index
    %2 = vector.load %arg2[%c0_1, %c0_2] : memref<128x384xbf16, #tpu.memory_space<vmem>>, vector<128x384xbf16>
    %cst = arith.constant dense<0.000000e+00> : vector<8x384xf32>
    %3 = tpu.matmul %1, %2, %cst {dimension_numbers = #tpu.dot_dimension_numbers<[1], [0], [0], [1], [0, 0, 1, 1], [], []>} : vector<8x128xbf16>, vector<128x384xbf16>, vector<8x384xf32> -> vector<8x384xf32>
    %c0_3 = arith.constant 0 : index
    %c0_4 = arith.constant 0 : index
    %4 = vector.load %arg4[%c0_3, %c0_4] : memref<1x128xf32, #tpu.memory_space<vmem>>, vector<1x128xf32>
    %5 = vector.shape_cast %4 : vector<1x128xf32> to vector<1x128xf32>
    %6 = vector.broadcast %5 : vector<1x128xf32> to vector<8x128xf32>
    %c0_5 = arith.constant 0 : index
    %c0_6 = arith.constant 0 : index
    %7 = vector.load %arg6[%c0_5, %c0_6] : memref<1x128xf32, #tpu.memory_space<vmem>>, vector<1x128xf32>
    %8 = vector.shape_cast %7 : vector<1x128xf32> to vector<1x128xf32>
    %9 = vector.broadcast %8 : vector<1x128xf32> to vector<8x128xf32>
    %c0_i32 = arith.constant 0 : i32
    %10 = arith.index_cast %c0_i32 : i32 to index
    %c0_7 = arith.constant 0 : index
    %c0_8 = arith.constant 0 : index
    %11 = vector.load %arg0[%10, %c0_7, %c0_8] : memref<8x8x384xf32, #tpu.memory_space<vmem>>, vector<1x8x384xf32>
    %12 = vector.shape_cast %11 : vector<1x8x384xf32> to vector<8x384xf32>
    %13 = arith.addf %12, %3 : vector<8x384xf32>
    %14 = arith.truncf %0 : vector<8x128xf32> to vector<8x128xbf16>
    %c0_9 = arith.constant 0 : index
    %c0_10 = arith.constant 0 : index
    %15 = vector.load %arg3[%c0_9, %c0_10] : memref<128x384xbf16, #tpu.memory_space<vmem>>, vector<128x384xbf16>
    %cst_11 = arith.constant dense<0.000000e+00> : vector<8x384xf32>
    %16 = tpu.matmul %14, %15, %cst_11 {dimension_numbers = #tpu.dot_dimension_numbers<[1], [0], [0], [1], [0, 0, 1, 1], [], []>} : vector<8x128xbf16>, vector<128x384xbf16>, vector<8x384xf32> -> vector<8x384xf32>
    %17 = vector.extract_strided_slice %13 {offsets = [0, 0], sizes = [8, 128], strides = [1, 1]} : vector<8x384xf32> to vector<8x128xf32>
    %18 = vector.extract_strided_slice %16 {offsets = [0, 0], sizes = [8, 128], strides = [1, 1]} : vector<8x384xf32> to vector<8x128xf32>
    %19 = arith.addf %17, %18 : vector<8x128xf32>
    %20 = arith.negf %19 : vector<8x128xf32>
    %21 = math.exp %20 : vector<8x128xf32>
    %cst_12 = arith.constant 1.000000e+00 : f32
    %22 = vector.broadcast %cst_12 : f32 to vector<8x128xf32>
    %23 = arith.addf %22, %21 : vector<8x128xf32>
    %24 = arith.divf %22, %23 : vector<8x128xf32>
    %25 = vector.extract_strided_slice %13 {offsets = [0, 128], sizes = [8, 128], strides = [1, 1]} : vector<8x384xf32> to vector<8x128xf32>
    %26 = vector.extract_strided_slice %16 {offsets = [0, 128], sizes = [8, 128], strides = [1, 1]} : vector<8x384xf32> to vector<8x128xf32>
    %27 = arith.addf %25, %26 : vector<8x128xf32>
    %28 = arith.negf %27 : vector<8x128xf32>
    %29 = math.exp %28 : vector<8x128xf32>
    %cst_13 = arith.constant 1.000000e+00 : f32
    %30 = vector.broadcast %cst_13 : f32 to vector<8x128xf32>
    %31 = arith.addf %30, %29 : vector<8x128xf32>
    %32 = arith.divf %30, %31 : vector<8x128xf32>
    %33 = vector.extract_strided_slice %13 {offsets = [0, 256], sizes = [8, 128], strides = [1, 1]} : vector<8x384xf32> to vector<8x128xf32>
    %34 = vector.extract_strided_slice %16 {offsets = [0, 256], sizes = [8, 128], strides = [1, 1]} : vector<8x384xf32> to vector<8x128xf32>
    %35 = arith.addf %34, %6 : vector<8x128xf32>
    %36 = arith.mulf %24, %35 : vector<8x128xf32>
    %37 = arith.addf %33, %36 : vector<8x128xf32>
    %38 = math.tanh %37 : vector<8x128xf32>
    %cst_14 = arith.constant 1.000000e+00 : f32
    %39 = vector.broadcast %cst_14 : f32 to vector<8x128xf32>
    %40 = arith.subf %39, %32 : vector<8x128xf32>
    %41 = arith.mulf %40, %38 : vector<8x128xf32>
    %42 = arith.mulf %32, %0 : vector<8x128xf32>
    %43 = arith.addf %41, %42 : vector<8x128xf32>
    %44 = arith.truncf %43 : vector<8x128xf32> to vector<8x128xbf16>
    %c0_15 = arith.constant 0 : index
    %c0_16 = arith.constant 0 : index
    %45 = vector.load %arg5[%c0_15, %c0_16] : memref<128x128xbf16, #tpu.memory_space<vmem>>, vector<128x128xbf16>
    %cst_17 = arith.constant dense<0.000000e+00> : vector<8x128xf32>
    %46 = tpu.matmul %44, %45, %cst_17 {dimension_numbers = #tpu.dot_dimension_numbers<[1], [0], [0], [1], [0, 0, 1, 1], [], []>} : vector<8x128xbf16>, vector<128x128xbf16>, vector<8x128xf32> -> vector<8x128xf32>
    %47 = arith.addf %46, %9 : vector<8x128xf32>
    %48 = arith.index_cast %c0_i32 : i32 to index
    %c0_18 = arith.constant 0 : index
    %c0_19 = arith.constant 0 : index
    %49 = vector.load %arg7[%48, %c0_18, %c0_19] : memref<8x8x128xf32, #tpu.memory_space<vmem>>, vector<1x8x128xf32>
    %50 = vector.shape_cast %49 : vector<1x8x128xf32> to vector<8x128xf32>
    %51 = vector.shape_cast %47 : vector<8x128xf32> to vector<1x8x128xf32>
    tpu.vector_store %arg7[%48, %c0_18, %c0_19], %51 {strides = array<i32>} : memref<8x8x128xf32, #tpu.memory_space<vmem>>, vector<1x8x128xf32>,
    %c1_i32 = arith.constant 1 : i32
    %52 = arith.index_cast %c1_i32 : i32 to index
    %c0_20 = arith.constant 0 : index
    %c0_21 = arith.constant 0 : index
    %53 = vector.load %arg0[%52, %c0_20, %c0_21] : memref<8x8x384xf32, #tpu.memory_space<vmem>>, vector<1x8x384xf32>
    %54 = vector.shape_cast %53 : vector<1x8x384xf32> to vector<8x384xf32>
    %55 = arith.addf %54, %3 : vector<8x384xf32>
    %56 = arith.truncf %43 : vector<8x128xf32> to vector<8x128xbf16>
    %c0_22 = arith.constant 0 : index
    %c0_23 = arith.constant 0 : index
    %57 = vector.load %arg3[%c0_22, %c0_23] : memref<128x384xbf16, #tpu.memory_space<vmem>>, vector<128x384xbf16>
    %cst_24 = arith.constant dense<0.000000e+00> : vector<8x384xf32>
    %58 = tpu.matmul %56, %57, %cst_24 {dimension_numbers = #tpu.dot_dimension_numbers<[1], [0], [0], [1], [0, 0, 1, 1], [], []>} : vector<8x128xbf16>, vector<128x384xbf16>, vector<8x384xf32> -> vector<8x384xf32>
    %59 = vector.extract_strided_slice %55 {offsets = [0, 0], sizes = [8, 128], strides = [1, 1]} : vector<8x384xf32> to vector<8x128xf32>
    %60 = vector.extract_strided_slice %58 {offsets = [0, 0], sizes = [8, 128], strides = [1, 1]} : vector<8x384xf32> to vector<8x128xf32>
    %61 = arith.addf %59, %60 : vector<8x128xf32>
    %62 = arith.negf %61 : vector<8x128xf32>
    %63 = math.exp %62 : vector<8x128xf32>
    %cst_25 = arith.constant 1.000000e+00 : f32
    %64 = vector.broadcast %cst_25 : f32 to vector<8x128xf32>
    %65 = arith.addf %64, %63 : vector<8x128xf32>
    %66 = arith.divf %64, %65 : vector<8x128xf32>
    %67 = vector.extract_strided_slice %55 {offsets = [0, 128], sizes = [8, 128], strides = [1, 1]} : vector<8x384xf32> to vector<8x128xf32>
    %68 = vector.extract_strided_slice %58 {offsets = [0, 128], sizes = [8, 128], strides = [1, 1]} : vector<8x384xf32> to vector<8x128xf32>
    %69 = arith.addf %67, %68 : vector<8x128xf32>
    %70 = arith.negf %69 : vector<8x128xf32>
    %71 = math.exp %70 : vector<8x128xf32>
    %cst_26 = arith.constant 1.000000e+00 : f32
    %72 = vector.broadcast %cst_26 : f32 to vector<8x128xf32>
    %73 = arith.addf %72, %71 : vector<8x128xf32>
    %74 = arith.divf %72, %73 : vector<8x128xf32>
    %75 = vector.extract_strided_slice %55 {offsets = [0, 256], sizes = [8, 128], strides = [1, 1]} : vector<8x384xf32> to vector<8x128xf32>
    %76 = vector.extract_strided_slice %58 {offsets = [0, 256], sizes = [8, 128], strides = [1, 1]} : vector<8x384xf32> to vector<8x128xf32>
    %77 = arith.addf %76, %6 : vector<8x128xf32>
    %78 = arith.mulf %66, %77 : vector<8x128xf32>
    %79 = arith.addf %75, %78 : vector<8x128xf32>
    %80 = math.tanh %79 : vector<8x128xf32>
    %cst_27 = arith.constant 1.000000e+00 : f32
    %81 = vector.broadcast %cst_27 : f32 to vector<8x128xf32>
    %82 = arith.subf %81, %74 : vector<8x128xf32>
    %83 = arith.mulf %82, %80 : vector<8x128xf32>
    %84 = arith.mulf %74, %43 : vector<8x128xf32>
    %85 = arith.addf %83, %84 : vector<8x128xf32>
    %86 = arith.truncf %85 : vector<8x128xf32> to vector<8x128xbf16>
    %c0_28 = arith.constant 0 : index
    %c0_29 = arith.constant 0 : index
    %87 = vector.load %arg5[%c0_28, %c0_29] : memref<128x128xbf16, #tpu.memory_space<vmem>>, vector<128x128xbf16>
    %cst_30 = arith.constant dense<0.000000e+00> : vector<8x128xf32>
    %88 = tpu.matmul %86, %87, %cst_30 {dimension_numbers = #tpu.dot_dimension_numbers<[1], [0], [0], [1], [0, 0, 1, 1], [], []>} : vector<8x128xbf16>, vector<128x128xbf16>, vector<8x128xf32> -> vector<8x128xf32>
    %89 = arith.addf %88, %9 : vector<8x128xf32>
    %90 = arith.index_cast %c1_i32 : i32 to index
    %c0_31 = arith.constant 0 : index
    %c0_32 = arith.constant 0 : index
    %91 = vector.load %arg7[%90, %c0_31, %c0_32] : memref<8x8x128xf32, #tpu.memory_space<vmem>>, vector<1x8x128xf32>
    %92 = vector.shape_cast %91 : vector<1x8x128xf32> to vector<8x128xf32>
    %93 = vector.shape_cast %89 : vector<8x128xf32> to vector<1x8x128xf32>
    tpu.vector_store %arg7[%90, %c0_31, %c0_32], %93 {strides = array<i32>} : memref<8x8x128xf32, #tpu.memory_space<vmem>>, vector<1x8x128xf32>,
    %c2_i32 = arith.constant 2 : i32
    %94 = arith.index_cast %c2_i32 : i32 to index
    %c0_33 = arith.constant 0 : index
    %c0_34 = arith.constant 0 : index
    %95 = vector.load %arg0[%94, %c0_33, %c0_34] : memref<8x8x384xf32, #tpu.memory_space<vmem>>, vector<1x8x384xf32>
    %96 = vector.shape_cast %95 : vector<1x8x384xf32> to vector<8x384xf32>
    %97 = arith.addf %96, %3 : vector<8x384xf32>
    %98 = arith.truncf %85 : vector<8x128xf32> to vector<8x128xbf16>
    %c0_35 = arith.constant 0 : index
    %c0_36 = arith.constant 0 : index
    %99 = vector.load %arg3[%c0_35, %c0_36] : memref<128x384xbf16, #tpu.memory_space<vmem>>, vector<128x384xbf16>
    %cst_37 = arith.constant dense<0.000000e+00> : vector<8x384xf32>
    %100 = tpu.matmul %98, %99, %cst_37 {dimension_numbers = #tpu.dot_dimension_numbers<[1], [0], [0], [1], [0, 0, 1, 1], [], []>} : vector<8x128xbf16>, vector<128x384xbf16>, vector<8x384xf32> -> vector<8x384xf32>
    %101 = vector.extract_strided_slice %97 {offsets = [0, 0], sizes = [8, 128], strides = [1, 1]} : vector<8x384xf32> to vector<8x128xf32>
    %102 = vector.extract_strided_slice %100 {offsets = [0, 0], sizes = [8, 128], strides = [1, 1]} : vector<8x384xf32> to vector<8x128xf32>
    %103 = arith.addf %101, %102 : vector<8x128xf32>
    %104 = arith.negf %103 : vector<8x128xf32>
    %105 = math.exp %104 : vector<8x128xf32>
    %cst_38 = arith.constant 1.000000e+00 : f32
    %106 = vector.broadcast %cst_38 : f32 to vector<8x128xf32>
    %107 = arith.addf %106, %105 : vector<8x128xf32>
    %108 = arith.divf %106, %107 : vector<8x128xf32>
    %109 = vector.extract_strided_slice %97 {offsets = [0, 128], sizes = [8, 128], strides = [1, 1]} : vector<8x384xf32> to vector<8x128xf32>
    %110 = vector.extract_strided_slice %100 {offsets = [0, 128], sizes = [8, 128], strides = [1, 1]} : vector<8x384xf32> to vector<8x128xf32>
    %111 = arith.addf %109, %110 : vector<8x128xf32>
    %112 = arith.negf %111 : vector<8x128xf32>
    %113 = math.exp %112 : vector<8x128xf32>
    %cst_39 = arith.constant 1.000000e+00 : f32
    %114 = vector.broadcast %cst_39 : f32 to vector<8x128xf32>
    %115 = arith.addf %114, %113 : vector<8x128xf32>
    %116 = arith.divf %114, %115 : vector<8x128xf32>
    %117 = vector.extract_strided_slice %97 {offsets = [0, 256], sizes = [8, 128], strides = [1, 1]} : vector<8x384xf32> to vector<8x128xf32>
    %118 = vector.extract_strided_slice %100 {offsets = [0, 256], sizes = [8, 128], strides = [1, 1]} : vector<8x384xf32> to vector<8x128xf32>
    %119 = arith.addf %118, %6 : vector<8x128xf32>
    %120 = arith.mulf %108, %119 : vector<8x128xf32>
    %121 = arith.addf %117, %120 : vector<8x128xf32>
    %122 = math.tanh %121 : vector<8x128xf32>
    %cst_40 = arith.constant 1.000000e+00 : f32
    %123 = vector.broadcast %cst_40 : f32 to vector<8x128xf32>
    %124 = arith.subf %123, %116 : vector<8x128xf32>
    %125 = arith.mulf %124, %122 : vector<8x128xf32>
    %126 = arith.mulf %116, %85 : vector<8x128xf32>
    %127 = arith.addf %125, %126 : vector<8x128xf32>
    %128 = arith.truncf %127 : vector<8x128xf32> to vector<8x128xbf16>
    %c0_41 = arith.constant 0 : index
    %c0_42 = arith.constant 0 : index
    %129 = vector.load %arg5[%c0_41, %c0_42] : memref<128x128xbf16, #tpu.memory_space<vmem>>, vector<128x128xbf16>
    %cst_43 = arith.constant dense<0.000000e+00> : vector<8x128xf32>
    %130 = tpu.matmul %128, %129, %cst_43 {dimension_numbers = #tpu.dot_dimension_numbers<[1], [0], [0], [1], [0, 0, 1, 1], [], []>} : vector<8x128xbf16>, vector<128x128xbf16>, vector<8x128xf32> -> vector<8x128xf32>
    %131 = arith.addf %130, %9 : vector<8x128xf32>
    %132 = arith.index_cast %c2_i32 : i32 to index
    %c0_44 = arith.constant 0 : index
    %c0_45 = arith.constant 0 : index
    %133 = vector.load %arg7[%132, %c0_44, %c0_45] : memref<8x8x128xf32, #tpu.memory_space<vmem>>, vector<1x8x128xf32>
    %134 = vector.shape_cast %133 : vector<1x8x128xf32> to vector<8x128xf32>
    %135 = vector.shape_cast %131 : vector<8x128xf32> to vector<1x8x128xf32>
    tpu.vector_store %arg7[%132, %c0_44, %c0_45], %135 {strides = array<i32>} : memref<8x8x128xf32, #tpu.memory_space<vmem>>, vector<1x8x128xf32>,
    %c3_i32 = arith.constant 3 : i32
    %136 = arith.index_cast %c3_i32 : i32 to index
    %c0_46 = arith.constant 0 : index
    %c0_47 = arith.constant 0 : index
    %137 = vector.load %arg0[%136, %c0_46, %c0_47] : memref<8x8x384xf32, #tpu.memory_space<vmem>>, vector<1x8x384xf32>
    %138 = vector.shape_cast %137 : vector<1x8x384xf32> to vector<8x384xf32>
    %139 = arith.addf %138, %3 : vector<8x384xf32>
    %140 = arith.truncf %127 : vector<8x128xf32> to vector<8x128xbf16>
    %c0_48 = arith.constant 0 : index
    %c0_49 = arith.constant 0 : index
    %141 = vector.load %arg3[%c0_48, %c0_49] : memref<128x384xbf16, #tpu.memory_space<vmem>>, vector<128x384xbf16>
    %cst_50 = arith.constant dense<0.000000e+00> : vector<8x384xf32>
    %142 = tpu.matmul %140, %141, %cst_50 {dimension_numbers = #tpu.dot_dimension_numbers<[1], [0], [0], [1], [0, 0, 1, 1], [], []>} : vector<8x128xbf16>, vector<128x384xbf16>, vector<8x384xf32> -> vector<8x384xf32>
    %143 = vector.extract_strided_slice %139 {offsets = [0, 0], sizes = [8, 128], strides = [1, 1]} : vector<8x384xf32> to vector<8x128xf32>
    %144 = vector.extract_strided_slice %142 {offsets = [0, 0], sizes = [8, 128], strides = [1, 1]} : vector<8x384xf32> to vector<8x128xf32>
    %145 = arith.addf %143, %144 : vector<8x128xf32>
    %146 = arith.negf %145 : vector<8x128xf32>
    %147 = math.exp %146 : vector<8x128xf32>
    %cst_51 = arith.constant 1.000000e+00 : f32
    %148 = vector.broadcast %cst_51 : f32 to vector<8x128xf32>
    %149 = arith.addf %148, %147 : vector<8x128xf32>
    %150 = arith.divf %148, %149 : vector<8x128xf32>
    %151 = vector.extract_strided_slice %139 {offsets = [0, 128], sizes = [8, 128], strides = [1, 1]} : vector<8x384xf32> to vector<8x128xf32>
    %152 = vector.extract_strided_slice %142 {offsets = [0, 128], sizes = [8, 128], strides = [1, 1]} : vector<8x384xf32> to vector<8x128xf32>
    %153 = arith.addf %151, %152 : vector<8x128xf32>
    %154 = arith.negf %153 : vector<8x128xf32>
    %155 = math.exp %154 : vector<8x128xf32>
    %cst_52 = arith.constant 1.000000e+00 : f32
    %156 = vector.broadcast %cst_52 : f32 to vector<8x128xf32>
    %157 = arith.addf %156, %155 : vector<8x128xf32>
    %158 = arith.divf %156, %157 : vector<8x128xf32>
    %159 = vector.extract_strided_slice %139 {offsets = [0, 256], sizes = [8, 128], strides = [1, 1]} : vector<8x384xf32> to vector<8x128xf32>
    %160 = vector.extract_strided_slice %142 {offsets = [0, 256], sizes = [8, 128], strides = [1, 1]} : vector<8x384xf32> to vector<8x128xf32>
    %161 = arith.addf %160, %6 : vector<8x128xf32>
    %162 = arith.mulf %150, %161 : vector<8x128xf32>
    %163 = arith.addf %159, %162 : vector<8x128xf32>
    %164 = math.tanh %163 : vector<8x128xf32>
    %cst_53 = arith.constant 1.000000e+00 : f32
    %165 = vector.broadcast %cst_53 : f32 to vector<8x128xf32>
    %166 = arith.subf %165, %158 : vector<8x128xf32>
    %167 = arith.mulf %166, %164 : vector<8x128xf32>
    %168 = arith.mulf %158, %127 : vector<8x128xf32>
    %169 = arith.addf %167, %168 : vector<8x128xf32>
    %170 = arith.truncf %169 : vector<8x128xf32> to vector<8x128xbf16>
    %c0_54 = arith.constant 0 : index
    %c0_55 = arith.constant 0 : index
    %171 = vector.load %arg5[%c0_54, %c0_55] : memref<128x128xbf16, #tpu.memory_space<vmem>>, vector<128x128xbf16>
    %cst_56 = arith.constant dense<0.000000e+00> : vector<8x128xf32>
    %172 = tpu.matmul %170, %171, %cst_56 {dimension_numbers = #tpu.dot_dimension_numbers<[1], [0], [0], [1], [0, 0, 1, 1], [], []>} : vector<8x128xbf16>, vector<128x128xbf16>, vector<8x128xf32> -> vector<8x128xf32>
    %173 = arith.addf %172, %9 : vector<8x128xf32>
    %174 = arith.index_cast %c3_i32 : i32 to index
    %c0_57 = arith.constant 0 : index
    %c0_58 = arith.constant 0 : index
    %175 = vector.load %arg7[%174, %c0_57, %c0_58] : memref<8x8x128xf32, #tpu.memory_space<vmem>>, vector<1x8x128xf32>
    %176 = vector.shape_cast %175 : vector<1x8x128xf32> to vector<8x128xf32>
    %177 = vector.shape_cast %173 : vector<8x128xf32> to vector<1x8x128xf32>
    tpu.vector_store %arg7[%174, %c0_57, %c0_58], %177 {strides = array<i32>} : memref<8x8x128xf32, #tpu.memory_space<vmem>>, vector<1x8x128xf32>,
    %c4_i32 = arith.constant 4 : i32
    %178 = arith.index_cast %c4_i32 : i32 to index
    %c0_59 = arith.constant 0 : index
    %c0_60 = arith.constant 0 : index
    %179 = vector.load %arg0[%178, %c0_59, %c0_60] : memref<8x8x384xf32, #tpu.memory_space<vmem>>, vector<1x8x384xf32>
    %180 = vector.shape_cast %179 : vector<1x8x384xf32> to vector<8x384xf32>
    %181 = arith.addf %180, %3 : vector<8x384xf32>
    %182 = arith.truncf %169 : vector<8x128xf32> to vector<8x128xbf16>
    %c0_61 = arith.constant 0 : index
    %c0_62 = arith.constant 0 : index
    %183 = vector.load %arg3[%c0_61, %c0_62] : memref<128x384xbf16, #tpu.memory_space<vmem>>, vector<128x384xbf16>
    %cst_63 = arith.constant dense<0.000000e+00> : vector<8x384xf32>
    %184 = tpu.matmul %182, %183, %cst_63 {dimension_numbers = #tpu.dot_dimension_numbers<[1], [0], [0], [1], [0, 0, 1, 1], [], []>} : vector<8x128xbf16>, vector<128x384xbf16>, vector<8x384xf32> -> vector<8x384xf32>
    %185 = vector.extract_strided_slice %181 {offsets = [0, 0], sizes = [8, 128], strides = [1, 1]} : vector<8x384xf32> to vector<8x128xf32>
    %186 = vector.extract_strided_slice %184 {offsets = [0, 0], sizes = [8, 128], strides = [1, 1]} : vector<8x384xf32> to vector<8x128xf32>
    %187 = arith.addf %185, %186 : vector<8x128xf32>
    %188 = arith.negf %187 : vector<8x128xf32>
    %189 = math.exp %188 : vector<8x128xf32>
    %cst_64 = arith.constant 1.000000e+00 : f32
    %190 = vector.broadcast %cst_64 : f32 to vector<8x128xf32>
    %191 = arith.addf %190, %189 : vector<8x128xf32>
    %192 = arith.divf %190, %191 : vector<8x128xf32>
    %193 = vector.extract_strided_slice %181 {offsets = [0, 128], sizes = [8, 128], strides = [1, 1]} : vector<8x384xf32> to vector<8x128xf32>
    %194 = vector.extract_strided_slice %184 {offsets = [0, 128], sizes = [8, 128], strides = [1, 1]} : vector<8x384xf32> to vector<8x128xf32>
    %195 = arith.addf %193, %194 : vector<8x128xf32>
    %196 = arith.negf %195 : vector<8x128xf32>
    %197 = math.exp %196 : vector<8x128xf32>
    %cst_65 = arith.constant 1.000000e+00 : f32
    %198 = vector.broadcast %cst_65 : f32 to vector<8x128xf32>
    %199 = arith.addf %198, %197 : vector<8x128xf32>
    %200 = arith.divf %198, %199 : vector<8x128xf32>
    %201 = vector.extract_strided_slice %181 {offsets = [0, 256], sizes = [8, 128], strides = [1, 1]} : vector<8x384xf32> to vector<8x128xf32>
    %202 = vector.extract_strided_slice %184 {offsets = [0, 256], sizes = [8, 128], strides = [1, 1]} : vector<8x384xf32> to vector<8x128xf32>
    %203 = arith.addf %202, %6 : vector<8x128xf32>
    %204 = arith.mulf %192, %203 : vector<8x128xf32>
    %205 = arith.addf %201, %204 : vector<8x128xf32>
    %206 = math.tanh %205 : vector<8x128xf32>
    %cst_66 = arith.constant 1.000000e+00 : f32
    %207 = vector.broadcast %cst_66 : f32 to vector<8x128xf32>
    %208 = arith.subf %207, %200 : vector<8x128xf32>
    %209 = arith.mulf %208, %206 : vector<8x128xf32>
    %210 = arith.mulf %200, %169 : vector<8x128xf32>
    %211 = arith.addf %209, %210 : vector<8x128xf32>
    %212 = arith.truncf %211 : vector<8x128xf32> to vector<8x128xbf16>
    %c0_67 = arith.constant 0 : index
    %c0_68 = arith.constant 0 : index
    %213 = vector.load %arg5[%c0_67, %c0_68] : memref<128x128xbf16, #tpu.memory_space<vmem>>, vector<128x128xbf16>
    %cst_69 = arith.constant dense<0.000000e+00> : vector<8x128xf32>
    %214 = tpu.matmul %212, %213, %cst_69 {dimension_numbers = #tpu.dot_dimension_numbers<[1], [0], [0], [1], [0, 0, 1, 1], [], []>} : vector<8x128xbf16>, vector<128x128xbf16>, vector<8x128xf32> -> vector<8x128xf32>
    %215 = arith.addf %214, %9 : vector<8x128xf32>
    %216 = arith.index_cast %c4_i32 : i32 to index
    %c0_70 = arith.constant 0 : index
    %c0_71 = arith.constant 0 : index
    %217 = vector.load %arg7[%216, %c0_70, %c0_71] : memref<8x8x128xf32, #tpu.memory_space<vmem>>, vector<1x8x128xf32>
    %218 = vector.shape_cast %217 : vector<1x8x128xf32> to vector<8x128xf32>
    %219 = vector.shape_cast %215 : vector<8x128xf32> to vector<1x8x128xf32>
    tpu.vector_store %arg7[%216, %c0_70, %c0_71], %219 {strides = array<i32>} : memref<8x8x128xf32, #tpu.memory_space<vmem>>, vector<1x8x128xf32>,
    %c5_i32 = arith.constant 5 : i32
    %220 = arith.index_cast %c5_i32 : i32 to index
    %c0_72 = arith.constant 0 : index
    %c0_73 = arith.constant 0 : index
    %221 = vector.load %arg0[%220, %c0_72, %c0_73] : memref<8x8x384xf32, #tpu.memory_space<vmem>>, vector<1x8x384xf32>
    %222 = vector.shape_cast %221 : vector<1x8x384xf32> to vector<8x384xf32>
    %223 = arith.addf %222, %3 : vector<8x384xf32>
    %224 = arith.truncf %211 : vector<8x128xf32> to vector<8x128xbf16>
    %c0_74 = arith.constant 0 : index
    %c0_75 = arith.constant 0 : index
    %225 = vector.load %arg3[%c0_74, %c0_75] : memref<128x384xbf16, #tpu.memory_space<vmem>>, vector<128x384xbf16>
    %cst_76 = arith.constant dense<0.000000e+00> : vector<8x384xf32>
    %226 = tpu.matmul %224, %225, %cst_76 {dimension_numbers = #tpu.dot_dimension_numbers<[1], [0], [0], [1], [0, 0, 1, 1], [], []>} : vector<8x128xbf16>, vector<128x384xbf16>, vector<8x384xf32> -> vector<8x384xf32>
    %227 = vector.extract_strided_slice %223 {offsets = [0, 0], sizes = [8, 128], strides = [1, 1]} : vector<8x384xf32> to vector<8x128xf32>
    %228 = vector.extract_strided_slice %226 {offsets = [0, 0], sizes = [8, 128], strides = [1, 1]} : vector<8x384xf32> to vector<8x128xf32>
    %229 = arith.addf %227, %228 : vector<8x128xf32>
    %230 = arith.negf %229 : vector<8x128xf32>
    %231 = math.exp %230 : vector<8x128xf32>
    %cst_77 = arith.constant 1.000000e+00 : f32
    %232 = vector.broadcast %cst_77 : f32 to vector<8x128xf32>
    %233 = arith.addf %232, %231 : vector<8x128xf32>
    %234 = arith.divf %232, %233 : vector<8x128xf32>
    %235 = vector.extract_strided_slice %223 {offsets = [0, 128], sizes = [8, 128], strides = [1, 1]} : vector<8x384xf32> to vector<8x128xf32>
    %236 = vector.extract_strided_slice %226 {offsets = [0, 128], sizes = [8, 128], strides = [1, 1]} : vector<8x384xf32> to vector<8x128xf32>
    %237 = arith.addf %235, %236 : vector<8x128xf32>
    %238 = arith.negf %237 : vector<8x128xf32>
    %239 = math.exp %238 : vector<8x128xf32>
    %cst_78 = arith.constant 1.000000e+00 : f32
    %240 = vector.broadcast %cst_78 : f32 to vector<8x128xf32>
    %241 = arith.addf %240, %239 : vector<8x128xf32>
    %242 = arith.divf %240, %241 : vector<8x128xf32>
    %243 = vector.extract_strided_slice %223 {offsets = [0, 256], sizes = [8, 128], strides = [1, 1]} : vector<8x384xf32> to vector<8x128xf32>
    %244 = vector.extract_strided_slice %226 {offsets = [0, 256], sizes = [8, 128], strides = [1, 1]} : vector<8x384xf32> to vector<8x128xf32>
    %245 = arith.addf %244, %6 : vector<8x128xf32>
    %246 = arith.mulf %234, %245 : vector<8x128xf32>
    %247 = arith.addf %243, %246 : vector<8x128xf32>
    %248 = math.tanh %247 : vector<8x128xf32>
    %cst_79 = arith.constant 1.000000e+00 : f32
    %249 = vector.broadcast %cst_79 : f32 to vector<8x128xf32>
    %250 = arith.subf %249, %242 : vector<8x128xf32>
    %251 = arith.mulf %250, %248 : vector<8x128xf32>
    %252 = arith.mulf %242, %211 : vector<8x128xf32>
    %253 = arith.addf %251, %252 : vector<8x128xf32>
    %254 = arith.truncf %253 : vector<8x128xf32> to vector<8x128xbf16>
    %c0_80 = arith.constant 0 : index
    %c0_81 = arith.constant 0 : index
    %255 = vector.load %arg5[%c0_80, %c0_81] : memref<128x128xbf16, #tpu.memory_space<vmem>>, vector<128x128xbf16>
    %cst_82 = arith.constant dense<0.000000e+00> : vector<8x128xf32>
    %256 = tpu.matmul %254, %255, %cst_82 {dimension_numbers = #tpu.dot_dimension_numbers<[1], [0], [0], [1], [0, 0, 1, 1], [], []>} : vector<8x128xbf16>, vector<128x128xbf16>, vector<8x128xf32> -> vector<8x128xf32>
    %257 = arith.addf %256, %9 : vector<8x128xf32>
    %258 = arith.index_cast %c5_i32 : i32 to index
    %c0_83 = arith.constant 0 : index
    %c0_84 = arith.constant 0 : index
    %259 = vector.load %arg7[%258, %c0_83, %c0_84] : memref<8x8x128xf32, #tpu.memory_space<vmem>>, vector<1x8x128xf32>
    %260 = vector.shape_cast %259 : vector<1x8x128xf32> to vector<8x128xf32>
    %261 = vector.shape_cast %257 : vector<8x128xf32> to vector<1x8x128xf32>
    tpu.vector_store %arg7[%258, %c0_83, %c0_84], %261 {strides = array<i32>} : memref<8x8x128xf32, #tpu.memory_space<vmem>>, vector<1x8x128xf32>,
    %c6_i32 = arith.constant 6 : i32
    %262 = arith.index_cast %c6_i32 : i32 to index
    %c0_85 = arith.constant 0 : index
    %c0_86 = arith.constant 0 : index
    %263 = vector.load %arg0[%262, %c0_85, %c0_86] : memref<8x8x384xf32, #tpu.memory_space<vmem>>, vector<1x8x384xf32>
    %264 = vector.shape_cast %263 : vector<1x8x384xf32> to vector<8x384xf32>
    %265 = arith.addf %264, %3 : vector<8x384xf32>
    %266 = arith.truncf %253 : vector<8x128xf32> to vector<8x128xbf16>
    %c0_87 = arith.constant 0 : index
    %c0_88 = arith.constant 0 : index
    %267 = vector.load %arg3[%c0_87, %c0_88] : memref<128x384xbf16, #tpu.memory_space<vmem>>, vector<128x384xbf16>
    %cst_89 = arith.constant dense<0.000000e+00> : vector<8x384xf32>
    %268 = tpu.matmul %266, %267, %cst_89 {dimension_numbers = #tpu.dot_dimension_numbers<[1], [0], [0], [1], [0, 0, 1, 1], [], []>} : vector<8x128xbf16>, vector<128x384xbf16>, vector<8x384xf32> -> vector<8x384xf32>
    %269 = vector.extract_strided_slice %265 {offsets = [0, 0], sizes = [8, 128], strides = [1, 1]} : vector<8x384xf32> to vector<8x128xf32>
    %270 = vector.extract_strided_slice %268 {offsets = [0, 0], sizes = [8, 128], strides = [1, 1]} : vector<8x384xf32> to vector<8x128xf32>
    %271 = arith.addf %269, %270 : vector<8x128xf32>
    %272 = arith.negf %271 : vector<8x128xf32>
    %273 = math.exp %272 : vector<8x128xf32>
    %cst_90 = arith.constant 1.000000e+00 : f32
    %274 = vector.broadcast %cst_90 : f32 to vector<8x128xf32>
    %275 = arith.addf %274, %273 : vector<8x128xf32>
    %276 = arith.divf %274, %275 : vector<8x128xf32>
    %277 = vector.extract_strided_slice %265 {offsets = [0, 128], sizes = [8, 128], strides = [1, 1]} : vector<8x384xf32> to vector<8x128xf32>
    %278 = vector.extract_strided_slice %268 {offsets = [0, 128], sizes = [8, 128], strides = [1, 1]} : vector<8x384xf32> to vector<8x128xf32>
    %279 = arith.addf %277, %278 : vector<8x128xf32>
    %280 = arith.negf %279 : vector<8x128xf32>
    %281 = math.exp %280 : vector<8x128xf32>
    %cst_91 = arith.constant 1.000000e+00 : f32
    %282 = vector.broadcast %cst_91 : f32 to vector<8x128xf32>
    %283 = arith.addf %282, %281 : vector<8x128xf32>
    %284 = arith.divf %282, %283 : vector<8x128xf32>
    %285 = vector.extract_strided_slice %265 {offsets = [0, 256], sizes = [8, 128], strides = [1, 1]} : vector<8x384xf32> to vector<8x128xf32>
    %286 = vector.extract_strided_slice %268 {offsets = [0, 256], sizes = [8, 128], strides = [1, 1]} : vector<8x384xf32> to vector<8x128xf32>
    %287 = arith.addf %286, %6 : vector<8x128xf32>
    %288 = arith.mulf %276, %287 : vector<8x128xf32>
    %289 = arith.addf %285, %288 : vector<8x128xf32>
    %290 = math.tanh %289 : vector<8x128xf32>
    %cst_92 = arith.constant 1.000000e+00 : f32
    %291 = vector.broadcast %cst_92 : f32 to vector<8x128xf32>
    %292 = arith.subf %291, %284 : vector<8x128xf32>
    %293 = arith.mulf %292, %290 : vector<8x128xf32>
    %294 = arith.mulf %284, %253 : vector<8x128xf32>
    %295 = arith.addf %293, %294 : vector<8x128xf32>
    %296 = arith.truncf %295 : vector<8x128xf32> to vector<8x128xbf16>
    %c0_93 = arith.constant 0 : index
    %c0_94 = arith.constant 0 : index
    %297 = vector.load %arg5[%c0_93, %c0_94] : memref<128x128xbf16, #tpu.memory_space<vmem>>, vector<128x128xbf16>
    %cst_95 = arith.constant dense<0.000000e+00> : vector<8x128xf32>
    %298 = tpu.matmul %296, %297, %cst_95 {dimension_numbers = #tpu.dot_dimension_numbers<[1], [0], [0], [1], [0, 0, 1, 1], [], []>} : vector<8x128xbf16>, vector<128x128xbf16>, vector<8x128xf32> -> vector<8x128xf32>
    %299 = arith.addf %298, %9 : vector<8x128xf32>
    %300 = arith.index_cast %c6_i32 : i32 to index
    %c0_96 = arith.constant 0 : index
    %c0_97 = arith.constant 0 : index
    %301 = vector.load %arg7[%300, %c0_96, %c0_97] : memref<8x8x128xf32, #tpu.memory_space<vmem>>, vector<1x8x128xf32>
    %302 = vector.shape_cast %301 : vector<1x8x128xf32> to vector<8x128xf32>
    %303 = vector.shape_cast %299 : vector<8x128xf32> to vector<1x8x128xf32>
    tpu.vector_store %arg7[%300, %c0_96, %c0_97], %303 {strides = array<i32>} : memref<8x8x128xf32, #tpu.memory_space<vmem>>, vector<1x8x128xf32>,
    %c7_i32 = arith.constant 7 : i32
    %304 = arith.index_cast %c7_i32 : i32 to index
    %c0_98 = arith.constant 0 : index
    %c0_99 = arith.constant 0 : index
    %305 = vector.load %arg0[%304, %c0_98, %c0_99] : memref<8x8x384xf32, #tpu.memory_space<vmem>>, vector<1x8x384xf32>
    %306 = vector.shape_cast %305 : vector<1x8x384xf32> to vector<8x384xf32>
    %307 = arith.addf %306, %3 : vector<8x384xf32>
    %308 = arith.truncf %295 : vector<8x128xf32> to vector<8x128xbf16>
    %c0_100 = arith.constant 0 : index
    %c0_101 = arith.constant 0 : index
    %309 = vector.load %arg3[%c0_100, %c0_101] : memref<128x384xbf16, #tpu.memory_space<vmem>>, vector<128x384xbf16>
    %cst_102 = arith.constant dense<0.000000e+00> : vector<8x384xf32>
    %310 = tpu.matmul %308, %309, %cst_102 {dimension_numbers = #tpu.dot_dimension_numbers<[1], [0], [0], [1], [0, 0, 1, 1], [], []>} : vector<8x128xbf16>, vector<128x384xbf16>, vector<8x384xf32> -> vector<8x384xf32>
    %311 = vector.extract_strided_slice %307 {offsets = [0, 0], sizes = [8, 128], strides = [1, 1]} : vector<8x384xf32> to vector<8x128xf32>
    %312 = vector.extract_strided_slice %310 {offsets = [0, 0], sizes = [8, 128], strides = [1, 1]} : vector<8x384xf32> to vector<8x128xf32>
    %313 = arith.addf %311, %312 : vector<8x128xf32>
    %314 = arith.negf %313 : vector<8x128xf32>
    %315 = math.exp %314 : vector<8x128xf32>
    %cst_103 = arith.constant 1.000000e+00 : f32
    %316 = vector.broadcast %cst_103 : f32 to vector<8x128xf32>
    %317 = arith.addf %316, %315 : vector<8x128xf32>
    %318 = arith.divf %316, %317 : vector<8x128xf32>
    %319 = vector.extract_strided_slice %307 {offsets = [0, 128], sizes = [8, 128], strides = [1, 1]} : vector<8x384xf32> to vector<8x128xf32>
    %320 = vector.extract_strided_slice %310 {offsets = [0, 128], sizes = [8, 128], strides = [1, 1]} : vector<8x384xf32> to vector<8x128xf32>
    %321 = arith.addf %319, %320 : vector<8x128xf32>
    %322 = arith.negf %321 : vector<8x128xf32>
    %323 = math.exp %322 : vector<8x128xf32>
    %cst_104 = arith.constant 1.000000e+00 : f32
    %324 = vector.broadcast %cst_104 : f32 to vector<8x128xf32>
    %325 = arith.addf %324, %323 : vector<8x128xf32>
    %326 = arith.divf %324, %325 : vector<8x128xf32>
    %327 = vector.extract_strided_slice %307 {offsets = [0, 256], sizes = [8, 128], strides = [1, 1]} : vector<8x384xf32> to vector<8x128xf32>
    %328 = vector.extract_strided_slice %310 {offsets = [0, 256], sizes = [8, 128], strides = [1, 1]} : vector<8x384xf32> to vector<8x128xf32>
    %329 = arith.addf %328, %6 : vector<8x128xf32>
    %330 = arith.mulf %318, %329 : vector<8x128xf32>
    %331 = arith.addf %327, %330 : vector<8x128xf32>
    %332 = math.tanh %331 : vector<8x128xf32>
    %cst_105 = arith.constant 1.000000e+00 : f32
    %333 = vector.broadcast %cst_105 : f32 to vector<8x128xf32>
    %334 = arith.subf %333, %326 : vector<8x128xf32>
    %335 = arith.mulf %334, %332 : vector<8x128xf32>
    %336 = arith.mulf %326, %295 : vector<8x128xf32>
    %337 = arith.addf %335, %336 : vector<8x128xf32>
    %338 = arith.truncf %337 : vector<8x128xf32> to vector<8x128xbf16>
    %c0_106 = arith.constant 0 : index
    %c0_107 = arith.constant 0 : index
    %339 = vector.load %arg5[%c0_106, %c0_107] : memref<128x128xbf16, #tpu.memory_space<vmem>>, vector<128x128xbf16>
    %cst_108 = arith.constant dense<0.000000e+00> : vector<8x128xf32>
    %340 = tpu.matmul %338, %339, %cst_108 {dimension_numbers = #tpu.dot_dimension_numbers<[1], [0], [0], [1], [0, 0, 1, 1], [], []>} : vector<8x128xbf16>, vector<128x128xbf16>, vector<8x128xf32> -> vector<8x128xf32>
    %341 = arith.addf %340, %9 : vector<8x128xf32>
    %342 = arith.index_cast %c7_i32 : i32 to index
    %c0_109 = arith.constant 0 : index
    %c0_110 = arith.constant 0 : index
    %343 = vector.load %arg7[%342, %c0_109, %c0_110] : memref<8x8x128xf32, #tpu.memory_space<vmem>>, vector<1x8x128xf32>
    %344 = vector.shape_cast %343 : vector<1x8x128xf32> to vector<8x128xf32>
    %345 = vector.shape_cast %341 : vector<8x128xf32> to vector<1x8x128xf32>
    tpu.vector_store %arg7[%342, %c0_109, %c0_110], %345 {strides = array<i32>} : memref<8x8x128xf32, #tpu.memory_space<vmem>>, vector<1x8x128xf32>,
    %c8_i32 = arith.constant 8 : i32
    %c0_111 = arith.constant 0 : index
    %c0_112 = arith.constant 0 : index
    %346 = vector.load %arg8[%c0_111, %c0_112] : memref<8x128xf32, #tpu.memory_space<vmem>>, vector<8x128xf32>
    tpu.vector_store %arg8[%c0_111, %c0_112], %337 {strides = array<i32>} : memref<8x128xf32, #tpu.memory_space<vmem>>, vector<8x128xf32>,
    return
  }
}

</mosaic_0001>

<bundles_post_ra>
// kernel: encoder_decoder_forward.4
= control target key start
LH: loop header
LB: loop body
LE: loop exit
PB: predicated region body
PF: predicated region fallthrough
CT: control target
= control target key end

     0   :  { %v332_v1 = vmov 0   ;;  %vm100_vm0 = vcmask 261120   ;;  %v33_v11 = vlaneseq  ;;  %s486_s1 = inlined_call_operand.vmem [shape: bf16[32,384], index: 1, kind: input, shape index: {}]   ;;  %s487_s0 = inlined_call_operand.vmem [shape: bf16[64,32], index: 0, kind: input, shape index: {}]   ;;  %s488_s2 = inlined_call_operand.vmem [shape: f32[1,384], index: 2, kind: input, shape index: {}]   ;;  %s489_s3 = inlined_call_operand.vmem [shape: f32[64,384], index: 3, kind: output, shape index: {}]  }
   0x1   :  { %v320_v0 = vld [vmem:[%s486_s1 + $0x4] ss:$12 sps:$4 sm:$0xff]   ;;  %145 = vmatprep.mubr.bf16.mxu0 %v332_v1  ;;  %175 = vmatprep.mubr.bf16.mxu1 %v332_v1  ;;  %v322_v2 = vld [vmem:[%s486_s1] ss:$12 sps:$4 sm:$0xff]   ;;  %v323_v3 = vld [vmem:[%s486_s1 + $0x1c] ss:$12 sps:$4 sm:$0xff]  }
   0x2   :  { %113 = vmatprep.subr.bf16.mxu0 %v320_v0  ;;  %315 = vmatprep.subr.bf16.mxu1 %v320_v0  ;;  %v325_v4 = vld [vmem:[%s486_s1 + $0x18] ss:$12 sps:$4 sm:$0xff]   ;;  %v328_v6 = vld [vmem:[%s486_s1 + $0x8] ss:$12 sps:$4 sm:$0xff]   ;;  %v329_v8 = vld [vmem:[%s486_s1 + $0x20] ss:$12 sps:$4 sm:$0xff]  }
   0x3   :  { %114 = vmatpush1.bf16.msra.mxu0 %v322_v2  ;;  %317 = vmatpush1.bf16.msra.mxu1 %v322_v2  ;;  %v326_v5 = vld [vmem:[%s487_s0] sm:$0xff]   ;;  %v327_v7 = vld [vmem:[%s487_s0 + $0x18] sm:$0xff]   ;;  %v330_v9 = vld [vmem:[%s487_s0 + $0x8] sm:$0xff]   ;;  %v34_v12 = vshrl.u32 %v33_v11, 7 }
   0x4   :  { %115 = vmatprep.subr.bf16.mxu0 %v323_v3  ;;  %316 = vmatprep.subr.bf16.mxu1 %v323_v3  ;;  %v331_v10 = vld [vmem:[%s487_s0 + $0x10] sm:$0xff]   ;;  %v31_v14 = vld [vmem:[%s488_s2] sm:$0x7] }
   0x5   :  { %v35_v13 = vsub.s32 0, %v34_v12  ;;  %v39_v15 = vsub.s32 1, %v34_v12  ;;  %v43_v24 = vsub.s32 2, %v34_v12 }
   0x7   :  { %116 = vmatpush1.bf16.msra.mxu0 %v325_v4  ;;  %318 = vmatpush1.bf16.msra.mxu1 %v325_v4  ;;  %v394_v16 = vrot.slane %v31_v14, %v35_v13  ;;  %v396_v17 = vrot.slane %v31_v14, %v39_v15  ;;  %v44_v35 = vrot.slane %v31_v14, %v43_v24 }
   0x8   :  { %303 = vmatprep.subr.bf16.mxu1 %v328_v6 }
   0xa   :  { %289 = vmatmul.mubr.msk.bf16.vlgmr.msra.gmra.mrb[0].mxu0 %vm100_vm0, %v326_v5  ;;  %292 = vmatmul.mubr.msk.bf16.vlgmr.msra.gmra.mrb[0].mxu1 %vm100_vm0, %v327_v7 }
   0xb   :  { %304 = vmatpush3.bf16.msra.mxu1 %v328_v6  ;;  %155 = vmatprep.mubr.bf16.mxu0 %v332_v1 }
   0xc   :  { %305 = vmatprep.subr.bf16.mxu1 %v329_v8  ;;  %307 = vmatprep.mubr.msk.bf16.mxu1 %vm100_vm0, %v326_v5 }
   0xf   :  { %306 = vmatpush3.bf16.msra.mxu1 %v329_v8 }
  0x12   :  { %290 = vmatmul.mubr.msk.bf16.gmra.mrb[4].mxu0 %vm100_vm0, %v330_v9  ;;  %308 = vmatmul.mubr.msk.bf16.vlgmr.msra.gmra.mrb[4].mxu1 %vm100_vm0, %v330_v9 }
  0x13   :  { %165 = vmatprep.mubr.bf16.mxu0 %v332_v1  ;;  %311 = vmatprep.mubr.msk.bf16.mxu1 %vm100_vm0, %v331_v10 }
  0x1a   :  { %291 = vmatmul.mubr.msk.bf16.gmra.mrb[8].mxu0 %vm100_vm0, %v331_v10  ;;  %312 = vmatmul.mubr.msk.bf16.gmra.mrb[8].mxu1 %vm100_vm0, %v327_v7 }
  0xdd   :  { %v147_v18 = vpop.f32.mrb[0].mxu0  ;;  %v177_v19 = vpop.f32.mrb[0].mxu1 }
  0xde   :  { %v148_v20 = vadd.f32 %v147_v18, %v394_v16  ;;  %v178_v21 = vadd.f32 %v177_v19, %v394_v16  ;;  %v149_v22 = vpop.f32.mrb[1].mxu0  ;;  %v179_v23 = vpop.f32.mrb[1].mxu1 }
  0xdf   :  { %v150_v25 = vadd.f32 %v149_v22, %v396_v17  ;;  %v180_v26 = vadd.f32 %v179_v23, %v396_v17  ;;  %v151_v27 = vpop.f32.mrb[2].mxu0  ;;  %v181_v28 = vpop.f32.mrb[2].mxu1 }
  0xe0   :  { %251 = vst [vmem:[%s489_s3] sm:$0xff] %v148_v20  ;;  %269 = vst [vmem:[%s489_s3 + $0x90] sm:$0xff] %v178_v21  ;;  %v152_v29 = vadd.f32 %v151_v27, %v394_v16  ;;  %v182_v30 = vadd.f32 %v181_v28, %v394_v16  ;;  %v153_v31 = vpop.f32.mrb[3].mxu0  ;;  %v183_v32 = vpop.f32.mrb[3].mxu1 }
  0xe1   :  { %252 = vst [vmem:[%s489_s3 + $0x8] sm:$0xff] %v150_v25  ;;  %270 = vst [vmem:[%s489_s3 + $0x98] sm:$0xff] %v180_v26  ;;  %v154_v33 = vadd.f32 %v153_v31, %v396_v17  ;;  %v184_v34 = vadd.f32 %v183_v32, %v396_v17 }
  0xe2   :  { %254 = vst [vmem:[%s489_s3 + $0x18] sm:$0xff] %v152_v29  ;;  %272 = vst [vmem:[%s489_s3 + $0xa8] sm:$0xff] %v182_v30 }
  0xe3   :  { %255 = vst [vmem:[%s489_s3 + $0x20] sm:$0xff] %v154_v33  ;;  %273 = vst [vmem:[%s489_s3 + $0xb0] sm:$0xff] %v184_v34 }
  0xe5   :  { %v157_v36 = vpop.f32.mrb[4].mxu0  ;;  %v309_v37 = vpop.f32.mrb[4].mxu1 }
  0xe6   :  { %v158_v38 = vadd.f32 %v157_v36, %v394_v16  ;;  %v229_v39 = vadd.f32 %v309_v37, %v44_v35  ;;  %v159_v40 = vpop.f32.mrb[5].mxu0  ;;  %v220_v41 = vpop.f32.mrb[5].mxu1 }
  0xe7   :  { %v160_v42 = vadd.f32 %v159_v40, %v396_v17  ;;  %v221_v43 = vadd.f32 %v220_v41, %v44_v35  ;;  %v161_v44 = vpop.f32.mrb[6].mxu0  ;;  %v310_v45 = vpop.f32.mrb[6].mxu1 }
  0xe8   :  { %257 = vst [vmem:[%s489_s3 + $0x30] sm:$0xff] %v158_v38  ;;  %259 = vst [vmem:[%s489_s3 + $0x40] sm:$0xff] %v229_v39  ;;  %v162_v46 = vadd.f32 %v161_v44, %v394_v16  ;;  %v232_v47 = vadd.f32 %v310_v45, %v44_v35  ;;  %v163_v48 = vpop.f32.mrb[7].mxu0  ;;  %v223_v49 = vpop.f32.mrb[7].mxu1 }
  0xe9   :  { %258 = vst [vmem:[%s489_s3 + $0x38] sm:$0xff] %v160_v42  ;;  %253 = vst [vmem:[%s489_s3 + $0x10] sm:$0xff] %v221_v43  ;;  %v164_v50 = vadd.f32 %v163_v48, %v396_v17  ;;  %v224_v51 = vadd.f32 %v223_v49, %v44_v35 }
  0xea   :  { %260 = vst [vmem:[%s489_s3 + $0x48] sm:$0xff] %v162_v46  ;;  %262 = vst [vmem:[%s489_s3 + $0x58] sm:$0xff] %v232_v47 }
  0xeb   :  { %261 = vst [vmem:[%s489_s3 + $0x50] sm:$0xff] %v164_v50  ;;  %256 = vst [vmem:[%s489_s3 + $0x28] sm:$0xff] %v224_v51 }
  0xed   :  { %v167_v52 = vpop.f32.mrb[8].mxu0  ;;  %v313_v53 = vpop.f32.mrb[8].mxu1 }
  0xee   :  { %v168_v54 = vadd.f32 %v167_v52, %v394_v16  ;;  %v245_v55 = vadd.f32 %v313_v53, %v44_v35  ;;  %v169_v56 = vpop.f32.mrb[9].mxu0  ;;  %v236_v57 = vpop.f32.mrb[9].mxu1 }
  0xef   :  { %v170_v58 = vadd.f32 %v169_v56, %v396_v17  ;;  %v237_v59 = vadd.f32 %v236_v57, %v44_v35  ;;  %v171_v60 = vpop.f32.mrb[10].mxu0  ;;  %v314_v61 = vpop.f32.mrb[10].mxu1 }
  0xf0   :  { %263 = vst [vmem:[%s489_s3 + $0x60] sm:$0xff] %v168_v54  ;;  %271 = vst [vmem:[%s489_s3 + $0xa0] sm:$0xff] %v245_v55  ;;  %v172_v62 = vadd.f32 %v171_v60, %v394_v16  ;;  %v248_v63 = vadd.f32 %v314_v61, %v44_v35  ;;  %v173_v0 = vpop.f32.mrb[11].mxu0  ;;  %v239_v1 = vpop.f32.mrb[11].mxu1 }
  0xf1   :  { %264 = vst [vmem:[%s489_s3 + $0x68] sm:$0xff] %v170_v58  ;;  %265 = vst [vmem:[%s489_s3 + $0x70] sm:$0xff] %v237_v59  ;;  %v174_v2 = vadd.f32 %v173_v0, %v396_v17  ;;  %v240_v3 = vadd.f32 %v239_v1, %v44_v35 }
  0xf2   :  { %266 = vst [vmem:[%s489_s3 + $0x78] sm:$0xff] %v172_v62  ;;  %274 = vst [vmem:[%s489_s3 + $0xb8] sm:$0xff] %v248_v63 }
  0xf3   :  { %267 = vst [vmem:[%s489_s3 + $0x80] sm:$0xff] %v174_v2  ;;  %268 = vst [vmem:[%s489_s3 + $0x88] sm:$0xff] %v240_v3 }

// kernel: encoder_decoder_forward.5
= control target key start
LH: loop header
LB: loop body
LE: loop exit
PB: predicated region body
PF: predicated region fallthrough
CT: control target
= control target key end

     0   :  { %v1469_v1 = vmov 0.0   ;;  %v1470_v2 = vmov 0   ;;  %vm1471_vm0 = vmmov 0   ;;  %s2035_s2 = inlined_call_operand.vmem [shape: bf16[128,384], index: 2, kind: input, shape index: {}]   ;;  %s2036_s1 = inlined_call_operand.vmem [shape: f32[8,128], index: 1, kind: input, shape index: {}]   ;;  %s2037_s0 = inlined_call_operand.vmem [shape: f32[8,8,384], index: 0, kind: input, shape index: {}]   ;;  %s2038_s3 = inlined_call_operand.vmem [shape: f32[1,128], index: 3, kind: input, shape index: {}]   ;;  %s2039_s4 = inlined_call_operand.vmem [shape: f32[8,128], index: 4, kind: output, shape index: {}]  }
   0x1   :  { %v1500_v0 = vld [vmem:[%s2035_s2 + $0x4] ss:$12 sps:$4 sm:$0xff]   ;;  %1188 = vmatprep.subr.bf16.mxu1 %v1469_v1  ;;  %222 = vmatprep.mubr.bf16.mxu0 %v1470_v2  ;;  %v1507_v3 = vld [vmem:[%s2035_s2] ss:$12 sps:$4 sm:$0xff]   ;;  %v1515_v4 = vld [vmem:[%s2035_s2 + $0x1c] ss:$12 sps:$4 sm:$0xff]  }
   0x2   :  { %1204 = vmatprep.mubr.msk.bf16.mxu1 %vm1471_vm0, %v1469_v1  ;;  %190 = vmatprep.subr.bf16.mxu0 %v1500_v0  ;;  %v1521_v5 = vld [vmem:[%s2035_s2 + $0x18] ss:$12 sps:$4 sm:$0xff]   ;;  %v1527_v6 = vld [vmem:[%s2035_s2 + $0x34] ss:$12 sps:$4 sm:$0xff]   ;;  %v1533_v7 = vld [vmem:[%s2035_s2 + $0x30] ss:$12 sps:$4 sm:$0xff]  }
   0x3   :  { %191 = vmatpush1.bf16.msra.mxu0 %v1507_v3  ;;  %v1539_v8 = vld [vmem:[%s2035_s2 + $0x4c] ss:$12 sps:$4 sm:$0xff]   ;;  %v1544_v9 = vld [vmem:[%s2035_s2 + $0x8] ss:$12 sps:$4 sm:$0xff]   ;;  %v1557_v11 = vld [vmem:[%s2035_s2 + $0x64] ss:$12 sps:$4 sm:$0xff]  }
   0x4   :  { %192 = vmatprep.subr.bf16.mxu0 %v1515_v4  ;;  %v1550_v10 = vld [vmem:[%s2035_s2 + $0x48] ss:$12 sps:$4 sm:$0xff]   ;;  %1189 = vmatpush3.bf16.msra.mxu1 %v1544_v9  ;;  %v1563_v12 = vld [vmem:[%s2035_s2 + $0x20] ss:$12 sps:$4 sm:$0xff]   ;;  %v1575_v14 = vld [vmem:[%s2035_s2 + $0x38] ss:$12 sps:$4 sm:$0xff]  }
   0x5   :  { %1190 = vmatprep.subr.bf16.mxu1 %v1469_v1  ;;  %v1568_v13 = vld [vmem:[%s2035_s2 + $0x60] ss:$12 sps:$4 sm:$0xff]   ;;  %v1581_v15 = vld [vmem:[%s2035_s2 + $0x7c] ss:$12 sps:$4 sm:$0xff]   ;;  %v1588_v16 = vld [vmem:[%s2035_s2 + $0x78] ss:$12 sps:$4 sm:$0xff]  }
   0x6   :  { %v1594_v17 = vld [vmem:[%s2035_s2 + $0x50] ss:$12 sps:$4 sm:$0xff]   ;;  %v1600_v18 = vld [vmem:[%s2035_s2 + $0x94] ss:$12 sps:$4 sm:$0xff]   ;;  %v1619_v21 = vld [vmem:[%s2035_s2 + $0xac] ss:$12 sps:$4 sm:$0xff]  }
   0x7   :  { %193 = vmatpush1.bf16.msra.mxu0 %v1521_v5  ;;  %v1607_v19 = vld [vmem:[%s2035_s2 + $0x90] ss:$12 sps:$4 sm:$0xff]   ;;  %v1613_v20 = vld [vmem:[%s2035_s2 + $0x68] ss:$12 sps:$4 sm:$0xff]   ;;  %v1631_v23 = vld [vmem:[%s2036_s1] sm:$0xff] }
   0x8   :  { %194 = vmatprep.subr.bf16.mxu0 %v1527_v6  ;;  %1191 = vmatpush3.bf16.msra.mxu1 %v1563_v12  ;;  %v1626_v22 = vld [vmem:[%s2035_s2 + $0xa8] ss:$12 sps:$4 sm:$0xff]   ;;  %v1637_v24 = vld [vmem:[%s2035_s2 + $0x80] ss:$12 sps:$4 sm:$0xff]   ;;  %v29_v25 = vpack.c.bf16 %v1631_v23, %v1631_v23  ;;  %v1648_v26 = vld [vmem:[%s2035_s2 + $0x98] ss:$12 sps:$4 sm:$0xff]  }
   0x9   :  { %1192 = vmatprep.subr.bf16.mxu1 %v1469_v1  ;;  %v1656_v27 = vld [vmem:[%s2035_s2 + $0xb0] ss:$12 sps:$4 sm:$0xff]   ;;  %v26_v28 = vld [vmem:[%s2037_s0] sm:$0xff]  ;;  %v27_v31 = vld [vmem:[%s2037_s0 + $0x8] sm:$0xff] }
   0xa   :  { %v1705_v45 = vld [vmem:[%s2038_s3] ss:$0 sm:$0xff]  ;;  %v28_v49 = vld [vmem:[%s2037_s0 + $0x10] sm:$0xff]  ;;  %v1081_v59 = vld [vmem:[%s2037_s0 + $0x18] sm:$0xff] }
   0xb   :  { %195 = vmatpush1.bf16.msra.mxu0 %v1533_v7  ;;  %v1082_v63 = vld [vmem:[%s2037_s0 + $0x20] sm:$0xff] }
   0xc   :  { %196 = vmatprep.subr.bf16.mxu0 %v1539_v8  ;;  %1193 = vmatpush3.bf16.msra.mxu1 %v1575_v14 }
   0xd   :  { %1194 = vmatprep.subr.bf16.mxu1 %v1469_v1 }
   0xf   :  { %197 = vmatpush1.bf16.msra.mxu0 %v1550_v10 }
  0x10   :  { %198 = vmatprep.subr.bf16.mxu0 %v1557_v11  ;;  %1195 = vmatpush3.bf16.msra.mxu1 %v1594_v17 }
  0x11   :  { %1196 = vmatprep.subr.bf16.mxu1 %v1469_v1 }
  0x13   :  { %199 = vmatpush1.bf16.msra.mxu0 %v1568_v13 }
  0x14   :  { %200 = vmatprep.subr.bf16.mxu0 %v1581_v15  ;;  %1197 = vmatpush3.bf16.msra.mxu1 %v1613_v20 }
  0x15   :  { %1198 = vmatprep.subr.bf16.mxu1 %v1469_v1 }
  0x17   :  { %201 = vmatpush1.bf16.msra.mxu0 %v1588_v16 }
  0x18   :  { %202 = vmatprep.subr.bf16.mxu0 %v1600_v18  ;;  %1199 = vmatpush3.bf16.msra.mxu1 %v1637_v24 }
  0x19   :  { %1200 = vmatprep.subr.bf16.mxu1 %v1469_v1 }
  0x1b   :  { %203 = vmatpush1.bf16.msra.mxu0 %v1607_v19 }
  0x1c   :  { %204 = vmatprep.subr.bf16.mxu0 %v1619_v21  ;;  %1201 = vmatpush3.bf16.msra.mxu1 %v1648_v26 }
  0x1d   :  { %1202 = vmatprep.subr.bf16.mxu1 %v1469_v1 }
  0x1f   :  { %205 = vmatpush1.bf16.msra.mxu0 %v1626_v22 }
  0x20   :  { %298 = vmatprep.subr.bf16.mxu0 %v1500_v0  ;;  %1203 = vmatpush3.bf16.msra.mxu1 %v1656_v27 }
  0x21   :  { %1208 = vmatprep.subr.bf16.mxu1 %v1469_v1 }
  0x22   :  { %223 = vmatmul.mubr.bf16.vlgmr.msra.gmra.mrb[0].mxu0 %v29_v25 }
  0x23   :  { %299 = vmatpush1.bf16.msra.mxu0 %v1507_v3  ;;  %330 = vmatprep.mubr.bf16.mxu0 %v1470_v2 }
  0x24   :  { %300 = vmatprep.subr.bf16.mxu0 %v1515_v4  ;;  %1205 = vmatmul.mubr.bf16.vlgmr.msra.gmra.mrb[0].mxu1 %v29_v25 }
  0x25   :  { %1209 = vmatpush3.bf16.msra.mxu1 %v1544_v9  ;;  %1224 = vmatprep.mubr.msk.bf16.mxu1 %vm1471_vm0, %v1469_v1 }
  0x26   :  { %1210 = vmatprep.subr.bf16.mxu1 %v1469_v1 }
  0x27   :  { %301 = vmatpush1.bf16.msra.mxu0 %v1521_v5 }
  0x28   :  { %302 = vmatprep.subr.bf16.mxu0 %v1527_v6 }
  0x29   :  { %1211 = vmatpush3.bf16.msra.mxu1 %v1563_v12 }
  0x2a   :  { %1212 = vmatprep.subr.bf16.mxu1 %v1469_v1 }
  0x2b   :  { %303 = vmatpush1.bf16.msra.mxu0 %v1533_v7 }
  0x2c   :  { %304 = vmatprep.subr.bf16.mxu0 %v1539_v8 }
  0x2d   :  { %1213 = vmatpush3.bf16.msra.mxu1 %v1575_v14 }
  0x2e   :  { %1214 = vmatprep.subr.bf16.mxu1 %v1469_v1 }
  0x2f   :  { %305 = vmatpush1.bf16.msra.mxu0 %v1550_v10 }
  0x30   :  { %306 = vmatprep.subr.bf16.mxu0 %v1557_v11 }
  0x31   :  { %1215 = vmatpush3.bf16.msra.mxu1 %v1594_v17 }
  0x32   :  { %1216 = vmatprep.subr.bf16.mxu1 %v1469_v1 }
  0x33   :  { %307 = vmatpush1.bf16.msra.mxu0 %v1568_v13 }
  0x34   :  { %308 = vmatprep.subr.bf16.mxu0 %v1581_v15 }
  0x35   :  { %1217 = vmatpush3.bf16.msra.mxu1 %v1613_v20 }
  0x36   :  { %1218 = vmatprep.subr.bf16.mxu1 %v1469_v1 }
  0x37   :  { %309 = vmatpush1.bf16.msra.mxu0 %v1588_v16 }
  0x38   :  { %310 = vmatprep.subr.bf16.mxu0 %v1600_v18 }
  0x39   :  { %1219 = vmatpush3.bf16.msra.mxu1 %v1637_v24 }
  0x3a   :  { %1220 = vmatprep.subr.bf16.mxu1 %v1469_v1 }
  0x3b   :  { %311 = vmatpush1.bf16.msra.mxu0 %v1607_v19 }
  0x3c   :  { %312 = vmatprep.subr.bf16.mxu0 %v1619_v21 }
  0x3d   :  { %1221 = vmatpush3.bf16.msra.mxu1 %v1648_v26 }
  0x3e   :  { %1222 = vmatprep.subr.bf16.mxu1 %v1469_v1 }
  0x3f   :  { %313 = vmatpush1.bf16.msra.mxu0 %v1626_v22 }
  0x40   :  { %406 = vmatprep.subr.bf16.mxu0 %v1500_v0 }
  0x41   :  { %1223 = vmatpush3.bf16.msra.mxu1 %v1656_v27 }
  0x42   :  { %1228 = vmatprep.subr.bf16.mxu1 %v1469_v1 }
  0xf5   :  { %v224_v29 = vpop.f32.mrb[0].mxu0 }
  0xf6   :  { %v271_v30 = vadd.f32 %v224_v29, %v26_v28  ;;  %v226_v32 = vpop.f32.mrb[1].mxu0 }
  0xf7   :  { %v228_v33 = vpop.f32.mrb[2].mxu0  ;;  %v278_v36 = vadd.f32 %v226_v32, %v27_v31  ;;  %v265_v38 = vpop.f32.mrb[0].mxu1 }
  0xf8   :  { %v1079_v34 = vmul.f32 -1.442695, %v271_v30  ;;  %v229_v35 = vpop.f32.mrb[3].mxu0  ;;  %v1206_v39 = vpop.f32.mrb[1].mxu1  ;;  %v285_v47 = vadd.f32 %v1705_v45, %v265_v38 }
  0xf9   :  { %v1080_v37 = vmul.f32 -1.442695, %v278_v36  ;;  %v268_v40 = vpop.f32.mrb[2].mxu1 }
  0xfa   :  { %1383 = vpow2.f32 %v1079_v34  ;;  %v1207_v41 = vpop.f32.mrb[3].mxu1 }
  0xfb   :  { %1385 = vpow2.f32 %v1080_v37  ;;  %v1083_v41 = vld [vmem:[%s2037_s0 + $0x28] sm:$0xff] }
 0x104   :  { %v1384_v42 = vpop.eup %1383 }
 0x105   :  { %v275_v43 = vadd.f32 1.0, %v1384_v42  ;;  %v1386_v44 = vpop.eup %1385 }
 0x106   :  { %v282_v46 = vadd.f32 1.0, %v1386_v44 }
 0x107   :  { %1387 = vrcp.f32 %v275_v43 }
 0x108   :  { %1389 = vrcp.f32 %v282_v46 }
 0x111   :  { %v1388_v48 = vpop.eup %1387 }
 0x112   :  { %v286_v50 = vmul.f32 %v1388_v48, %v285_v47  ;;  %v1390_v52 = vpop.eup %1389 }
 0x113   :  { %v289_v53 = vsub.f32 1.0, %v1390_v52  ;;  %v291_v56 = vmul.f32 %v1390_v52, %v1631_v23  ;;  %v1086_v52 = vld [vmem:[%s2037_s0 + $0x30] sm:$0xff] }
 0x114   :  { %v287_v51 = vadd.f32 %v286_v50, %v28_v49 }
 0x116   :  { %1391 = vtanh.f32 %v287_v51 }
 0x120   :  { %v1392_v54 = vpop.eup %1391 }
 0x121   :  { %v290_v55 = vmul.f32 %v1392_v54, %v289_v53 }
 0x123   :  { %v1712_v57 = vadd.f32 %v291_v56, %v290_v55  ;;  %v1087_v56 = vld [vmem:[%s2037_s0 + $0x38] sm:$0xff] }
 0x125   :  { %v297_v58 = vpack.c.bf16 %v1712_v57, %v1712_v57 }
 0x127   :  { %331 = vmatmul.mubr.bf16.vlgmr.msra.gmra.mrb[4].mxu0 %v297_v58  ;;  %1225 = vmatmul.mubr.bf16.vlgmr.msra.gmra.mrb[4].mxu1 %v297_v58 }
 0x128   :  { %407 = vmatpush1.bf16.msra.mxu0 %v1507_v3  ;;  %1229 = vmatpush3.bf16.msra.mxu1 %v1544_v9 }
 0x129   :  { %408 = vmatprep.subr.bf16.mxu0 %v1515_v4  ;;  %1230 = vmatprep.subr.bf16.mxu1 %v1469_v1 }
 0x12a   :  { %438 = vmatprep.mubr.bf16.mxu0 %v1470_v2  ;;  %1244 = vmatprep.mubr.msk.bf16.mxu1 %vm1471_vm0, %v1469_v1 }
 0x12c   :  { %409 = vmatpush1.bf16.msra.mxu0 %v1521_v5  ;;  %1231 = vmatpush3.bf16.msra.mxu1 %v1563_v12 }
 0x12d   :  { %410 = vmatprep.subr.bf16.mxu0 %v1527_v6  ;;  %1232 = vmatprep.subr.bf16.mxu1 %v1469_v1 }
 0x130   :  { %411 = vmatpush1.bf16.msra.mxu0 %v1533_v7  ;;  %1233 = vmatpush3.bf16.msra.mxu1 %v1575_v14 }
 0x131   :  { %412 = vmatprep.subr.bf16.mxu0 %v1539_v8  ;;  %1234 = vmatprep.subr.bf16.mxu1 %v1469_v1 }
 0x134   :  { %413 = vmatpush1.bf16.msra.mxu0 %v1550_v10  ;;  %1235 = vmatpush3.bf16.msra.mxu1 %v1594_v17 }
 0x135   :  { %414 = vmatprep.subr.bf16.mxu0 %v1557_v11  ;;  %1236 = vmatprep.subr.bf16.mxu1 %v1469_v1 }
 0x138   :  { %415 = vmatpush1.bf16.msra.mxu0 %v1568_v13  ;;  %1237 = vmatpush3.bf16.msra.mxu1 %v1613_v20 }
 0x139   :  { %416 = vmatprep.subr.bf16.mxu0 %v1581_v15  ;;  %1238 = vmatprep.subr.bf16.mxu1 %v1469_v1 }
 0x13c   :  { %417 = vmatpush1.bf16.msra.mxu0 %v1588_v16  ;;  %1239 = vmatpush3.bf16.msra.mxu1 %v1637_v24 }
 0x13d   :  { %418 = vmatprep.subr.bf16.mxu0 %v1600_v18  ;;  %1240 = vmatprep.subr.bf16.mxu1 %v1469_v1 }
 0x140   :  { %419 = vmatpush1.bf16.msra.mxu0 %v1607_v19  ;;  %1241 = vmatpush3.bf16.msra.mxu1 %v1648_v26 }
 0x141   :  { %420 = vmatprep.subr.bf16.mxu0 %v1619_v21  ;;  %1242 = vmatprep.subr.bf16.mxu1 %v1469_v1 }
 0x144   :  { %421 = vmatpush1.bf16.msra.mxu0 %v1626_v22  ;;  %1243 = vmatpush3.bf16.msra.mxu1 %v1656_v27 }
 0x145   :  { %514 = vmatprep.subr.bf16.mxu0 %v1500_v0  ;;  %1248 = vmatprep.subr.bf16.mxu1 %v1469_v1 }
 0x1fa   :  { %v332_v60 = vpop.f32.mrb[4].mxu0  ;;  %v373_v61 = vpop.f32.mrb[4].mxu1 }
 0x1fb   :  { %v379_v62 = vadd.f32 %v1081_v59, %v332_v60  ;;  %v334_v23 = vpop.f32.mrb[5].mxu0  ;;  %v1226_v25 = vpop.f32.mrb[5].mxu1  ;;  %v393_v39 = vadd.f32 %v1705_v45, %v373_v61 }
 0x1fc   :  { %v336_v28 = vpop.f32.mrb[6].mxu0  ;;  %v376_v29 = vpop.f32.mrb[6].mxu1  ;;  %v386_v33 = vadd.f32 %v1082_v63, %v334_v23 }
 0x1fd   :  { %v1084_v30 = vmul.f32 -1.442695, %v379_v62  ;;  %v337_v31 = vpop.f32.mrb[7].mxu0  ;;  %v1227_v32 = vpop.f32.mrb[7].mxu1 }
 0x1fe   :  { %v1085_v34 = vmul.f32 -1.442695, %v386_v33 }
 0x1ff   :  { %1393 = vpow2.f32 %v1084_v30 }
 0x200   :  { %1395 = vpow2.f32 %v1085_v34  ;;  %v1088_v34 = vld [vmem:[%s2037_s0 + $0x40] sm:$0xff] }
 0x209   :  { %v1394_v35 = vpop.eup %1393 }
 0x20a   :  { %v383_v36 = vadd.f32 1.0, %v1394_v35  ;;  %v1396_v37 = vpop.eup %1395 }
 0x20b   :  { %v390_v38 = vadd.f32 1.0, %v1396_v37 }
 0x20c   :  { %1397 = vrcp.f32 %v383_v36 }
 0x20d   :  { %1399 = vrcp.f32 %v390_v38 }
 0x216   :  { %v1398_v40 = vpop.eup %1397 }
 0x217   :  { %v394_v42 = vmul.f32 %v1398_v40, %v393_v39  ;;  %v1400_v44 = vpop.eup %1399 }
 0x218   :  { %v397_v46 = vsub.f32 1.0, %v1400_v44  ;;  %v399_v49 = vmul.f32 %v1400_v44, %v1712_v57  ;;  %v1091_v44 = vld [vmem:[%s2037_s0 + $0x48] sm:$0xff] }
 0x219   :  { %v395_v43 = vadd.f32 %v1083_v41, %v394_v42 }
 0x21b   :  { %1401 = vtanh.f32 %v395_v43 }
 0x225   :  { %v1402_v47 = vpop.eup %1401 }
 0x226   :  { %v398_v48 = vmul.f32 %v1402_v47, %v397_v46 }
 0x228   :  { %v1762_v50 = vadd.f32 %v399_v49, %v398_v48  ;;  %v1092_v49 = vld [vmem:[%s2037_s0 + $0x50] sm:$0xff] }
 0x22a   :  { %v405_v51 = vpack.c.bf16 %v1762_v50, %v1762_v50 }
 0x22c   :  { %439 = vmatmul.mubr.bf16.vlgmr.msra.gmra.mrb[8].mxu0 %v405_v51  ;;  %1245 = vmatmul.mubr.bf16.vlgmr.msra.gmra.mrb[8].mxu1 %v405_v51 }
 0x22d   :  { %515 = vmatpush1.bf16.msra.mxu0 %v1507_v3  ;;  %1249 = vmatpush3.bf16.msra.mxu1 %v1544_v9 }
 0x22e   :  { %516 = vmatprep.subr.bf16.mxu0 %v1515_v4  ;;  %1250 = vmatprep.subr.bf16.mxu1 %v1469_v1 }
 0x22f   :  { %546 = vmatprep.mubr.bf16.mxu0 %v1470_v2  ;;  %1264 = vmatprep.mubr.msk.bf16.mxu1 %vm1471_vm0, %v1469_v1 }
 0x231   :  { %517 = vmatpush1.bf16.msra.mxu0 %v1521_v5  ;;  %1251 = vmatpush3.bf16.msra.mxu1 %v1563_v12 }
 0x232   :  { %518 = vmatprep.subr.bf16.mxu0 %v1527_v6  ;;  %1252 = vmatprep.subr.bf16.mxu1 %v1469_v1 }
 0x235   :  { %519 = vmatpush1.bf16.msra.mxu0 %v1533_v7  ;;  %1253 = vmatpush3.bf16.msra.mxu1 %v1575_v14 }
 0x236   :  { %520 = vmatprep.subr.bf16.mxu0 %v1539_v8  ;;  %1254 = vmatprep.subr.bf16.mxu1 %v1469_v1 }
 0x239   :  { %521 = vmatpush1.bf16.msra.mxu0 %v1550_v10  ;;  %1255 = vmatpush3.bf16.msra.mxu1 %v1594_v17 }
 0x23a   :  { %522 = vmatprep.subr.bf16.mxu0 %v1557_v11  ;;  %1256 = vmatprep.subr.bf16.mxu1 %v1469_v1 }
 0x23d   :  { %523 = vmatpush1.bf16.msra.mxu0 %v1568_v13  ;;  %1257 = vmatpush3.bf16.msra.mxu1 %v1613_v20 }
 0x23e   :  { %524 = vmatprep.subr.bf16.mxu0 %v1581_v15  ;;  %1258 = vmatprep.subr.bf16.mxu1 %v1469_v1 }
 0x241   :  { %525 = vmatpush1.bf16.msra.mxu0 %v1588_v16  ;;  %1259 = vmatpush3.bf16.msra.mxu1 %v1637_v24 }
 0x242   :  { %526 = vmatprep.subr.bf16.mxu0 %v1600_v18  ;;  %1260 = vmatprep.subr.bf16.mxu1 %v1469_v1 }
 0x245   :  { %527 = vmatpush1.bf16.msra.mxu0 %v1607_v19  ;;  %1261 = vmatpush3.bf16.msra.mxu1 %v1648_v26 }
 0x246   :  { %528 = vmatprep.subr.bf16.mxu0 %v1619_v21  ;;  %1262 = vmatprep.subr.bf16.mxu1 %v1469_v1 }
 0x249   :  { %529 = vmatpush1.bf16.msra.mxu0 %v1626_v22  ;;  %1263 = vmatpush3.bf16.msra.mxu1 %v1656_v27 }
 0x24a   :  { %622 = vmatprep.subr.bf16.mxu0 %v1500_v0  ;;  %1268 = vmatprep.subr.bf16.mxu1 %v1469_v1 }
 0x2ff   :  { %v440_v53 = vpop.f32.mrb[8].mxu0  ;;  %v481_v54 = vpop.f32.mrb[8].mxu1 }
 0x300   :  { %v487_v55 = vadd.f32 %v1086_v52, %v440_v53  ;;  %v442_v57 = vpop.f32.mrb[9].mxu0  ;;  %v1246_v58 = vpop.f32.mrb[9].mxu1  ;;  %v501_v32 = vadd.f32 %v1705_v45, %v481_v54 }
 0x301   :  { %v444_v59 = vpop.f32.mrb[10].mxu0  ;;  %v484_v60 = vpop.f32.mrb[10].mxu1  ;;  %v494_v23 = vadd.f32 %v1087_v56, %v442_v57 }
 0x302   :  { %v1089_v61 = vmul.f32 -1.442695, %v487_v55  ;;  %v445_v62 = vpop.f32.mrb[11].mxu0  ;;  %v1247_v63 = vpop.f32.mrb[11].mxu1 }
 0x303   :  { %v1090_v25 = vmul.f32 -1.442695, %v494_v23 }
 0x304   :  { %1403 = vpow2.f32 %v1089_v61 }
 0x305   :  { %1405 = vpow2.f32 %v1090_v25  ;;  %v1093_v25 = vld [vmem:[%s2037_s0 + $0x58] sm:$0xff] }
 0x30e   :  { %v1404_v28 = vpop.eup %1403 }
 0x30f   :  { %v491_v29 = vadd.f32 1.0, %v1404_v28  ;;  %v1406_v30 = vpop.eup %1405 }
 0x310   :  { %v498_v31 = vadd.f32 1.0, %v1406_v30 }
 0x311   :  { %1407 = vrcp.f32 %v491_v29 }
 0x312   :  { %1409 = vrcp.f32 %v498_v31 }
 0x31b   :  { %v1408_v33 = vpop.eup %1407 }
 0x31c   :  { %v502_v35 = vmul.f32 %v1408_v33, %v501_v32  ;;  %v1410_v37 = vpop.eup %1409 }
 0x31d   :  { %v505_v38 = vsub.f32 1.0, %v1410_v37  ;;  %v507_v41 = vmul.f32 %v1410_v37, %v1762_v50  ;;  %v1096_v37 = vld [vmem:[%s2037_s0 + $0x60] sm:$0xff] }
 0x31e   :  { %v503_v36 = vadd.f32 %v1088_v34, %v502_v35 }
 0x320   :  { %1411 = vtanh.f32 %v503_v36 }
 0x32a   :  { %v1412_v39 = vpop.eup %1411 }
 0x32b   :  { %v506_v40 = vmul.f32 %v1412_v39, %v505_v38 }
 0x32d   :  { %v1812_v42 = vadd.f32 %v507_v41, %v506_v40  ;;  %v1097_v41 = vld [vmem:[%s2037_s0 + $0x68] sm:$0xff] }
 0x32f   :  { %v513_v43 = vpack.c.bf16 %v1812_v42, %v1812_v42 }
 0x331   :  { %547 = vmatmul.mubr.bf16.vlgmr.msra.gmra.mrb[12].mxu0 %v513_v43  ;;  %1265 = vmatmul.mubr.bf16.vlgmr.msra.gmra.mrb[12].mxu1 %v513_v43 }
 0x332   :  { %623 = vmatpush1.bf16.msra.mxu0 %v1507_v3  ;;  %1269 = vmatpush3.bf16.msra.mxu1 %v1544_v9 }
 0x333   :  { %624 = vmatprep.subr.bf16.mxu0 %v1515_v4  ;;  %1270 = vmatprep.subr.bf16.mxu1 %v1469_v1 }
 0x334   :  { %654 = vmatprep.mubr.bf16.mxu0 %v1470_v2  ;;  %1284 = vmatprep.mubr.msk.bf16.mxu1 %vm1471_vm0, %v1469_v1 }
 0x336   :  { %625 = vmatpush1.bf16.msra.mxu0 %v1521_v5  ;;  %1271 = vmatpush3.bf16.msra.mxu1 %v1563_v12 }
 0x337   :  { %626 = vmatprep.subr.bf16.mxu0 %v1527_v6  ;;  %1272 = vmatprep.subr.bf16.mxu1 %v1469_v1 }
 0x33a   :  { %627 = vmatpush1.bf16.msra.mxu0 %v1533_v7  ;;  %1273 = vmatpush3.bf16.msra.mxu1 %v1575_v14 }
 0x33b   :  { %628 = vmatprep.subr.bf16.mxu0 %v1539_v8  ;;  %1274 = vmatprep.subr.bf16.mxu1 %v1469_v1 }
 0x33e   :  { %629 = vmatpush1.bf16.msra.mxu0 %v1550_v10  ;;  %1275 = vmatpush3.bf16.msra.mxu1 %v1594_v17 }
 0x33f   :  { %630 = vmatprep.subr.bf16.mxu0 %v1557_v11  ;;  %1276 = vmatprep.subr.bf16.mxu1 %v1469_v1 }
 0x342   :  { %631 = vmatpush1.bf16.msra.mxu0 %v1568_v13  ;;  %1277 = vmatpush3.bf16.msra.mxu1 %v1613_v20 }
 0x343   :  { %632 = vmatprep.subr.bf16.mxu0 %v1581_v15  ;;  %1278 = vmatprep.subr.bf16.mxu1 %v1469_v1 }
 0x346   :  { %633 = vmatpush1.bf16.msra.mxu0 %v1588_v16  ;;  %1279 = vmatpush3.bf16.msra.mxu1 %v1637_v24 }
 0x347   :  { %634 = vmatprep.subr.bf16.mxu0 %v1600_v18  ;;  %1280 = vmatprep.subr.bf16.mxu1 %v1469_v1 }
 0x34a   :  { %635 = vmatpush1.bf16.msra.mxu0 %v1607_v19  ;;  %1281 = vmatpush3.bf16.msra.mxu1 %v1648_v26 }
 0x34b   :  { %636 = vmatprep.subr.bf16.mxu0 %v1619_v21  ;;  %1282 = vmatprep.subr.bf16.mxu1 %v1469_v1 }
 0x34e   :  { %637 = vmatpush1.bf16.msra.mxu0 %v1626_v22  ;;  %1283 = vmatpush3.bf16.msra.mxu1 %v1656_v27 }
 0x34f   :  { %730 = vmatprep.subr.bf16.mxu0 %v1500_v0  ;;  %1288 = vmatprep.subr.bf16.mxu1 %v1469_v1 }
 0x404   :  { %v548_v46 = vpop.f32.mrb[12].mxu0  ;;  %v589_v47 = vpop.f32.mrb[12].mxu1 }
 0x405   :  { %v595_v48 = vadd.f32 %v1091_v44, %v548_v46  ;;  %v550_v50 = vpop.f32.mrb[13].mxu0  ;;  %v1266_v51 = vpop.f32.mrb[13].mxu1  ;;  %v609_v63 = vadd.f32 %v1705_v45, %v589_v47 }
 0x406   :  { %v552_v52 = vpop.f32.mrb[14].mxu0  ;;  %v592_v53 = vpop.f32.mrb[14].mxu1  ;;  %v602_v57 = vadd.f32 %v1092_v49, %v550_v50 }
 0x407   :  { %v1094_v54 = vmul.f32 -1.442695, %v595_v48  ;;  %v553_v55 = vpop.f32.mrb[15].mxu0  ;;  %v1267_v56 = vpop.f32.mrb[15].mxu1 }
 0x408   :  { %v1095_v58 = vmul.f32 -1.442695, %v602_v57 }
 0x409   :  { %1413 = vpow2.f32 %v1094_v54 }
 0x40a   :  { %1415 = vpow2.f32 %v1095_v58  ;;  %v1098_v58 = vld [vmem:[%s2037_s0 + $0x70] sm:$0xff] }
 0x413   :  { %v1414_v59 = vpop.eup %1413 }
 0x414   :  { %v599_v60 = vadd.f32 1.0, %v1414_v59  ;;  %v1416_v61 = vpop.eup %1415 }
 0x415   :  { %v606_v62 = vadd.f32 1.0, %v1416_v61 }
 0x416   :  { %1417 = vrcp.f32 %v599_v60 }
 0x417   :  { %1419 = vrcp.f32 %v606_v62 }
 0x420   :  { %v1418_v23 = vpop.eup %1417 }
 0x421   :  { %v610_v28 = vmul.f32 %v1418_v23, %v609_v63  ;;  %v1420_v30 = vpop.eup %1419 }
 0x422   :  { %v613_v31 = vsub.f32 1.0, %v1420_v30  ;;  %v615_v34 = vmul.f32 %v1420_v30, %v1812_v42 }
 0x423   :  { %v611_v29 = vadd.f32 %v1093_v25, %v610_v28 }
 0x425   :  { %1421 = vtanh.f32 %v611_v29 }
 0x42f   :  { %v1422_v32 = vpop.eup %1421 }
 0x430   :  { %v614_v33 = vmul.f32 %v1422_v32, %v613_v31 }
 0x432   :  { %v1862_v35 = vadd.f32 %v615_v34, %v614_v33 }
 0x434   :  { %v621_v36 = vpack.c.bf16 %v1862_v35, %v1862_v35 }
 0x436   :  { %655 = vmatmul.mubr.bf16.vlgmr.msra.gmra.mrb[16].mxu0 %v621_v36  ;;  %1285 = vmatmul.mubr.bf16.vlgmr.msra.gmra.mrb[16].mxu1 %v621_v36 }
 0x437   :  { %731 = vmatpush1.bf16.msra.mxu0 %v1507_v3  ;;  %1289 = vmatpush3.bf16.msra.mxu1 %v1544_v9 }
 0x438   :  { %732 = vmatprep.subr.bf16.mxu0 %v1515_v4  ;;  %1290 = vmatprep.subr.bf16.mxu1 %v1469_v1 }
 0x439   :  { %762 = vmatprep.mubr.bf16.mxu0 %v1470_v2  ;;  %1304 = vmatprep.mubr.msk.bf16.mxu1 %vm1471_vm0, %v1469_v1 }
 0x43b   :  { %733 = vmatpush1.bf16.msra.mxu0 %v1521_v5  ;;  %1291 = vmatpush3.bf16.msra.mxu1 %v1563_v12 }
 0x43c   :  { %734 = vmatprep.subr.bf16.mxu0 %v1527_v6  ;;  %1292 = vmatprep.subr.bf16.mxu1 %v1469_v1 }
 0x43f   :  { %735 = vmatpush1.bf16.msra.mxu0 %v1533_v7  ;;  %1293 = vmatpush3.bf16.msra.mxu1 %v1575_v14 }
 0x440   :  { %736 = vmatprep.subr.bf16.mxu0 %v1539_v8  ;;  %1294 = vmatprep.subr.bf16.mxu1 %v1469_v1 }
 0x443   :  { %737 = vmatpush1.bf16.msra.mxu0 %v1550_v10  ;;  %1295 = vmatpush3.bf16.msra.mxu1 %v1594_v17 }
 0x444   :  { %738 = vmatprep.subr.bf16.mxu0 %v1557_v11  ;;  %1296 = vmatprep.subr.bf16.mxu1 %v1469_v1 }
 0x447   :  { %739 = vmatpush1.bf16.msra.mxu0 %v1568_v13  ;;  %1297 = vmatpush3.bf16.msra.mxu1 %v1613_v20 }
 0x448   :  { %740 = vmatprep.subr.bf16.mxu0 %v1581_v15  ;;  %1298 = vmatprep.subr.bf16.mxu1 %v1469_v1 }
 0x44b   :  { %741 = vmatpush1.bf16.msra.mxu0 %v1588_v16  ;;  %1299 = vmatpush3.bf16.msra.mxu1 %v1637_v24 }
 0x44c   :  { %742 = vmatprep.subr.bf16.mxu0 %v1600_v18  ;;  %1300 = vmatprep.subr.bf16.mxu1 %v1469_v1 }
 0x44f   :  { %743 = vmatpush1.bf16.msra.mxu0 %v1607_v19  ;;  %1301 = vmatpush3.bf16.msra.mxu1 %v1648_v26 }
 0x450   :  { %744 = vmatprep.subr.bf16.mxu0 %v1619_v21  ;;  %1302 = vmatprep.subr.bf16.mxu1 %v1469_v1 }
 0x453   :  { %745 = vmatpush1.bf16.msra.mxu0 %v1626_v22  ;;  %1303 = vmatpush3.bf16.msra.mxu1 %v1656_v27 }
 0x454   :  { %838 = vmatprep.subr.bf16.mxu0 %v1500_v0  ;;  %1308 = vmatprep.subr.bf16.mxu1 %v1469_v1 }
 0x509   :  { %v656_v38 = vpop.f32.mrb[16].mxu0  ;;  %v697_v39 = vpop.f32.mrb[16].mxu1 }
 0x50a   :  { %v703_v40 = vadd.f32 %v1096_v37, %v656_v38  ;;  %v658_v42 = vpop.f32.mrb[17].mxu0  ;;  %v1286_v43 = vpop.f32.mrb[17].mxu1  ;;  %v717_v56 = vadd.f32 %v1705_v45, %v697_v39 }
 0x50b   :  { %v660_v44 = vpop.f32.mrb[18].mxu0  ;;  %v700_v46 = vpop.f32.mrb[18].mxu1  ;;  %v710_v50 = vadd.f32 %v1097_v41, %v658_v42  ;;  %v1103_v43 = vld [vmem:[%s2037_s0 + $0x88] sm:$0xff] }
 0x50c   :  { %v1099_v47 = vmul.f32 -1.442695, %v703_v40  ;;  %v661_v48 = vpop.f32.mrb[19].mxu0  ;;  %v1287_v49 = vpop.f32.mrb[19].mxu1 }
 0x50d   :  { %v1100_v51 = vmul.f32 -1.442695, %v710_v50 }
 0x50e   :  { %1423 = vpow2.f32 %v1099_v47 }
 0x50f   :  { %1425 = vpow2.f32 %v1100_v51 }
 0x518   :  { %v1424_v52 = vpop.eup %1423 }
 0x519   :  { %v707_v53 = vadd.f32 1.0, %v1424_v52  ;;  %v1426_v54 = vpop.eup %1425 }
 0x51a   :  { %v714_v55 = vadd.f32 1.0, %v1426_v54  ;;  %v1463_v54 = vld [vmem:[%s2035_s2] ss:$12 sps:$4 sm:$0xff]  }
 0x51b   :  { %1427 = vrcp.f32 %v707_v53 }
 0x51c   :  { %1429 = vrcp.f32 %v714_v55  ;;  %v1464_v55 = vld [vmem:[%s2035_s2 + $0x1c] ss:$12 sps:$4 sm:$0xff]  }
 0x525   :  { %v1428_v57 = vpop.eup %1427 }
 0x526   :  { %v718_v59 = vmul.f32 %v1428_v57, %v717_v56  ;;  %v1430_v61 = vpop.eup %1429  ;;  %v1465_v56 = vld [vmem:[%s2035_s2 + $0x18] ss:$12 sps:$4 sm:$0xff]  }
 0x527   :  { %v721_v62 = vsub.f32 1.0, %v1430_v61  ;;  %v723_v25 = vmul.f32 %v1430_v61, %v1862_v35  ;;  %v1468_v57 = vld [vmem:[%s2035_s2 + $0x4c] ss:$12 sps:$4 sm:$0xff]   ;;  %v1108_v61 = vld [vmem:[%s2037_s0 + $0xa0] sm:$0xff] }
 0x528   :  { %v719_v60 = vadd.f32 %v1098_v58, %v718_v59 }
 0x52a   :  { %1431 = vtanh.f32 %v719_v60 }
 0x534   :  { %v1432_v63 = vpop.eup %1431 }
 0x535   :  { %v722_v23 = vmul.f32 %v1432_v63, %v721_v62 }
 0x537   :  { %v1912_v28 = vadd.f32 %v723_v25, %v722_v23 }
 0x539   :  { %v729_v29 = vpack.c.bf16 %v1912_v28, %v1912_v28 }
 0x53b   :  { %763 = vmatmul.mubr.bf16.vlgmr.msra.gmra.mrb[20].mxu0 %v729_v29  ;;  %1305 = vmatmul.mubr.bf16.vlgmr.msra.gmra.mrb[20].mxu1 %v729_v29 }
 0x53c   :  { %839 = vmatpush1.bf16.msra.mxu0 %v1507_v3  ;;  %1309 = vmatpush3.bf16.msra.mxu1 %v1544_v9  ;;  %v1101_v3 = vld [vmem:[%s2037_s0 + $0x78] sm:$0xff] }
 0x53d   :  { %840 = vmatprep.subr.bf16.mxu0 %v1515_v4  ;;  %1310 = vmatprep.subr.bf16.mxu1 %v1469_v1 }
 0x53e   :  { %870 = vmatprep.mubr.bf16.mxu0 %v1470_v2  ;;  %1324 = vmatprep.mubr.msk.bf16.mxu1 %vm1471_vm0, %v1469_v1 }
 0x540   :  { %841 = vmatpush1.bf16.msra.mxu0 %v1521_v5  ;;  %1311 = vmatpush3.bf16.msra.mxu1 %v1563_v12 }
 0x541   :  { %842 = vmatprep.subr.bf16.mxu0 %v1527_v6  ;;  %1312 = vmatprep.subr.bf16.mxu1 %v1469_v1 }
 0x544   :  { %843 = vmatpush1.bf16.msra.mxu0 %v1533_v7  ;;  %1313 = vmatpush3.bf16.msra.mxu1 %v1575_v14  ;;  %v1102_v7 = vld [vmem:[%s2037_s0 + $0x80] sm:$0xff] }
 0x545   :  { %844 = vmatprep.subr.bf16.mxu0 %v1539_v8  ;;  %1314 = vmatprep.subr.bf16.mxu1 %v1469_v1 }
 0x548   :  { %845 = vmatpush1.bf16.msra.mxu0 %v1550_v10  ;;  %1315 = vmatpush3.bf16.msra.mxu1 %v1594_v17 }
 0x549   :  { %846 = vmatprep.subr.bf16.mxu0 %v1557_v11  ;;  %1316 = vmatprep.subr.bf16.mxu1 %v1469_v1 }
 0x54c   :  { %847 = vmatpush1.bf16.msra.mxu0 %v1568_v13  ;;  %1317 = vmatpush3.bf16.msra.mxu1 %v1613_v20 }
 0x54d   :  { %848 = vmatprep.subr.bf16.mxu0 %v1581_v15  ;;  %1318 = vmatprep.subr.bf16.mxu1 %v1469_v1 }
 0x550   :  { %849 = vmatpush1.bf16.msra.mxu0 %v1588_v16  ;;  %1319 = vmatpush3.bf16.msra.mxu1 %v1637_v24 }
 0x551   :  { %850 = vmatprep.subr.bf16.mxu0 %v1600_v18  ;;  %1320 = vmatprep.subr.bf16.mxu1 %v1469_v1 }
 0x554   :  { %851 = vmatpush1.bf16.msra.mxu0 %v1607_v19  ;;  %1321 = vmatpush3.bf16.msra.mxu1 %v1648_v26 }
 0x555   :  { %852 = vmatprep.subr.bf16.mxu0 %v1619_v21  ;;  %1322 = vmatprep.subr.bf16.mxu1 %v1469_v1 }
 0x558   :  { %853 = vmatpush1.bf16.msra.mxu0 %v1626_v22  ;;  %1323 = vmatpush3.bf16.msra.mxu1 %v1656_v27 }
 0x559   :  { %946 = vmatprep.subr.bf16.mxu0 %v1500_v0  ;;  %1328 = vmatprep.subr.bf16.mxu1 %v1469_v1 }
 0x60e   :  { %v764_v4 = vpop.f32.mrb[20].mxu0  ;;  %v805_v5 = vpop.f32.mrb[20].mxu1 }
 0x60f   :  { %v811_v6 = vadd.f32 %v1101_v3, %v764_v4  ;;  %v766_v8 = vpop.f32.mrb[21].mxu0  ;;  %v1306_v30 = vpop.f32.mrb[21].mxu1  ;;  %v825_v41 = vadd.f32 %v1705_v45, %v805_v5 }
 0x610   :  { %v768_v31 = vpop.f32.mrb[22].mxu0  ;;  %v808_v32 = vpop.f32.mrb[22].mxu1  ;;  %v818_v35 = vadd.f32 %v1102_v7, %v766_v8 }
 0x611   :  { %v1104_v33 = vmul.f32 -1.442695, %v811_v6  ;;  %v769_v34 = vpop.f32.mrb[23].mxu0  ;;  %v1307_v0 = vpop.f32.mrb[23].mxu1  ;;  %v1111_v6 = vld [vmem:[%s2037_s0 + $0xa8] sm:$0xff]  ;;  %v1112_v31 = vld [vmem:[%s2037_s0 + $0xb0] sm:$0xff] }
 0x612   :  { %v1105_v36 = vmul.f32 -1.442695, %v818_v35 }
 0x613   :  { %1433 = vpow2.f32 %v1104_v33 }
 0x614   :  { %1435 = vpow2.f32 %v1105_v36 }
 0x61d   :  { %v1434_v37 = vpop.eup %1433 }
 0x61e   :  { %v815_v38 = vadd.f32 1.0, %v1434_v37  ;;  %v1436_v39 = vpop.eup %1435 }
 0x61f   :  { %v822_v40 = vadd.f32 1.0, %v1436_v39 }
 0x620   :  { %1437 = vrcp.f32 %v815_v38 }
 0x621   :  { %1439 = vrcp.f32 %v822_v40 }
 0x62a   :  { %v1438_v42 = vpop.eup %1437 }
 0x62b   :  { %v826_v44 = vmul.f32 %v1438_v42, %v825_v41  ;;  %v1440_v47 = vpop.eup %1439 }
 0x62c   :  { %v829_v48 = vsub.f32 1.0, %v1440_v47  ;;  %v831_v51 = vmul.f32 %v1440_v47, %v1912_v28  ;;  %v1113_v47 = vld [vmem:[%s2037_s0 + $0xb8] sm:$0xff] }
 0x62d   :  { %v827_v46 = vadd.f32 %v1103_v43, %v826_v44 }
 0x62f   :  { %1441 = vtanh.f32 %v827_v46 }
 0x639   :  { %v1442_v49 = vpop.eup %1441 }
 0x63a   :  { %v830_v50 = vmul.f32 %v1442_v49, %v829_v48 }
 0x63c   :  { %v1962_v52 = vadd.f32 %v831_v51, %v830_v50 }
 0x63e   :  { %v837_v53 = vpack.c.bf16 %v1962_v52, %v1962_v52 }
 0x640   :  { %871 = vmatmul.mubr.bf16.vlgmr.msra.gmra.mrb[24].mxu0 %v837_v53  ;;  %1325 = vmatmul.mubr.bf16.vlgmr.msra.gmra.mrb[24].mxu1 %v837_v53 }
 0x641   :  { %947 = vmatpush1.bf16.msra.mxu0 %v1463_v54  ;;  %1329 = vmatpush3.bf16.msra.mxu1 %v1544_v9  ;;  %v1466_v9 = vld [vmem:[%s2035_s2 + $0x34] ss:$12 sps:$4 sm:$0xff]  }
 0x642   :  { %948 = vmatprep.subr.bf16.mxu0 %v1464_v55  ;;  %1330 = vmatprep.subr.bf16.mxu1 %v1469_v1 }
 0x643   :  { %978 = vmatprep.mubr.bf16.mxu0 %v1470_v2  ;;  %1344 = vmatprep.mubr.msk.bf16.mxu1 %vm1471_vm0, %v1469_v1  ;;  %v1467_v2 = vld [vmem:[%s2035_s2 + $0x30] ss:$12 sps:$4 sm:$0xff]  }
 0x645   :  { %949 = vmatpush1.bf16.msra.mxu0 %v1465_v56  ;;  %1331 = vmatpush3.bf16.msra.mxu1 %v1563_v12 }
 0x646   :  { %950 = vmatprep.subr.bf16.mxu0 %v1466_v9  ;;  %1332 = vmatprep.subr.bf16.mxu1 %v1469_v1 }
 0x649   :  { %951 = vmatpush1.bf16.msra.mxu0 %v1467_v2  ;;  %1333 = vmatpush3.bf16.msra.mxu1 %v1575_v14  ;;  %v1107_v14 = vld [vmem:[%s2037_s0 + $0x98] sm:$0xff] }
 0x64a   :  { %952 = vmatprep.subr.bf16.mxu0 %v1468_v57  ;;  %1334 = vmatprep.subr.bf16.mxu1 %v1469_v1 }
 0x64d   :  { %953 = vmatpush1.bf16.msra.mxu0 %v1550_v10  ;;  %1335 = vmatpush3.bf16.msra.mxu1 %v1594_v17  ;;  %v1106_v10 = vld [vmem:[%s2037_s0 + $0x90] sm:$0xff] }
 0x64e   :  { %954 = vmatprep.subr.bf16.mxu0 %v1557_v11  ;;  %1336 = vmatprep.subr.bf16.mxu1 %v1469_v1 }
 0x651   :  { %955 = vmatpush1.bf16.msra.mxu0 %v1568_v13  ;;  %1337 = vmatpush3.bf16.msra.mxu1 %v1613_v20 }
 0x652   :  { %956 = vmatprep.subr.bf16.mxu0 %v1581_v15  ;;  %1338 = vmatprep.subr.bf16.mxu1 %v1469_v1 }
 0x655   :  { %957 = vmatpush1.bf16.msra.mxu0 %v1588_v16  ;;  %1339 = vmatpush3.bf16.msra.mxu1 %v1637_v24 }
 0x656   :  { %958 = vmatprep.subr.bf16.mxu0 %v1600_v18  ;;  %1340 = vmatprep.subr.bf16.mxu1 %v1469_v1 }
 0x659   :  { %959 = vmatpush1.bf16.msra.mxu0 %v1607_v19  ;;  %1341 = vmatpush3.bf16.msra.mxu1 %v1648_v26 }
 0x65a   :  { %960 = vmatprep.subr.bf16.mxu0 %v1619_v21  ;;  %1342 = vmatprep.subr.bf16.mxu1 %v1469_v1 }
 0x65d   :  { %961 = vmatpush1.bf16.msra.mxu0 %v1626_v22  ;;  %1343 = vmatpush3.bf16.msra.mxu1 %v1656_v27 }
 0x713   :  { %v872_v11 = vpop.f32.mrb[24].mxu0  ;;  %v913_v12 = vpop.f32.mrb[24].mxu1 }
 0x714   :  { %v919_v13 = vadd.f32 %v1106_v10, %v872_v11  ;;  %v874_v15 = vpop.f32.mrb[25].mxu0  ;;  %v1326_v16 = vpop.f32.mrb[25].mxu1  ;;  %v933_v59 = vadd.f32 %v1705_v45, %v913_v12 }
 0x715   :  { %v876_v17 = vpop.f32.mrb[26].mxu0  ;;  %v916_v18 = vpop.f32.mrb[26].mxu1  ;;  %v926_v21 = vadd.f32 %v1107_v14, %v874_v15 }
 0x716   :  { %v1109_v1 = vmul.f32 -1.442695, %v919_v13  ;;  %v877_v19 = vpop.f32.mrb[27].mxu0  ;;  %v1327_v20 = vpop.f32.mrb[27].mxu1 }
 0x717   :  { %v1110_v22 = vmul.f32 -1.442695, %v926_v21 }
 0x718   :  { %1443 = vpow2.f32 %v1109_v1 }
 0x719   :  { %1445 = vpow2.f32 %v1110_v22 }
 0x722   :  { %v1444_v24 = vpop.eup %1443 }
 0x723   :  { %v923_v26 = vadd.f32 1.0, %v1444_v24  ;;  %v1446_v27 = vpop.eup %1445 }
 0x724   :  { %v930_v58 = vadd.f32 1.0, %v1446_v27 }
 0x725   :  { %1447 = vrcp.f32 %v923_v26 }
 0x726   :  { %1449 = vrcp.f32 %v930_v58 }
 0x72f   :  { %v1448_v60 = vpop.eup %1447 }
 0x730   :  { %v934_v62 = vmul.f32 %v1448_v60, %v933_v59  ;;  %v1450_v23 = vpop.eup %1449 }
 0x731   :  { %v937_v25 = vsub.f32 1.0, %v1450_v23  ;;  %v939_v3 = vmul.f32 %v1450_v23, %v1962_v52 }
 0x732   :  { %v935_v63 = vadd.f32 %v1108_v61, %v934_v62 }
 0x734   :  { %1451 = vtanh.f32 %v935_v63 }
 0x73e   :  { %v1452_v28 = vpop.eup %1451 }
 0x73f   :  { %v938_v29 = vmul.f32 %v1452_v28, %v937_v25 }
 0x741   :  { %v940_v4 = vadd.f32 %v939_v3, %v938_v29 }
 0x743   :  { %v945_v5 = vpack.c.bf16 %v940_v4, %v940_v4 }
 0x745   :  { %979 = vmatmul.mubr.bf16.vlgmr.msra.gmra.mrb[28].mxu0 %v945_v5  ;;  %1345 = vmatmul.mubr.bf16.vlgmr.msra.gmra.mrb[28].mxu1 %v945_v5 }
 0x818   :  { %v980_v7 = vpop.f32.mrb[28].mxu0  ;;  %v1021_v8 = vpop.f32.mrb[28].mxu1 }
 0x819   :  { %v1027_v30 = vadd.f32 %v1111_v6, %v980_v7  ;;  %v982_v32 = vpop.f32.mrb[29].mxu0  ;;  %v1346_v33 = vpop.f32.mrb[29].mxu1  ;;  %v1041_v44 = vadd.f32 %v1705_v45, %v1021_v8 }
 0x81a   :  { %v984_v34 = vpop.f32.mrb[30].mxu0  ;;  %v1024_v0 = vpop.f32.mrb[30].mxu1  ;;  %v1034_v38 = vadd.f32 %v1112_v31, %v982_v32 }
 0x81b   :  { %v1114_v35 = vmul.f32 -1.442695, %v1027_v30  ;;  %v985_v36 = vpop.f32.mrb[31].mxu0  ;;  %v1347_v37 = vpop.f32.mrb[31].mxu1 }
 0x81c   :  { %v1115_v39 = vmul.f32 -1.442695, %v1034_v38 }
 0x81d   :  { %1453 = vpow2.f32 %v1114_v35 }
 0x81e   :  { %1455 = vpow2.f32 %v1115_v39 }
 0x827   :  { %v1454_v40 = vpop.eup %1453 }
 0x828   :  { %v1031_v41 = vadd.f32 1.0, %v1454_v40  ;;  %v1456_v42 = vpop.eup %1455 }
 0x829   :  { %v1038_v43 = vadd.f32 1.0, %v1456_v42 }
 0x82a   :  { %1457 = vrcp.f32 %v1031_v41 }
 0x82b   :  { %1459 = vrcp.f32 %v1038_v43 }
 0x834   :  { %v1458_v46 = vpop.eup %1457 }
 0x835   :  { %v1042_v48 = vmul.f32 %v1458_v46, %v1041_v44  ;;  %v1460_v50 = vpop.eup %1459 }
 0x836   :  { %v1045_v51 = vsub.f32 1.0, %v1460_v50  ;;  %v1047_v54 = vmul.f32 %v1460_v50, %v940_v4 }
 0x837   :  { %v1043_v49 = vadd.f32 %v1113_v47, %v1042_v48 }
 0x839   :  { %1461 = vtanh.f32 %v1043_v49 }
 0x843   :  { %v1462_v52 = vpop.eup %1461 }
 0x844   :  { %v1046_v53 = vmul.f32 %v1462_v52, %v1045_v51 }
 0x846   :  { %v1048_v55 = vadd.f32 %v1047_v54, %v1046_v53 }
 0x848   :  { %1049 = vst [vmem:[%s2039_s4] sm:$0xff] %v1048_v55 }

// kernel: encoder_decoder_forward.7
= control target key start
LH: loop header
LB: loop body
LE: loop exit
PB: predicated region body
PF: predicated region fallthrough
CT: control target
= control target key end

     0   :  { %v4493_v2 = vmov 0.0   ;;  %v4494_v3 = vmov 0   ;;  %vm4495_vm0 = vmmov 0   ;;  %s5744_s0 = inlined_call_operand.vmem [shape: f32[8,8,384], index: 0, kind: input, shape index: {}]   ;;  %s5745_s1 = inlined_call_operand.vmem [shape: f32[8,128], index: 1, kind: input, shape index: {}]   ;;  %s5746_s2 = inlined_call_operand.vmem [shape: bf16[128,384], index: 2, kind: input, shape index: {}]   ;;  %s5747_s3 = inlined_call_operand.vmem [shape: bf16[128,384], index: 3, kind: input, shape index: {}]   ;;  %s5748_s4 = inlined_call_operand.vmem [shape: f32[1,128], index: 4, kind: input, shape index: {}]   ;;  %s5749_s5 = inlined_call_operand.vmem [shape: bf16[128,128], index: 5, kind: input, shape index: {}]   ;;  %s5750_s6 = inlined_call_operand.vmem [shape: f32[1,128], index: 6, kind: input, shape index: {}]   ;;  %s5751_s7 = inlined_call_operand.vmem [shape: f32[8,8,128], index: 7, kind: output, shape index: {0}]   ;;  %s5752_s8 = inlined_call_operand.hbm [shape: f32[8,128], index: 8, kind: output, shape index: {1}]  }
   0x1   :  { %v4143_v0 = vld [vmem:[%s5746_s2 + $0x4] ss:$12 sps:$4 sm:$0xff]   ;;  %v4145_v1 = vld [vmem:[%s5746_s2] ss:$12 sps:$4 sm:$0xff]   ;;  %3799 = vmatprep.subr.bf16.mxu1 %v4493_v2  ;;  %224 = vmatprep.mubr.bf16.mxu0 %v4494_v3  ;;  %v4146_v4 = vld [vmem:[%s5746_s2 + $0x1c] ss:$12 sps:$4 sm:$0xff]  }
   0x2   :  { %192 = vmatprep.subr.bf16.mxu0 %v4143_v0  ;;  %3815 = vmatprep.mubr.msk.bf16.mxu1 %vm4495_vm0, %v4493_v2  ;;  %v4148_v5 = vld [vmem:[%s5746_s2 + $0x18] ss:$12 sps:$4 sm:$0xff]   ;;  %v4149_v6 = vld [vmem:[%s5746_s2 + $0x34] ss:$12 sps:$4 sm:$0xff]   ;;  %v4151_v7 = vld [vmem:[%s5746_s2 + $0x30] ss:$12 sps:$4 sm:$0xff]  }
   0x3   :  { %193 = vmatpush1.bf16.msra.mxu0 %v4145_v1  ;;  %v4152_v8 = vld [vmem:[%s5746_s2 + $0x4c] ss:$12 sps:$4 sm:$0xff]   ;;  %v4163_v9 = vld [vmem:[%s5746_s2 + $0x8] ss:$12 sps:$4 sm:$0xff]   ;;  %v4155_v11 = vld [vmem:[%s5746_s2 + $0x64] ss:$12 sps:$4 sm:$0xff]  }
   0x4   :  { %194 = vmatprep.subr.bf16.mxu0 %v4146_v4  ;;  %v4154_v10 = vld [vmem:[%s5746_s2 + $0x48] ss:$12 sps:$4 sm:$0xff]   ;;  %3800 = vmatpush3.bf16.msra.mxu1 %v4163_v9  ;;  %v4167_v12 = vld [vmem:[%s5746_s2 + $0x20] ss:$12 sps:$4 sm:$0xff]   ;;  %v4169_v14 = vld [vmem:[%s5746_s2 + $0x38] ss:$12 sps:$4 sm:$0xff]  }
   0x5   :  { %3801 = vmatprep.subr.bf16.mxu1 %v4493_v2  ;;  %v4157_v13 = vld [vmem:[%s5746_s2 + $0x60] ss:$12 sps:$4 sm:$0xff]   ;;  %v4158_v15 = vld [vmem:[%s5746_s2 + $0x7c] ss:$12 sps:$4 sm:$0xff]   ;;  %v4160_v16 = vld [vmem:[%s5746_s2 + $0x78] ss:$12 sps:$4 sm:$0xff]  }
   0x6   :  { %v4173_v17 = vld [vmem:[%s5746_s2 + $0x50] ss:$12 sps:$4 sm:$0xff]   ;;  %v4161_v18 = vld [vmem:[%s5746_s2 + $0x94] ss:$12 sps:$4 sm:$0xff]   ;;  %v4165_v21 = vld [vmem:[%s5746_s2 + $0xac] ss:$12 sps:$4 sm:$0xff]  }
   0x7   :  { %195 = vmatpush1.bf16.msra.mxu0 %v4148_v5  ;;  %v4164_v19 = vld [vmem:[%s5746_s2 + $0x90] ss:$12 sps:$4 sm:$0xff]   ;;  %v4177_v20 = vld [vmem:[%s5746_s2 + $0x68] ss:$12 sps:$4 sm:$0xff]   ;;  %v4616_v23 = vld [vmem:[%s5745_s1] sm:$0xff] }
   0x8   :  { %196 = vmatprep.subr.bf16.mxu0 %v4149_v6  ;;  %3802 = vmatpush3.bf16.msra.mxu1 %v4167_v12  ;;  %v4168_v22 = vld [vmem:[%s5746_s2 + $0xa8] ss:$12 sps:$4 sm:$0xff]   ;;  %v4181_v24 = vld [vmem:[%s5746_s2 + $0x80] ss:$12 sps:$4 sm:$0xff]   ;;  %v4624_v25 = vld [vmem:[%s5747_s3 + $0x4] ss:$12 sps:$4 sm:$0xff]   ;;  %v4629_v26 = vpack.c.bf16 %v4616_v23, %v4616_v23 }
   0x9   :  { %3803 = vmatprep.subr.bf16.mxu1 %v4493_v2  ;;  %v4634_v27 = vld [vmem:[%s5747_s3] ss:$12 sps:$4 sm:$0xff]   ;;  %v4185_v28 = vld [vmem:[%s5746_s2 + $0x98] ss:$12 sps:$4 sm:$0xff]   ;;  %v4643_v29 = vld [vmem:[%s5747_s3 + $0x1c] ss:$12 sps:$4 sm:$0xff]  }
   0xa   :  { %v4650_v30 = vld [vmem:[%s5747_s3 + $0x18] ss:$12 sps:$4 sm:$0xff]   ;;  %v4189_v31 = vld [vmem:[%s5746_s2 + $0xb0] ss:$12 sps:$4 sm:$0xff]   ;;  %v4660_v32 = vld [vmem:[%s5747_s3 + $0x34] ss:$12 sps:$4 sm:$0xff]  }
   0xb   :  { %197 = vmatpush1.bf16.msra.mxu0 %v4151_v7  ;;  %v4666_v33 = vld [vmem:[%s5747_s3 + $0x30] ss:$12 sps:$4 sm:$0xff]   ;;  %v4196_v34 = vld [vmem:[%s5747_s3 + $0x8] ss:$12 sps:$4 sm:$0xff]   ;;  %v4675_v35 = vld [vmem:[%s5747_s3 + $0x4c] ss:$12 sps:$4 sm:$0xff]  }
   0xc   :  { %198 = vmatprep.subr.bf16.mxu0 %v4152_v8  ;;  %3804 = vmatpush3.bf16.msra.mxu1 %v4169_v14  ;;  %v4683_v36 = vld [vmem:[%s5747_s3 + $0x48] ss:$12 sps:$4 sm:$0xff]   ;;  %v4200_v37 = vld [vmem:[%s5747_s3 + $0x20] ss:$12 sps:$4 sm:$0xff]   ;;  %v4691_v38 = vld [vmem:[%s5747_s3 + $0x64] ss:$12 sps:$4 sm:$0xff]  }
   0xd   :  { %3805 = vmatprep.subr.bf16.mxu1 %v4493_v2  ;;  %v4700_v39 = vld [vmem:[%s5747_s3 + $0x60] ss:$12 sps:$4 sm:$0xff]   ;;  %v4201_v40 = vld [vmem:[%s5747_s3 + $0x38] ss:$12 sps:$4 sm:$0xff]   ;;  %v4710_v41 = vld [vmem:[%s5747_s3 + $0x7c] ss:$12 sps:$4 sm:$0xff]  }
   0xe   :  { %v4718_v42 = vld [vmem:[%s5747_s3 + $0x78] ss:$12 sps:$4 sm:$0xff]   ;;  %v4202_v43 = vld [vmem:[%s5747_s3 + $0x50] ss:$12 sps:$4 sm:$0xff]   ;;  %v4726_v44 = vld [vmem:[%s5747_s3 + $0x94] ss:$12 sps:$4 sm:$0xff]  }
   0xf   :  { %199 = vmatpush1.bf16.msra.mxu0 %v4154_v10  ;;  %v4734_v45 = vld [vmem:[%s5747_s3 + $0x90] ss:$12 sps:$4 sm:$0xff]   ;;  %v4203_v46 = vld [vmem:[%s5747_s3 + $0x68] ss:$12 sps:$4 sm:$0xff]   ;;  %v4742_v47 = vld [vmem:[%s5747_s3 + $0xac] ss:$12 sps:$4 sm:$0xff]  }
  0x10   :  { %200 = vmatprep.subr.bf16.mxu0 %v4155_v11  ;;  %3806 = vmatpush3.bf16.msra.mxu1 %v4173_v17  ;;  %v4750_v48 = vld [vmem:[%s5747_s3 + $0xa8] ss:$12 sps:$4 sm:$0xff]   ;;  %v4204_v49 = vld [vmem:[%s5747_s3 + $0x80] ss:$12 sps:$4 sm:$0xff]   ;;  %v4205_v50 = vld [vmem:[%s5747_s3 + $0x98] ss:$12 sps:$4 sm:$0xff]  }
  0x11   :  { %3807 = vmatprep.subr.bf16.mxu1 %v4493_v2  ;;  %v4206_v51 = vld [vmem:[%s5747_s3 + $0xb0] ss:$12 sps:$4 sm:$0xff]  }
  0x13   :  { %201 = vmatpush1.bf16.msra.mxu0 %v4157_v13 }
  0x14   :  { %202 = vmatprep.subr.bf16.mxu0 %v4158_v15  ;;  %3808 = vmatpush3.bf16.msra.mxu1 %v4177_v20 }
  0x15   :  { %3809 = vmatprep.subr.bf16.mxu1 %v4493_v2 }
  0x17   :  { %203 = vmatpush1.bf16.msra.mxu0 %v4160_v16 }
  0x18   :  { %204 = vmatprep.subr.bf16.mxu0 %v4161_v18  ;;  %3810 = vmatpush3.bf16.msra.mxu1 %v4181_v24 }
  0x19   :  { %3811 = vmatprep.subr.bf16.mxu1 %v4493_v2 }
  0x1b   :  { %205 = vmatpush1.bf16.msra.mxu0 %v4164_v19 }
  0x1c   :  { %206 = vmatprep.subr.bf16.mxu0 %v4165_v21  ;;  %3812 = vmatpush3.bf16.msra.mxu1 %v4185_v28 }
  0x1d   :  { %3813 = vmatprep.subr.bf16.mxu1 %v4493_v2 }
  0x1f   :  { %207 = vmatpush1.bf16.msra.mxu0 %v4168_v22 }
  0x20   :  { %453 = vmatprep.subr.bf16.mxu0 %v4624_v25  ;;  %3814 = vmatpush3.bf16.msra.mxu1 %v4189_v31 }
  0x21   :  { %3819 = vmatprep.subr.bf16.mxu1 %v4493_v2 }
  0x22   :  { %225 = vmatmul.mubr.bf16.vlgmr.msra.gmra.mrb[0].mxu0 %v4629_v26 }
  0x23   :  { %454 = vmatpush1.bf16.msra.mxu0 %v4634_v27  ;;  %485 = vmatprep.mubr.bf16.mxu0 %v4494_v3 }
  0x24   :  { %455 = vmatprep.subr.bf16.mxu0 %v4643_v29  ;;  %3816 = vmatmul.mubr.bf16.vlgmr.msra.gmra.mrb[0].mxu1 %v4629_v26 }
  0x25   :  { %3820 = vmatpush3.bf16.msra.mxu1 %v4196_v34  ;;  %3835 = vmatprep.mubr.msk.bf16.mxu1 %vm4495_vm0, %v4493_v2 }
  0x26   :  { %3821 = vmatprep.subr.bf16.mxu1 %v4493_v2 }
  0x27   :  { %456 = vmatpush1.bf16.msra.mxu0 %v4650_v30 }
  0x28   :  { %457 = vmatprep.subr.bf16.mxu0 %v4660_v32 }
  0x29   :  { %3822 = vmatpush3.bf16.msra.mxu1 %v4200_v37 }
  0x2a   :  { %3823 = vmatprep.subr.bf16.mxu1 %v4493_v2 }
  0x2b   :  { %458 = vmatpush1.bf16.msra.mxu0 %v4666_v33 }
  0x2c   :  { %459 = vmatprep.subr.bf16.mxu0 %v4675_v35 }
  0x2d   :  { %3824 = vmatpush3.bf16.msra.mxu1 %v4201_v40 }
  0x2e   :  { %3825 = vmatprep.subr.bf16.mxu1 %v4493_v2 }
  0x2f   :  { %460 = vmatpush1.bf16.msra.mxu0 %v4683_v36 }
  0x30   :  { %461 = vmatprep.subr.bf16.mxu0 %v4691_v38 }
  0x31   :  { %3826 = vmatpush3.bf16.msra.mxu1 %v4202_v43 }
  0x32   :  { %3827 = vmatprep.subr.bf16.mxu1 %v4493_v2 }
  0x33   :  { %462 = vmatpush1.bf16.msra.mxu0 %v4700_v39 }
  0x34   :  { %463 = vmatprep.subr.bf16.mxu0 %v4710_v41 }
  0x35   :  { %3828 = vmatpush3.bf16.msra.mxu1 %v4203_v46 }
  0x36   :  { %3829 = vmatprep.subr.bf16.mxu1 %v4493_v2 }
  0x37   :  { %464 = vmatpush1.bf16.msra.mxu0 %v4718_v42 }
  0x38   :  { %465 = vmatprep.subr.bf16.mxu0 %v4726_v44 }
  0x39   :  { %3830 = vmatpush3.bf16.msra.mxu1 %v4204_v49 }
  0x3a   :  { %3831 = vmatprep.subr.bf16.mxu1 %v4493_v2 }
  0x3b   :  { %466 = vmatpush1.bf16.msra.mxu0 %v4734_v45 }
  0x3c   :  { %467 = vmatprep.subr.bf16.mxu0 %v4742_v47 }
  0x3d   :  { %3832 = vmatpush3.bf16.msra.mxu1 %v4205_v50 }
  0x3e   :  { %3833 = vmatprep.subr.bf16.mxu1 %v4493_v2 }
  0x3f   :  { %468 = vmatpush1.bf16.msra.mxu0 %v4750_v48 }
  0x40   :  { %3839 = vmatprep.subr.bf16.mxu0 %v4493_v2 }
  0x41   :  { %3834 = vmatpush3.bf16.msra.mxu1 %v4206_v51 }
  0x42   :  { %486 = vmatmul.mubr.bf16.vlgmr.msra.gmra.mrb[4].mxu0 %v4629_v26  ;;  %829 = vmatprep.subr.bf16.mxu1 %v4624_v25 }
  0x43   :  { %3855 = vmatprep.mubr.msk.bf16.mxu0 %vm4495_vm0, %v4493_v2 }
  0x44   :  { %3836 = vmatmul.mubr.bf16.vlgmr.msra.gmra.mrb[4].mxu1 %v4629_v26 }
  0x45   :  { %830 = vmatpush1.bf16.msra.mxu1 %v4634_v27  ;;  %861 = vmatprep.mubr.bf16.mxu1 %v4494_v3 }
  0x46   :  { %831 = vmatprep.subr.bf16.mxu1 %v4643_v29 }
  0x49   :  { %832 = vmatpush1.bf16.msra.mxu1 %v4650_v30 }
  0x4a   :  { %833 = vmatprep.subr.bf16.mxu1 %v4660_v32 }
  0x4d   :  { %834 = vmatpush1.bf16.msra.mxu1 %v4666_v33 }
  0x4e   :  { %835 = vmatprep.subr.bf16.mxu1 %v4675_v35 }
  0x51   :  { %836 = vmatpush1.bf16.msra.mxu1 %v4683_v36 }
  0x52   :  { %837 = vmatprep.subr.bf16.mxu1 %v4691_v38 }
  0x55   :  { %838 = vmatpush1.bf16.msra.mxu1 %v4700_v39 }
  0x56   :  { %839 = vmatprep.subr.bf16.mxu1 %v4710_v41 }
  0x59   :  { %840 = vmatpush1.bf16.msra.mxu1 %v4718_v42 }
  0x5a   :  { %841 = vmatprep.subr.bf16.mxu1 %v4726_v44 }
  0x5d   :  { %842 = vmatpush1.bf16.msra.mxu1 %v4734_v45 }
  0x5e   :  { %843 = vmatprep.subr.bf16.mxu1 %v4742_v47 }
  0x61   :  { %844 = vmatpush1.bf16.msra.mxu1 %v4750_v48 }
  0x62   :  { %3879 = vmatprep.subr.bf16.mxu1 %v4493_v2 }
  0x63   :  { %14 = vsyncpa [#allocation3], 0  ;;  %v4207_v52 = vld [vmem:[%s5749_s5] sm:$0xff]   ;;  %v4208_v53 = vld [vmem:[%s5749_s5 + $0x8] sm:$0xff]  }
  0x64   :  { %3840 = vmatpush3.bf16.msra.mxu0 %v4207_v52  ;;  %v4209_v54 = vld [vmem:[%s5749_s5 + $0x10] sm:$0xff]   ;;  %v4210_v55 = vld [vmem:[%s5749_s5 + $0x18] sm:$0xff]   ;;  %v4211_v56 = vld [vmem:[%s5749_s5 + $0x20] sm:$0xff]  }
  0x65   :  { %3841 = vmatprep.subr.bf16.mxu0 %v4493_v2  ;;  %v4212_v57 = vld [vmem:[%s5749_s5 + $0x28] sm:$0xff]   ;;  %v4213_v58 = vld [vmem:[%s5749_s5 + $0x30] sm:$0xff]   ;;  %v4214_v59 = vld [vmem:[%s5749_s5 + $0x38] sm:$0xff]  }
  0x66   :  { %v287_v6 = vld [vmem:[%s5744_s0] sm:$0xff]  ;;  %v288_v7 = vld [vmem:[%s5744_s0 + $0x8] sm:$0xff]  ;;  %v289_v37 = vld [vmem:[%s5744_s0 + $0x10] sm:$0xff] }
  0x67   :  { %v4839_v28 = vld [vmem:[%s5748_s4] ss:$0 sm:$0xff] }
  0x68   :  { %3842 = vmatpush3.bf16.msra.mxu0 %v4208_v53 }
  0x69   :  { %3843 = vmatprep.subr.bf16.mxu0 %v4493_v2 }
  0x6c   :  { %3844 = vmatpush3.bf16.msra.mxu0 %v4209_v54 }
  0x6d   :  { %3845 = vmatprep.subr.bf16.mxu0 %v4493_v2 }
  0x70   :  { %3846 = vmatpush3.bf16.msra.mxu0 %v4210_v55 }
  0x71   :  { %3847 = vmatprep.subr.bf16.mxu0 %v4493_v2 }
  0x74   :  { %3848 = vmatpush3.bf16.msra.mxu0 %v4211_v56  ;;  %v4215_v56 = vld [vmem:[%s5747_s3 + $0x8] ss:$12 sps:$4 sm:$0xff]  }
  0x75   :  { %3849 = vmatprep.subr.bf16.mxu0 %v4493_v2 }
  0x78   :  { %3850 = vmatpush3.bf16.msra.mxu0 %v4212_v57 }
  0x79   :  { %3851 = vmatprep.subr.bf16.mxu0 %v4493_v2 }
  0x7c   :  { %3852 = vmatpush3.bf16.msra.mxu0 %v4213_v58  ;;  %v4216_v58 = vld [vmem:[%s5747_s3 + $0x20] ss:$12 sps:$4 sm:$0xff]  }
  0x7d   :  { %3853 = vmatprep.subr.bf16.mxu0 %v4493_v2 }
  0x80   :  { %3854 = vmatpush3.bf16.msra.mxu0 %v4214_v59  ;;  %v4218_v59 = vld [vmem:[%s5747_s3 + $0x50] ss:$12 sps:$4 sm:$0xff]  }
  0x81   :  { %3859 = vmatprep.subr.bf16.mxu0 %v4493_v2 }
  0xf5   :  { %v4822_v60 = vpop.f32.mrb[0].mxu0 }
  0xf6   :  { %v4824_v61 = vpop.f32.mrb[1].mxu0  ;;  %v290_v8 = vadd.f32 %v287_v6, %v4822_v60 }
  0xf7   :  { %v230_v62 = vpop.f32.mrb[2].mxu0  ;;  %v4826_v0 = vpop.f32.mrb[0].mxu1  ;;  %v291_v10 = vadd.f32 %v288_v7, %v4824_v61 }
  0xf8   :  { %v231_v63 = vpop.f32.mrb[3].mxu0  ;;  %v3817_v1 = vpop.f32.mrb[1].mxu1  ;;  %v292_v43 = vadd.f32 %v289_v37, %v4826_v0  ;;  %v4219_v62 = vld [vmem:[%s5747_s3 + $0x68] ss:$12 sps:$4 sm:$0xff]  }
  0xf9   :  { %v270_v4 = vpop.f32.mrb[2].mxu1  ;;  %v4220_v63 = vld [vmem:[%s5747_s3 + $0x80] ss:$12 sps:$4 sm:$0xff]   ;;  %v4221_v1 = vld [vmem:[%s5747_s3 + $0x98] ss:$12 sps:$4 sm:$0xff]  }
  0xfa   :  { %v3818_v5 = vpop.f32.mrb[3].mxu1  ;;  %v4222_v4 = vld [vmem:[%s5747_s3 + $0xb0] ss:$12 sps:$4 sm:$0xff]  }
 0x115   :  { %v487_v9 = vpop.f32.mrb[4].mxu0 }
 0x116   :  { %v534_v11 = vadd.f32 %v487_v9, %v290_v8  ;;  %v489_v12 = vpop.f32.mrb[5].mxu0 }
 0x117   :  { %v541_v13 = vadd.f32 %v489_v12, %v291_v10  ;;  %v491_v14 = vpop.f32.mrb[6].mxu0  ;;  %v528_v18 = vpop.f32.mrb[4].mxu1 }
 0x118   :  { %v3370_v15 = vmul.f32 -1.442695, %v534_v11  ;;  %v492_v16 = vpop.f32.mrb[7].mxu0  ;;  %v3837_v19 = vpop.f32.mrb[5].mxu1  ;;  %v548_v34 = vadd.f32 %v4839_v28, %v528_v18 }
 0x119   :  { %v3371_v17 = vmul.f32 -1.442695, %v541_v13  ;;  %v531_v20 = vpop.f32.mrb[6].mxu1 }
 0x11a   :  { %4375 = vpow2.f32 %v3370_v15  ;;  %v3838_v21 = vpop.f32.mrb[7].mxu1 }
 0x11b   :  { %4377 = vpow2.f32 %v3371_v17 }
 0x124   :  { %v4376_v22 = vpop.eup %4375 }
 0x125   :  { %v538_v24 = vadd.f32 1.0, %v4376_v22  ;;  %v4378_v26 = vpop.eup %4377 }
 0x126   :  { %v545_v31 = vadd.f32 1.0, %v4378_v26 }
 0x127   :  { %4379 = vrcp.f32 %v538_v24  ;;  %v3382_v24 = vld [vmem:[%s5744_s0 + $0x28] sm:$0xff] }
 0x128   :  { %4381 = vrcp.f32 %v545_v31 }
 0x131   :  { %v4380_v40 = vpop.eup %4379 }
 0x132   :  { %v549_v46 = vmul.f32 %v4380_v40, %v548_v34  ;;  %v4382_v50 = vpop.eup %4381 }
 0x133   :  { %v552_v51 = vsub.f32 1.0, %v4382_v50  ;;  %v554_v54 = vmul.f32 %v4382_v50, %v4616_v23  ;;  %v4217_v23 = vld [vmem:[%s5747_s3 + $0x38] ss:$12 sps:$4 sm:$0xff]  }
 0x134   :  { %v550_v49 = vadd.f32 %v549_v46, %v292_v43  ;;  %v668_v43 = vadd.f32 %v3382_v24, %v4826_v0 }
 0x136   :  { %4383 = vtanh.f32 %v550_v49 }
 0x140   :  { %v4384_v52 = vpop.eup %4383 }
 0x141   :  { %v553_v53 = vmul.f32 %v4384_v52, %v552_v51 }
 0x143   :  { %v4847_v55 = vadd.f32 %v554_v54, %v553_v53 }
 0x145   :  { %v556_v57 = vpack.c.bf16 %v4847_v55, %v4847_v55 }
 0x147   :  { %3856 = vmatmul.mubr.bf16.vlgmr.msra.gmra.mrb[8].mxu0 %v556_v57  ;;  %862 = vmatmul.mubr.bf16.vlgmr.msra.gmra.mrb[8].mxu1 %v556_v57 }
 0x148   :  { %3860 = vmatpush3.bf16.msra.mxu0 %v4215_v56  ;;  %3875 = vmatprep.mubr.msk.bf16.mxu0 %vm4495_vm0, %v4493_v2 }
 0x149   :  { %3861 = vmatprep.subr.bf16.mxu0 %v4493_v2  ;;  %3895 = vmatprep.mubr.msk.bf16.mxu1 %vm4495_vm0, %v4493_v2 }
 0x14c   :  { %3862 = vmatpush3.bf16.msra.mxu0 %v4216_v58  ;;  %v4231_v58 = vld [vmem:[%s5747_s3 + $0x8] ss:$12 sps:$4 sm:$0xff]  }
 0x14d   :  { %3863 = vmatprep.subr.bf16.mxu0 %v4493_v2 }
 0x150   :  { %3864 = vmatpush3.bf16.msra.mxu0 %v4217_v23 }
 0x151   :  { %3865 = vmatprep.subr.bf16.mxu0 %v4493_v2 }
 0x154   :  { %3866 = vmatpush3.bf16.msra.mxu0 %v4218_v59  ;;  %v4232_v59 = vld [vmem:[%s5747_s3 + $0x20] ss:$12 sps:$4 sm:$0xff]  }
 0x155   :  { %3867 = vmatprep.subr.bf16.mxu0 %v4493_v2 }
 0x158   :  { %3868 = vmatpush3.bf16.msra.mxu0 %v4219_v62  ;;  %v4234_v62 = vld [vmem:[%s5747_s3 + $0x50] ss:$12 sps:$4 sm:$0xff]  }
 0x159   :  { %3869 = vmatprep.subr.bf16.mxu0 %v4493_v2 }
 0x15c   :  { %3870 = vmatpush3.bf16.msra.mxu0 %v4220_v63  ;;  %v4235_v63 = vld [vmem:[%s5747_s3 + $0x68] ss:$12 sps:$4 sm:$0xff]  }
 0x15d   :  { %3871 = vmatprep.subr.bf16.mxu0 %v4493_v2 }
 0x160   :  { %3872 = vmatpush3.bf16.msra.mxu0 %v4221_v1  ;;  %v4236_v1 = vld [vmem:[%s5747_s3 + $0x80] ss:$12 sps:$4 sm:$0xff]  }
 0x161   :  { %3873 = vmatprep.subr.bf16.mxu0 %v4493_v2 }
 0x164   :  { %3874 = vmatpush3.bf16.msra.mxu0 %v4222_v4  ;;  %v4237_v4 = vld [vmem:[%s5747_s3 + $0x98] ss:$12 sps:$4 sm:$0xff]  }
 0x165   :  { %1206 = vmatprep.subr.bf16.mxu0 %v4624_v25  ;;  %v4223_v25 = vld [vmem:[%s5749_s5] sm:$0xff]  }
 0x166   :  { %3880 = vmatpush3.bf16.msra.mxu1 %v4223_v25  ;;  %v4238_v25 = vld [vmem:[%s5747_s3 + $0xb0] ss:$12 sps:$4 sm:$0xff]  }
 0x167   :  { %3876 = vmatmul.mubr.bf16.vlgmr.msra.gmra.mrb[12].mxu0 %v556_v57  ;;  %3881 = vmatprep.subr.bf16.mxu1 %v4493_v2 }
 0x168   :  { %1207 = vmatpush1.bf16.msra.mxu0 %v4634_v27  ;;  %1238 = vmatprep.mubr.bf16.mxu0 %v4494_v3  ;;  %v4224_v27 = vld [vmem:[%s5749_s5 + $0x8] sm:$0xff]  }
 0x169   :  { %1208 = vmatprep.subr.bf16.mxu0 %v4643_v29  ;;  %v4225_v29 = vld [vmem:[%s5749_s5 + $0x10] sm:$0xff]  }
 0x16a   :  { %3882 = vmatpush3.bf16.msra.mxu1 %v4224_v27  ;;  %v4455_v27 = vld [vmem:[%s5747_s3 + $0x4] ss:$12 sps:$4 sm:$0xff]  }
 0x16b   :  { %3883 = vmatprep.subr.bf16.mxu1 %v4493_v2 }
 0x16c   :  { %1209 = vmatpush1.bf16.msra.mxu0 %v4650_v30  ;;  %v4226_v30 = vld [vmem:[%s5749_s5 + $0x18] sm:$0xff]  }
 0x16d   :  { %1210 = vmatprep.subr.bf16.mxu0 %v4660_v32  ;;  %v4227_v32 = vld [vmem:[%s5749_s5 + $0x20] sm:$0xff]  }
 0x16e   :  { %3884 = vmatpush3.bf16.msra.mxu1 %v4225_v29  ;;  %v4456_v29 = vld [vmem:[%s5747_s3] ss:$12 sps:$4 sm:$0xff]  }
 0x16f   :  { %3885 = vmatprep.subr.bf16.mxu1 %v4493_v2 }
 0x170   :  { %1211 = vmatpush1.bf16.msra.mxu0 %v4666_v33  ;;  %v4228_v33 = vld [vmem:[%s5749_s5 + $0x28] sm:$0xff]  }
 0x171   :  { %1212 = vmatprep.subr.bf16.mxu0 %v4675_v35  ;;  %v4229_v35 = vld [vmem:[%s5749_s5 + $0x30] sm:$0xff]  }
 0x172   :  { %3886 = vmatpush3.bf16.msra.mxu1 %v4226_v30  ;;  %v4457_v30 = vld [vmem:[%s5747_s3 + $0x1c] ss:$12 sps:$4 sm:$0xff]  }
 0x173   :  { %3887 = vmatprep.subr.bf16.mxu1 %v4493_v2 }
 0x174   :  { %1213 = vmatpush1.bf16.msra.mxu0 %v4683_v36  ;;  %v4230_v36 = vld [vmem:[%s5749_s5 + $0x38] sm:$0xff]  }
 0x175   :  { %1214 = vmatprep.subr.bf16.mxu0 %v4691_v38  ;;  %v3380_v38 = vld [vmem:[%s5744_s0 + $0x18] sm:$0xff] }
 0x176   :  { %3888 = vmatpush3.bf16.msra.mxu1 %v4227_v32  ;;  %v4458_v32 = vld [vmem:[%s5747_s3 + $0x18] ss:$12 sps:$4 sm:$0xff]  }
 0x177   :  { %3889 = vmatprep.subr.bf16.mxu1 %v4493_v2 }
 0x178   :  { %1215 = vmatpush1.bf16.msra.mxu0 %v4700_v39  ;;  %v3381_v39 = vld [vmem:[%s5744_s0 + $0x20] sm:$0xff] }
 0x179   :  { %1216 = vmatprep.subr.bf16.mxu0 %v4710_v41  ;;  %v4945_v41 = vld [vmem:[%s5750_s6] ss:$0 sm:$0xff]  ;;  %v667_v7 = vadd.f32 %v3381_v39, %v4824_v61  ;;  %v4463_v39 = vld [vmem:[%s5747_s3 + $0x64] ss:$12 sps:$4 sm:$0xff]  }
 0x17a   :  { %3890 = vmatpush3.bf16.msra.mxu1 %v4228_v33  ;;  %v4459_v33 = vld [vmem:[%s5747_s3 + $0x34] ss:$12 sps:$4 sm:$0xff]  }
 0x17b   :  { %3891 = vmatprep.subr.bf16.mxu1 %v4493_v2 }
 0x17c   :  { %1217 = vmatpush1.bf16.msra.mxu0 %v4718_v42  ;;  %v666_v42 = vadd.f32 %v3380_v38, %v4822_v60  ;;  %v4462_v38 = vld [vmem:[%s5747_s3 + $0x48] ss:$12 sps:$4 sm:$0xff]  }
 0x17d   :  { %1218 = vmatprep.subr.bf16.mxu0 %v4726_v44 }
 0x17e   :  { %3892 = vmatpush3.bf16.msra.mxu1 %v4229_v35  ;;  %v4460_v35 = vld [vmem:[%s5747_s3 + $0x30] ss:$12 sps:$4 sm:$0xff]  }
 0x17f   :  { %3893 = vmatprep.subr.bf16.mxu1 %v4493_v2 }
 0x180   :  { %1219 = vmatpush1.bf16.msra.mxu0 %v4734_v45 }
 0x181   :  { %1220 = vmatprep.subr.bf16.mxu0 %v4742_v47 }
 0x182   :  { %3894 = vmatpush3.bf16.msra.mxu1 %v4230_v36  ;;  %v4461_v36 = vld [vmem:[%s5747_s3 + $0x4c] ss:$12 sps:$4 sm:$0xff]  }
 0x183   :  { %3899 = vmatprep.subr.bf16.mxu1 %v4493_v2 }
 0x184   :  { %1221 = vmatpush1.bf16.msra.mxu0 %v4750_v48 }
 0x185   :  { %3919 = vmatprep.subr.bf16.mxu0 %v4493_v2 }
 0x21a   :  { %v655_v5 = vpop.f32.mrb[8].mxu0  ;;  %v863_v6 = vpop.f32.mrb[8].mxu1 }
 0x21b   :  { %v656_v8 = vadd.f32 %v4945_v41, %v655_v5  ;;  %v910_v9 = vadd.f32 %v863_v6, %v666_v42  ;;  %v3857_v10 = vpop.f32.mrb[9].mxu0  ;;  %v865_v11 = vpop.f32.mrb[9].mxu1  ;;  %v4464_v42 = vld [vmem:[%s5747_s3 + $0x60] ss:$12 sps:$4 sm:$0xff]   ;;  %v4465_v5 = vld [vmem:[%s5747_s3 + $0x7c] ss:$12 sps:$4 sm:$0xff]  }
 0x21c   :  { %v917_v12 = vadd.f32 %v865_v11, %v667_v7  ;;  %v658_v13 = vpop.f32.mrb[10].mxu0  ;;  %v867_v14 = vpop.f32.mrb[10].mxu1  ;;  %v4466_v6 = vld [vmem:[%s5747_s3 + $0x78] ss:$12 sps:$4 sm:$0xff]   ;;  %v3418_v11 = vld [vmem:[%s5744_s0 + $0x30] sm:$0xff] }
 0x21d   :  { %661 = vst [vmem:[%s5751_s7] sm:$0xff] %v656_v8  ;;  %v3407_v15 = vmul.f32 -1.442695, %v910_v9  ;;  %v3858_v16 = vpop.f32.mrb[11].mxu0  ;;  %v868_v17 = vpop.f32.mrb[11].mxu1  ;;  %v4239_v7 = vld [vmem:[%s5749_s5] sm:$0xff]   ;;  %v4240_v8 = vld [vmem:[%s5749_s5 + $0x8] sm:$0xff]   ;;  %v1043_v13 = vadd.f32 %v3418_v11, %v4822_v60 }
 0x21e   :  { %v3408_v18 = vmul.f32 -1.442695, %v917_v12  ;;  %v4245_v9 = vld [vmem:[%s5749_s5 + $0x30] sm:$0xff]   ;;  %v4246_v10 = vld [vmem:[%s5749_s5 + $0x38] sm:$0xff]  }
 0x21f   :  { %4385 = vpow2.f32 %v3407_v15  ;;  %v3419_v12 = vld [vmem:[%s5744_s0 + $0x38] sm:$0xff]  ;;  %v5189_v11 = vld [vmem:[%s5747_s3 + $0x48] ss:$12 sps:$4 sm:$0xff]  }
 0x220   :  { %4387 = vpow2.f32 %v3408_v18  ;;  %v1044_v16 = vadd.f32 %v3419_v12, %v4824_v61  ;;  %v4271_v12 = vld [vmem:[%s5749_s5 + $0x20] sm:$0xff]  }
 0x229   :  { %v4386_v19 = vpop.eup %4385 }
 0x22a   :  { %v914_v20 = vadd.f32 1.0, %v4386_v19  ;;  %v4388_v21 = vpop.eup %4387 }
 0x22b   :  { %v921_v22 = vadd.f32 1.0, %v4388_v21 }
 0x22c   :  { %4389 = vrcp.f32 %v914_v20 }
 0x22d   :  { %4391 = vrcp.f32 %v921_v22 }
 0x236   :  { %v4390_v37 = vpop.eup %4389 }
 0x237   :  { %v4392_v51 = vpop.eup %4391 }
 0x238   :  { %v928_v52 = vsub.f32 1.0, %v4392_v51  ;;  %v930_v56 = vmul.f32 %v4392_v51, %v4847_v55  ;;  %v4233_v55 = vld [vmem:[%s5747_s3 + $0x38] ss:$12 sps:$4 sm:$0xff]  }
 0x23a   :  { %v904_v26 = vpop.f32.mrb[12].mxu0 }
 0x23b   :  { %v924_v31 = vadd.f32 %v4839_v28, %v904_v26  ;;  %v3877_v34 = vpop.f32.mrb[13].mxu0 }
 0x23c   :  { %v907_v40 = vpop.f32.mrb[14].mxu0 }
 0x23d   :  { %v925_v46 = vmul.f32 %v4390_v37, %v924_v31  ;;  %v3878_v49 = vpop.f32.mrb[15].mxu0 }
 0x23f   :  { %v926_v50 = vadd.f32 %v925_v46, %v668_v43 }
 0x241   :  { %4393 = vtanh.f32 %v926_v50  ;;  %v3420_v50 = vld [vmem:[%s5744_s0 + $0x40] sm:$0xff] }
 0x24b   :  { %v4394_v53 = vpop.eup %4393 }
 0x24c   :  { %v929_v54 = vmul.f32 %v4394_v53, %v928_v52 }
 0x24e   :  { %v4959_v57 = vadd.f32 %v930_v56, %v929_v54 }
 0x250   :  { %v932_v23 = vpack.c.bf16 %v4959_v57, %v4959_v57 }
 0x252   :  { %3896 = vmatmul.mubr.bf16.vlgmr.msra.gmra.mrb[12].mxu1 %v932_v23  ;;  %1239 = vmatmul.mubr.bf16.vlgmr.msra.gmra.mrb[16].mxu0 %v932_v23 }
 0x253   :  { %3900 = vmatpush3.bf16.msra.mxu1 %v4231_v58  ;;  %3915 = vmatprep.mubr.msk.bf16.mxu1 %vm4495_vm0, %v4493_v2  ;;  %v1045_v58 = vadd.f32 %v3420_v50, %v4826_v0 }
 0x254   :  { %3901 = vmatprep.subr.bf16.mxu1 %v4493_v2  ;;  %3935 = vmatprep.mubr.msk.bf16.mxu0 %vm4495_vm0, %v4493_v2 }
 0x255   :  { %3920 = vmatpush3.bf16.msra.mxu0 %v4239_v7  ;;  %v5146_v7 = vld [vmem:[%s5747_s3 + $0x1c] ss:$12 sps:$4 sm:$0xff]  }
 0x256   :  { %3921 = vmatprep.subr.bf16.mxu0 %v4493_v2 }
 0x257   :  { %3902 = vmatpush3.bf16.msra.mxu1 %v4232_v59 }
 0x258   :  { %3903 = vmatprep.subr.bf16.mxu1 %v4493_v2 }
 0x259   :  { %3922 = vmatpush3.bf16.msra.mxu0 %v4240_v8  ;;  %v4259_v8 = vld [vmem:[%s5749_s5 + $0x8] sm:$0xff]  }
 0x25a   :  { %3923 = vmatprep.subr.bf16.mxu0 %v4493_v2 }
 0x25b   :  { %3904 = vmatpush3.bf16.msra.mxu1 %v4233_v55 }
 0x25c   :  { %3905 = vmatprep.subr.bf16.mxu1 %v4493_v2 }
 0x25f   :  { %3906 = vmatpush3.bf16.msra.mxu1 %v4234_v62 }
 0x260   :  { %3907 = vmatprep.subr.bf16.mxu1 %v4493_v2 }
 0x263   :  { %3908 = vmatpush3.bf16.msra.mxu1 %v4235_v63 }
 0x264   :  { %3909 = vmatprep.subr.bf16.mxu1 %v4493_v2 }
 0x267   :  { %3910 = vmatpush3.bf16.msra.mxu1 %v4236_v1 }
 0x268   :  { %3911 = vmatprep.subr.bf16.mxu1 %v4493_v2 }
 0x26b   :  { %3912 = vmatpush3.bf16.msra.mxu1 %v4237_v4 }
 0x26c   :  { %3913 = vmatprep.subr.bf16.mxu1 %v4493_v2 }
 0x26f   :  { %3914 = vmatpush3.bf16.msra.mxu1 %v4238_v25 }
 0x270   :  { %1583 = vmatprep.subr.bf16.mxu1 %v4455_v27 }
 0x272   :  { %3916 = vmatmul.mubr.bf16.vlgmr.msra.gmra.mrb[16].mxu1 %v932_v23 }
 0x273   :  { %1584 = vmatpush1.bf16.msra.mxu1 %v4456_v29  ;;  %1615 = vmatprep.mubr.bf16.mxu1 %v4494_v3  ;;  %v4247_v29 = vld [vmem:[%s5747_s3 + $0x8] ss:$12 sps:$4 sm:$0xff]  }
 0x274   :  { %1585 = vmatprep.subr.bf16.mxu1 %v4457_v30 }
 0x277   :  { %1586 = vmatpush1.bf16.msra.mxu1 %v4458_v32  ;;  %v4248_v32 = vld [vmem:[%s5747_s3 + $0x20] ss:$12 sps:$4 sm:$0xff]  }
 0x278   :  { %1587 = vmatprep.subr.bf16.mxu1 %v4459_v33  ;;  %v4250_v33 = vld [vmem:[%s5747_s3 + $0x50] ss:$12 sps:$4 sm:$0xff]  }
 0x27b   :  { %1588 = vmatpush1.bf16.msra.mxu1 %v4460_v35  ;;  %v4251_v35 = vld [vmem:[%s5747_s3 + $0x68] ss:$12 sps:$4 sm:$0xff]  }
 0x27c   :  { %1589 = vmatprep.subr.bf16.mxu1 %v4461_v36  ;;  %v4252_v36 = vld [vmem:[%s5747_s3 + $0x80] ss:$12 sps:$4 sm:$0xff]  }
 0x27f   :  { %1590 = vmatpush1.bf16.msra.mxu1 %v4462_v38  ;;  %v4253_v38 = vld [vmem:[%s5747_s3 + $0x98] ss:$12 sps:$4 sm:$0xff]  }
 0x280   :  { %1591 = vmatprep.subr.bf16.mxu1 %v4463_v39  ;;  %v4254_v39 = vld [vmem:[%s5747_s3 + $0xb0] ss:$12 sps:$4 sm:$0xff]  }
 0x283   :  { %1592 = vmatpush1.bf16.msra.mxu1 %v4464_v42  ;;  %v4255_v42 = vld [vmem:[%s5749_s5] sm:$0xff]  }
 0x284   :  { %1593 = vmatprep.subr.bf16.mxu1 %v4465_v5  ;;  %v5136_v5 = vld [vmem:[%s5747_s3] ss:$12 sps:$4 sm:$0xff]  }
 0x287   :  { %1594 = vmatpush1.bf16.msra.mxu1 %v4466_v6  ;;  %v5141_v6 = vld [vmem:[%s5747_s3 + $0x4] ss:$12 sps:$4 sm:$0xff]  }
 0x288   :  { %1595 = vmatprep.subr.bf16.mxu1 %v4726_v44  ;;  %v4241_v44 = vld [vmem:[%s5749_s5 + $0x10] sm:$0xff]  }
 0x289   :  { %3924 = vmatpush3.bf16.msra.mxu0 %v4241_v44  ;;  %v5157_v44 = vld [vmem:[%s5747_s3 + $0x18] ss:$12 sps:$4 sm:$0xff]  }
 0x28a   :  { %3925 = vmatprep.subr.bf16.mxu0 %v4493_v2 }
 0x28b   :  { %1596 = vmatpush1.bf16.msra.mxu1 %v4734_v45  ;;  %v4242_v45 = vld [vmem:[%s5749_s5 + $0x18] sm:$0xff]  }
 0x28c   :  { %1597 = vmatprep.subr.bf16.mxu1 %v4742_v47  ;;  %v4243_v47 = vld [vmem:[%s5749_s5 + $0x20] sm:$0xff]  }
 0x28d   :  { %3926 = vmatpush3.bf16.msra.mxu0 %v4242_v45  ;;  %v4263_v45 = vld [vmem:[%s5749_s5 + $0x10] sm:$0xff]  }
 0x28e   :  { %3927 = vmatprep.subr.bf16.mxu0 %v4493_v2 }
 0x28f   :  { %1598 = vmatpush1.bf16.msra.mxu1 %v4750_v48  ;;  %v4244_v48 = vld [vmem:[%s5749_s5 + $0x28] sm:$0xff]  }
 0x290   :  { %3959 = vmatprep.subr.bf16.mxu1 %v4493_v2 }
 0x291   :  { %3928 = vmatpush3.bf16.msra.mxu0 %v4243_v47  ;;  %v5168_v47 = vld [vmem:[%s5747_s3 + $0x34] ss:$12 sps:$4 sm:$0xff]  }
 0x292   :  { %3929 = vmatprep.subr.bf16.mxu0 %v4493_v2 }
 0x295   :  { %3930 = vmatpush3.bf16.msra.mxu0 %v4244_v48  ;;  %v5173_v48 = vld [vmem:[%s5747_s3 + $0x30] ss:$12 sps:$4 sm:$0xff]  }
 0x296   :  { %3931 = vmatprep.subr.bf16.mxu0 %v4493_v2 }
 0x299   :  { %3932 = vmatpush3.bf16.msra.mxu0 %v4245_v9  ;;  %v4267_v9 = vld [vmem:[%s5749_s5 + $0x18] sm:$0xff]  }
 0x29a   :  { %3933 = vmatprep.subr.bf16.mxu0 %v4493_v2 }
 0x29d   :  { %3934 = vmatpush3.bf16.msra.mxu0 %v4246_v10  ;;  %v5184_v10 = vld [vmem:[%s5747_s3 + $0x4c] ss:$12 sps:$4 sm:$0xff]  }
 0x29e   :  { %3939 = vmatprep.subr.bf16.mxu0 %v4493_v2 }
 0x325   :  { %v1031_v14 = vpop.f32.mrb[12].mxu1  ;;  %v1240_v15 = vpop.f32.mrb[16].mxu0 }
 0x326   :  { %v1032_v17 = vadd.f32 %v4945_v41, %v1031_v14  ;;  %v1287_v18 = vadd.f32 %v1240_v15, %v1043_v13  ;;  %v3897_v19 = vpop.f32.mrb[13].mxu1  ;;  %v1242_v20 = vpop.f32.mrb[17].mxu0  ;;  %v5200_v13 = vld [vmem:[%s5747_s3 + $0x64] ss:$12 sps:$4 sm:$0xff]   ;;  %v5205_v14 = vld [vmem:[%s5747_s3 + $0x60] ss:$12 sps:$4 sm:$0xff]  }
 0x327   :  { %v1294_v21 = vadd.f32 %v1242_v20, %v1044_v16  ;;  %v1034_v22 = vpop.f32.mrb[14].mxu1  ;;  %v1244_v24 = vpop.f32.mrb[18].mxu0  ;;  %v4275_v15 = vld [vmem:[%s5749_s5 + $0x28] sm:$0xff]   ;;  %v4279_v19 = vld [vmem:[%s5749_s5 + $0x30] sm:$0xff]  }
 0x328   :  { %3417 = vst [vmem:[%s5751_s7 + $0x8] sm:$0xff] %v1032_v17  ;;  %v3445_v26 = vmul.f32 -1.442695, %v1287_v18  ;;  %v3898_v31 = vpop.f32.mrb[15].mxu1  ;;  %v1245_v34 = vpop.f32.mrb[19].mxu0  ;;  %v4283_v22 = vld [vmem:[%s5749_s5 + $0x38] sm:$0xff]  }
 0x329   :  { %v3446_v37 = vmul.f32 -1.442695, %v1294_v21  ;;  %v5214_v16 = vld [vmem:[%s5747_s3 + $0x7c] ss:$12 sps:$4 sm:$0xff]   ;;  %v5221_v17 = vld [vmem:[%s5747_s3 + $0x78] ss:$12 sps:$4 sm:$0xff]  }
 0x32a   :  { %4395 = vpow2.f32 %v3445_v26  ;;  %v5227_v18 = vld [vmem:[%s5747_s3 + $0x94] ss:$12 sps:$4 sm:$0xff]   ;;  %v5237_v20 = vld [vmem:[%s5747_s3 + $0x90] ss:$12 sps:$4 sm:$0xff]   ;;  %v5243_v21 = vld [vmem:[%s5747_s3 + $0xac] ss:$12 sps:$4 sm:$0xff]  }
 0x32b   :  { %4397 = vpow2.f32 %v3446_v37  ;;  %v5253_v24 = vld [vmem:[%s5747_s3 + $0xa8] ss:$12 sps:$4 sm:$0xff]  }
 0x32c   :  { %v3456_v26 = vld [vmem:[%s5744_s0 + $0x48] sm:$0xff]  ;;  %v3457_v31 = vld [vmem:[%s5744_s0 + $0x50] sm:$0xff] }
 0x32d   :  { %v1420_v34 = vadd.f32 %v3456_v26, %v4822_v60  ;;  %v4290_v26 = vld [vmem:[%s5747_s3 + $0x50] ss:$12 sps:$4 sm:$0xff]  }
 0x334   :  { %v4396_v40 = vpop.eup %4395 }
 0x335   :  { %v1291_v43 = vadd.f32 1.0, %v4396_v40  ;;  %v4398_v46 = vpop.eup %4397 }
 0x336   :  { %v1298_v49 = vadd.f32 1.0, %v4398_v46 }
 0x337   :  { %4399 = vrcp.f32 %v1291_v43  ;;  %v1421_v43 = vadd.f32 %v3457_v31, %v4824_v61  ;;  %v4291_v31 = vld [vmem:[%s5747_s3 + $0x68] ss:$12 sps:$4 sm:$0xff]  }
 0x338   :  { %4401 = vrcp.f32 %v1298_v49 }
 0x341   :  { %v4400_v54 = vpop.eup %4399 }
 0x342   :  { %v4402_v62 = vpop.eup %4401 }
 0x343   :  { %v1305_v63 = vsub.f32 1.0, %v4402_v62  ;;  %v1307_v25 = vmul.f32 %v4402_v62, %v4959_v57  ;;  %v4249_v57 = vld [vmem:[%s5747_s3 + $0x38] ss:$12 sps:$4 sm:$0xff]  }
 0x345   :  { %v1281_v51 = vpop.f32.mrb[16].mxu1 }
 0x346   :  { %v1301_v52 = vadd.f32 %v4839_v28, %v1281_v51  ;;  %v3917_v53 = vpop.f32.mrb[17].mxu1 }
 0x347   :  { %v1284_v56 = vpop.f32.mrb[18].mxu1 }
 0x348   :  { %v1302_v23 = vmul.f32 %v4400_v54, %v1301_v52  ;;  %v3918_v59 = vpop.f32.mrb[19].mxu1 }
 0x34a   :  { %v1303_v55 = vadd.f32 %v1302_v23, %v1045_v58 }
 0x34c   :  { %4403 = vtanh.f32 %v1303_v55 }
 0x356   :  { %v4404_v1 = vpop.eup %4403 }
 0x357   :  { %v1306_v4 = vmul.f32 %v4404_v1, %v1305_v63 }
 0x359   :  { %v5090_v27 = vadd.f32 %v1307_v25, %v1306_v4  ;;  %v3458_v4 = vld [vmem:[%s5744_s0 + $0x58] sm:$0xff] }
 0x35b   :  { %v1309_v30 = vpack.c.bf16 %v5090_v27, %v5090_v27 }
 0x35d   :  { %3936 = vmatmul.mubr.bf16.vlgmr.msra.gmra.mrb[20].mxu0 %v1309_v30  ;;  %1616 = vmatmul.mubr.bf16.vlgmr.msra.gmra.mrb[20].mxu1 %v1309_v30 }
 0x35e   :  { %3940 = vmatpush3.bf16.msra.mxu0 %v4247_v29  ;;  %3955 = vmatprep.mubr.msk.bf16.mxu0 %vm4495_vm0, %v4493_v2 }
 0x35f   :  { %3941 = vmatprep.subr.bf16.mxu0 %v4493_v2  ;;  %3975 = vmatprep.mubr.msk.bf16.mxu1 %vm4495_vm0, %v4493_v2 }
 0x360   :  { %3960 = vmatpush3.bf16.msra.mxu1 %v4255_v42 }
 0x361   :  { %3961 = vmatprep.subr.bf16.mxu1 %v4493_v2 }
 0x362   :  { %3942 = vmatpush3.bf16.msra.mxu0 %v4248_v32 }
 0x363   :  { %3943 = vmatprep.subr.bf16.mxu0 %v4493_v2 }
 0x364   :  { %3962 = vmatpush3.bf16.msra.mxu1 %v4259_v8 }
 0x365   :  { %3963 = vmatprep.subr.bf16.mxu1 %v4493_v2 }
 0x366   :  { %3944 = vmatpush3.bf16.msra.mxu0 %v4249_v57 }
 0x367   :  { %3945 = vmatprep.subr.bf16.mxu0 %v4493_v2 }
 0x368   :  { %3964 = vmatpush3.bf16.msra.mxu1 %v4263_v45 }
 0x369   :  { %3965 = vmatprep.subr.bf16.mxu1 %v4493_v2 }
 0x36a   :  { %3946 = vmatpush3.bf16.msra.mxu0 %v4250_v33  ;;  %v1422_v33 = vadd.f32 %v3458_v4, %v4826_v0 }
 0x36b   :  { %3947 = vmatprep.subr.bf16.mxu0 %v4493_v2 }
 0x36c   :  { %3966 = vmatpush3.bf16.msra.mxu1 %v4267_v9 }
 0x36d   :  { %3967 = vmatprep.subr.bf16.mxu1 %v4493_v2 }
 0x36e   :  { %3948 = vmatpush3.bf16.msra.mxu0 %v4251_v35 }
 0x36f   :  { %3949 = vmatprep.subr.bf16.mxu0 %v4493_v2 }
 0x370   :  { %3968 = vmatpush3.bf16.msra.mxu1 %v4271_v12 }
 0x371   :  { %3969 = vmatprep.subr.bf16.mxu1 %v4493_v2 }
 0x372   :  { %3950 = vmatpush3.bf16.msra.mxu0 %v4252_v36 }
 0x373   :  { %3951 = vmatprep.subr.bf16.mxu0 %v4493_v2 }
 0x374   :  { %3970 = vmatpush3.bf16.msra.mxu1 %v4275_v15  ;;  %v4287_v15 = vld [vmem:[%s5747_s3 + $0x8] ss:$12 sps:$4 sm:$0xff]  }
 0x375   :  { %3971 = vmatprep.subr.bf16.mxu1 %v4493_v2 }
 0x376   :  { %3952 = vmatpush3.bf16.msra.mxu0 %v4253_v38 }
 0x377   :  { %3953 = vmatprep.subr.bf16.mxu0 %v4493_v2 }
 0x378   :  { %3972 = vmatpush3.bf16.msra.mxu1 %v4279_v19 }
 0x379   :  { %3973 = vmatprep.subr.bf16.mxu1 %v4493_v2 }
 0x37a   :  { %3954 = vmatpush3.bf16.msra.mxu0 %v4254_v39 }
 0x37b   :  { %1960 = vmatprep.subr.bf16.mxu0 %v5141_v6 }
 0x37c   :  { %3974 = vmatpush3.bf16.msra.mxu1 %v4283_v22  ;;  %v4288_v22 = vld [vmem:[%s5747_s3 + $0x20] ss:$12 sps:$4 sm:$0xff]  }
 0x37d   :  { %3956 = vmatmul.mubr.bf16.vlgmr.msra.gmra.mrb[24].mxu0 %v1309_v30  ;;  %3979 = vmatprep.subr.bf16.mxu1 %v4493_v2 }
 0x37e   :  { %1992 = vmatprep.mubr.bf16.mxu0 %v4494_v3  ;;  %1961 = vmatpush1.bf16.msra.mxu0 %v5136_v5 }
 0x37f   :  { %1962 = vmatprep.subr.bf16.mxu0 %v5146_v7 }
 0x382   :  { %1963 = vmatpush1.bf16.msra.mxu0 %v5157_v44 }
 0x383   :  { %1964 = vmatprep.subr.bf16.mxu0 %v5168_v47 }
 0x386   :  { %1965 = vmatpush1.bf16.msra.mxu0 %v5173_v48 }
 0x387   :  { %1966 = vmatprep.subr.bf16.mxu0 %v5184_v10 }
 0x38a   :  { %1967 = vmatpush1.bf16.msra.mxu0 %v5189_v11 }
 0x38b   :  { %1968 = vmatprep.subr.bf16.mxu0 %v5200_v13 }
 0x38e   :  { %1969 = vmatpush1.bf16.msra.mxu0 %v5205_v14 }
 0x38f   :  { %1970 = vmatprep.subr.bf16.mxu0 %v5214_v16 }
 0x392   :  { %1971 = vmatpush1.bf16.msra.mxu0 %v5221_v17 }
 0x393   :  { %1972 = vmatprep.subr.bf16.mxu0 %v5227_v18 }
 0x396   :  { %1973 = vmatpush1.bf16.msra.mxu0 %v5237_v20 }
 0x397   :  { %1974 = vmatprep.subr.bf16.mxu0 %v5243_v21 }
 0x39a   :  { %1975 = vmatpush1.bf16.msra.mxu0 %v5253_v24 }
 0x39b   :  { %3999 = vmatprep.subr.bf16.mxu0 %v4493_v2 }
 0x430   :  { %v1408_v37 = vpop.f32.mrb[20].mxu0  ;;  %v1617_v40 = vpop.f32.mrb[20].mxu1 }
 0x431   :  { %v1409_v46 = vadd.f32 %v4945_v41, %v1408_v37  ;;  %v1664_v49 = vadd.f32 %v1617_v40, %v1420_v34  ;;  %v3937_v50 = vpop.f32.mrb[21].mxu0  ;;  %v1619_v51 = vpop.f32.mrb[21].mxu1  ;;  %v4292_v34 = vld [vmem:[%s5747_s3 + $0x80] ss:$12 sps:$4 sm:$0xff]   ;;  %v4293_v37 = vld [vmem:[%s5747_s3 + $0x98] ss:$12 sps:$4 sm:$0xff]  }
 0x432   :  { %v1671_v52 = vadd.f32 %v1619_v51, %v1421_v43  ;;  %v1411_v53 = vpop.f32.mrb[22].mxu0  ;;  %v1621_v54 = vpop.f32.mrb[22].mxu1  ;;  %v4294_v40 = vld [vmem:[%s5747_s3 + $0xb0] ss:$12 sps:$4 sm:$0xff]   ;;  %v4295_v43 = vld [vmem:[%s5749_s5] sm:$0xff]  }
 0x433   :  { %3455 = vst [vmem:[%s5751_s7 + $0x10] sm:$0xff] %v1409_v46  ;;  %v3483_v56 = vmul.f32 -1.442695, %v1664_v49  ;;  %v3938_v58 = vpop.f32.mrb[23].mxu0  ;;  %v1622_v23 = vpop.f32.mrb[23].mxu1  ;;  %v4296_v46 = vld [vmem:[%s5749_s5 + $0x8] sm:$0xff]  }
 0x434   :  { %v3484_v59 = vmul.f32 -1.442695, %v1671_v52  ;;  %v4297_v49 = vld [vmem:[%s5749_s5 + $0x10] sm:$0xff]   ;;  %v4298_v50 = vld [vmem:[%s5749_s5 + $0x18] sm:$0xff]   ;;  %v4299_v51 = vld [vmem:[%s5749_s5 + $0x20] sm:$0xff]  }
 0x435   :  { %4405 = vpow2.f32 %v3483_v56  ;;  %v4300_v52 = vld [vmem:[%s5749_s5 + $0x28] sm:$0xff]   ;;  %v4301_v53 = vld [vmem:[%s5749_s5 + $0x30] sm:$0xff]   ;;  %v4302_v54 = vld [vmem:[%s5749_s5 + $0x38] sm:$0xff]  }
 0x436   :  { %4407 = vpow2.f32 %v3484_v59  ;;  %v3494_v56 = vld [vmem:[%s5744_s0 + $0x60] sm:$0xff]  ;;  %v3495_v58 = vld [vmem:[%s5744_s0 + $0x68] sm:$0xff] }
 0x437   :  { %v1797_v23 = vadd.f32 %v3494_v56, %v4822_v60  ;;  %v4307_v56 = vld [vmem:[%s5747_s3 + $0x68] ss:$12 sps:$4 sm:$0xff]  }
 0x43f   :  { %v4406_v55 = vpop.eup %4405 }
 0x440   :  { %v1668_v62 = vadd.f32 1.0, %v4406_v55  ;;  %v4408_v63 = vpop.eup %4407 }
 0x441   :  { %v1675_v1 = vadd.f32 1.0, %v4408_v63 }
 0x442   :  { %4409 = vrcp.f32 %v1668_v62  ;;  %v1798_v62 = vadd.f32 %v3495_v58, %v4824_v61  ;;  %v4308_v58 = vld [vmem:[%s5747_s3 + $0x80] ss:$12 sps:$4 sm:$0xff]  }
 0x443   :  { %4411 = vrcp.f32 %v1675_v1 }
 0x44c   :  { %v4410_v32 = vpop.eup %4409 }
 0x44d   :  { %v4412_v39 = vpop.eup %4411 }
 0x44e   :  { %v1682_v42 = vsub.f32 1.0, %v4412_v39  ;;  %v1684_v9 = vmul.f32 %v4412_v39, %v5090_v27  ;;  %v4289_v27 = vld [vmem:[%s5747_s3 + $0x38] ss:$12 sps:$4 sm:$0xff]  }
 0x450   :  { %v1658_v25 = vpop.f32.mrb[24].mxu0 }
 0x451   :  { %v1678_v29 = vadd.f32 %v4839_v28, %v1658_v25  ;;  %v3957_v30 = vpop.f32.mrb[25].mxu0 }
 0x452   :  { %v1661_v57 = vpop.f32.mrb[26].mxu0 }
 0x453   :  { %v1679_v35 = vmul.f32 %v4410_v32, %v1678_v29  ;;  %v3958_v36 = vpop.f32.mrb[27].mxu0 }
 0x455   :  { %v1680_v38 = vadd.f32 %v1679_v35, %v1422_v33 }
 0x457   :  { %4413 = vtanh.f32 %v1680_v38 }
 0x461   :  { %v4414_v8 = vpop.eup %4413 }
 0x462   :  { %v1683_v45 = vmul.f32 %v4414_v8, %v1682_v42 }
 0x464   :  { %v5277_v12 = vadd.f32 %v1684_v9, %v1683_v45  ;;  %v3496_v45 = vld [vmem:[%s5744_s0 + $0x70] sm:$0xff] }
 0x466   :  { %v1686_v19 = vpack.c.bf16 %v5277_v12, %v5277_v12 }
 0x468   :  { %3976 = vmatmul.mubr.bf16.vlgmr.msra.gmra.mrb[24].mxu1 %v1686_v19  ;;  %1993 = vmatmul.mubr.bf16.vlgmr.msra.gmra.mrb[28].mxu0 %v1686_v19 }
 0x469   :  { %3980 = vmatpush3.bf16.msra.mxu1 %v4287_v15  ;;  %3995 = vmatprep.mubr.msk.bf16.mxu1 %vm4495_vm0, %v4493_v2 }
 0x46a   :  { %3981 = vmatprep.subr.bf16.mxu1 %v4493_v2  ;;  %4015 = vmatprep.mubr.msk.bf16.mxu0 %vm4495_vm0, %v4493_v2 }
 0x46b   :  { %4000 = vmatpush3.bf16.msra.mxu0 %v4295_v43 }
 0x46c   :  { %4001 = vmatprep.subr.bf16.mxu0 %v4493_v2 }
 0x46d   :  { %3982 = vmatpush3.bf16.msra.mxu1 %v4288_v22 }
 0x46e   :  { %3983 = vmatprep.subr.bf16.mxu1 %v4493_v2 }
 0x46f   :  { %4002 = vmatpush3.bf16.msra.mxu0 %v4296_v46 }
 0x470   :  { %4003 = vmatprep.subr.bf16.mxu0 %v4493_v2 }
 0x471   :  { %3984 = vmatpush3.bf16.msra.mxu1 %v4289_v27 }
 0x472   :  { %3985 = vmatprep.subr.bf16.mxu1 %v4493_v2 }
 0x473   :  { %4004 = vmatpush3.bf16.msra.mxu0 %v4297_v49 }
 0x474   :  { %4005 = vmatprep.subr.bf16.mxu0 %v4493_v2 }
 0x475   :  { %3986 = vmatpush3.bf16.msra.mxu1 %v4290_v26  ;;  %v1799_v26 = vadd.f32 %v3496_v45, %v4826_v0 }
 0x476   :  { %3987 = vmatprep.subr.bf16.mxu1 %v4493_v2 }
 0x477   :  { %4006 = vmatpush3.bf16.msra.mxu0 %v4298_v50 }
 0x478   :  { %4007 = vmatprep.subr.bf16.mxu0 %v4493_v2 }
 0x479   :  { %3988 = vmatpush3.bf16.msra.mxu1 %v4291_v31 }
 0x47a   :  { %3989 = vmatprep.subr.bf16.mxu1 %v4493_v2 }
 0x47b   :  { %4008 = vmatpush3.bf16.msra.mxu0 %v4299_v51 }
 0x47c   :  { %4009 = vmatprep.subr.bf16.mxu0 %v4493_v2 }
 0x47d   :  { %3990 = vmatpush3.bf16.msra.mxu1 %v4292_v34 }
 0x47e   :  { %3991 = vmatprep.subr.bf16.mxu1 %v4493_v2 }
 0x47f   :  { %4010 = vmatpush3.bf16.msra.mxu0 %v4300_v52 }
 0x480   :  { %4011 = vmatprep.subr.bf16.mxu0 %v4493_v2 }
 0x481   :  { %3992 = vmatpush3.bf16.msra.mxu1 %v4293_v37 }
 0x482   :  { %3993 = vmatprep.subr.bf16.mxu1 %v4493_v2 }
 0x483   :  { %4012 = vmatpush3.bf16.msra.mxu0 %v4301_v53  ;;  %v4304_v53 = vld [vmem:[%s5747_s3 + $0x20] ss:$12 sps:$4 sm:$0xff]  }
 0x484   :  { %4013 = vmatprep.subr.bf16.mxu0 %v4493_v2 }
 0x485   :  { %3994 = vmatpush3.bf16.msra.mxu1 %v4294_v40 }
 0x486   :  { %2337 = vmatprep.subr.bf16.mxu1 %v5141_v6 }
 0x487   :  { %4014 = vmatpush3.bf16.msra.mxu0 %v4302_v54  ;;  %v4306_v54 = vld [vmem:[%s5747_s3 + $0x50] ss:$12 sps:$4 sm:$0xff]  }
 0x488   :  { %3996 = vmatmul.mubr.bf16.vlgmr.msra.gmra.mrb[28].mxu1 %v1686_v19  ;;  %4019 = vmatprep.subr.bf16.mxu0 %v4493_v2 }
 0x489   :  { %2338 = vmatpush1.bf16.msra.mxu1 %v5136_v5  ;;  %2369 = vmatprep.mubr.bf16.mxu1 %v4494_v3 }
 0x48a   :  { %2339 = vmatprep.subr.bf16.mxu1 %v5146_v7 }
 0x48d   :  { %2340 = vmatpush1.bf16.msra.mxu1 %v5157_v44 }
 0x48e   :  { %2341 = vmatprep.subr.bf16.mxu1 %v5168_v47 }
 0x491   :  { %2342 = vmatpush1.bf16.msra.mxu1 %v5173_v48 }
 0x492   :  { %2343 = vmatprep.subr.bf16.mxu1 %v5184_v10 }
 0x495   :  { %2344 = vmatpush1.bf16.msra.mxu1 %v5189_v11 }
 0x496   :  { %2345 = vmatprep.subr.bf16.mxu1 %v5200_v13 }
 0x499   :  { %2346 = vmatpush1.bf16.msra.mxu1 %v5205_v14 }
 0x49a   :  { %2347 = vmatprep.subr.bf16.mxu1 %v5214_v16 }
 0x49d   :  { %2348 = vmatpush1.bf16.msra.mxu1 %v5221_v17 }
 0x49e   :  { %2349 = vmatprep.subr.bf16.mxu1 %v5227_v18 }
 0x4a1   :  { %2350 = vmatpush1.bf16.msra.mxu1 %v5237_v20 }
 0x4a2   :  { %2351 = vmatprep.subr.bf16.mxu1 %v5243_v21 }
 0x4a5   :  { %2352 = vmatpush1.bf16.msra.mxu1 %v5253_v24 }
 0x4a6   :  { %4039 = vmatprep.subr.bf16.mxu1 %v4493_v2 }
 0x53b   :  { %v1785_v59 = vpop.f32.mrb[24].mxu1  ;;  %v1994_v55 = vpop.f32.mrb[28].mxu0 }
 0x53c   :  { %v1786_v63 = vadd.f32 %v4945_v41, %v1785_v59  ;;  %v2041_v1 = vadd.f32 %v1994_v55, %v1797_v23  ;;  %v3977_v4 = vpop.f32.mrb[25].mxu1  ;;  %v1996_v25 = vpop.f32.mrb[29].mxu0  ;;  %v4309_v23 = vld [vmem:[%s5747_s3 + $0x98] ss:$12 sps:$4 sm:$0xff]   ;;  %v4310_v59 = vld [vmem:[%s5747_s3 + $0xb0] ss:$12 sps:$4 sm:$0xff]  }
 0x53d   :  { %v2048_v29 = vadd.f32 %v1996_v25, %v1798_v62  ;;  %v1788_v30 = vpop.f32.mrb[26].mxu1  ;;  %v1998_v32 = vpop.f32.mrb[30].mxu0 }
 0x53e   :  { %3493 = vst [vmem:[%s5751_s7 + $0x18] sm:$0xff] %v1786_v63  ;;  %v3521_v57 = vmul.f32 -1.442695, %v2041_v1  ;;  %v3978_v33 = vpop.f32.mrb[27].mxu1  ;;  %v1999_v35 = vpop.f32.mrb[31].mxu0 }
 0x53f   :  { %v3522_v36 = vmul.f32 -1.442695, %v2048_v29 }
 0x540   :  { %4415 = vpow2.f32 %v3521_v57 }
 0x541   :  { %4417 = vpow2.f32 %v3522_v36  ;;  %v3534_v36 = vld [vmem:[%s5744_s0 + $0x88] sm:$0xff] }
 0x54a   :  { %v4416_v38 = vpop.eup %4415 }
 0x54b   :  { %v2045_v39 = vadd.f32 1.0, %v4416_v38  ;;  %v4418_v42 = vpop.eup %4417 }
 0x54c   :  { %v2052_v8 = vadd.f32 1.0, %v4418_v42 }
 0x54d   :  { %4419 = vrcp.f32 %v2045_v39  ;;  %v5491_v39 = vld [vmem:[%s5748_s4] ss:$0 sm:$0xff] }
 0x54e   :  { %4421 = vrcp.f32 %v2052_v8 }
 0x557   :  { %v4420_v22 = vpop.eup %4419 }
 0x558   :  { %v4422_v40 = vpop.eup %4421 }
 0x559   :  { %v2059_v43 = vsub.f32 1.0, %v4422_v40  ;;  %v2061_v50 = vmul.f32 %v4422_v40, %v5277_v12  ;;  %v4305_v12 = vld [vmem:[%s5747_s3 + $0x38] ss:$12 sps:$4 sm:$0xff]  }
 0x55b   :  { %v2035_v9 = vpop.f32.mrb[28].mxu1 }
 0x55c   :  { %v2055_v15 = vadd.f32 %v4839_v28, %v2035_v9  ;;  %v3997_v19 = vpop.f32.mrb[29].mxu1  ;;  %v4303_v28 = vld [vmem:[%s5747_s3 + $0x8] ss:$12 sps:$4 sm:$0xff]  }
 0x55d   :  { %v2038_v27 = vpop.f32.mrb[30].mxu1 }
 0x55e   :  { %v2056_v31 = vmul.f32 %v4420_v22, %v2055_v15  ;;  %v3998_v34 = vpop.f32.mrb[31].mxu1  ;;  %v2176_v15 = vadd.f32 %v3534_v36, %v4826_v0 }
 0x560   :  { %v2057_v37 = vadd.f32 %v2056_v31, %v1799_v26 }
 0x562   :  { %4423 = vtanh.f32 %v2057_v37 }
 0x56c   :  { %v4424_v46 = vpop.eup %4423 }
 0x56d   :  { %v2060_v49 = vmul.f32 %v4424_v46, %v2059_v43  ;;  %v4319_v46 = vld [vmem:[%s5747_s3 + $0x8] ss:$12 sps:$4 sm:$0xff]  }
 0x56f   :  { %v5384_v51 = vadd.f32 %v2061_v50, %v2060_v49  ;;  %v4320_v50 = vld [vmem:[%s5747_s3 + $0x20] ss:$12 sps:$4 sm:$0xff]  }
 0x571   :  { %v2063_v52 = vpack.c.bf16 %v5384_v51, %v5384_v51 }
 0x573   :  { %4016 = vmatmul.mubr.bf16.vlgmr.msra.gmra.mrb[32].mxu0 %v2063_v52  ;;  %2370 = vmatmul.mubr.bf16.vlgmr.msra.gmra.mrb[32].mxu1 %v2063_v52 }
 0x574   :  { %4020 = vmatpush3.bf16.msra.mxu0 %v4303_v28  ;;  %4035 = vmatprep.mubr.msk.bf16.mxu0 %vm4495_vm0, %v4493_v2  ;;  %v4322_v28 = vld [vmem:[%s5747_s3 + $0x50] ss:$12 sps:$4 sm:$0xff]  }
 0x575   :  { %4021 = vmatprep.subr.bf16.mxu0 %v4493_v2  ;;  %4055 = vmatprep.mubr.msk.bf16.mxu1 %vm4495_vm0, %v4493_v2 }
 0x578   :  { %4022 = vmatpush3.bf16.msra.mxu0 %v4304_v53  ;;  %v4324_v53 = vld [vmem:[%s5747_s3 + $0x80] ss:$12 sps:$4 sm:$0xff]  }
 0x579   :  { %4023 = vmatprep.subr.bf16.mxu0 %v4493_v2 }
 0x57c   :  { %4024 = vmatpush3.bf16.msra.mxu0 %v4305_v12  ;;  %v4325_v12 = vld [vmem:[%s5747_s3 + $0x98] ss:$12 sps:$4 sm:$0xff]  }
 0x57d   :  { %4025 = vmatprep.subr.bf16.mxu0 %v4493_v2 }
 0x580   :  { %4026 = vmatpush3.bf16.msra.mxu0 %v4306_v54  ;;  %v4326_v54 = vld [vmem:[%s5747_s3 + $0xb0] ss:$12 sps:$4 sm:$0xff]  }
 0x581   :  { %4027 = vmatprep.subr.bf16.mxu0 %v4493_v2 }
 0x584   :  { %4028 = vmatpush3.bf16.msra.mxu0 %v4307_v56  ;;  %v4327_v56 = vld [vmem:[%s5749_s5] sm:$0xff]  }
 0x585   :  { %4029 = vmatprep.subr.bf16.mxu0 %v4493_v2 }
 0x588   :  { %4030 = vmatpush3.bf16.msra.mxu0 %v4308_v58  ;;  %v4328_v58 = vld [vmem:[%s5747_s3] ss:$12 sps:$4 sm:$0xff]  }
 0x589   :  { %4031 = vmatprep.subr.bf16.mxu0 %v4493_v2 }
 0x58c   :  { %4032 = vmatpush3.bf16.msra.mxu0 %v4309_v23  ;;  %v4330_v23 = vld [vmem:[%s5747_s3 + $0x4] ss:$12 sps:$4 sm:$0xff]  }
 0x58d   :  { %4033 = vmatprep.subr.bf16.mxu0 %v4493_v2 }
 0x590   :  { %4034 = vmatpush3.bf16.msra.mxu0 %v4310_v59  ;;  %v4334_v59 = vld [vmem:[%s5747_s3 + $0x1c] ss:$12 sps:$4 sm:$0xff]  }
 0x591   :  { %2714 = vmatprep.subr.bf16.mxu0 %v5141_v6  ;;  %v4312_v6 = vld [vmem:[%s5749_s5 + $0x8] sm:$0xff]  }
 0x593   :  { %4036 = vmatmul.mubr.bf16.vlgmr.msra.gmra.mrb[36].mxu0 %v2063_v52  ;;  %v4323_v52 = vld [vmem:[%s5747_s3 + $0x68] ss:$12 sps:$4 sm:$0xff]  }
 0x594   :  { %2715 = vmatpush1.bf16.msra.mxu0 %v5136_v5  ;;  %2746 = vmatprep.mubr.bf16.mxu0 %v4494_v3  ;;  %v4311_v5 = vld [vmem:[%s5749_s5] sm:$0xff]  }
 0x595   :  { %2716 = vmatprep.subr.bf16.mxu0 %v5146_v7  ;;  %4040 = vmatpush3.bf16.msra.mxu1 %v4311_v5  ;;  %v4313_v7 = vld [vmem:[%s5749_s5 + $0x10] sm:$0xff]   ;;  %v4332_v5 = vld [vmem:[%s5747_s3 + $0x18] ss:$12 sps:$4 sm:$0xff]  }
 0x596   :  { %4041 = vmatprep.subr.bf16.mxu1 %v4493_v2 }
 0x598   :  { %2717 = vmatpush1.bf16.msra.mxu0 %v5157_v44  ;;  %v4314_v44 = vld [vmem:[%s5749_s5 + $0x18] sm:$0xff]  }
 0x599   :  { %2718 = vmatprep.subr.bf16.mxu0 %v5168_v47  ;;  %4042 = vmatpush3.bf16.msra.mxu1 %v4312_v6  ;;  %v4315_v47 = vld [vmem:[%s5749_s5 + $0x20] sm:$0xff]   ;;  %v4335_v6 = vld [vmem:[%s5749_s5 + $0x10] sm:$0xff]  }
 0x59a   :  { %4043 = vmatprep.subr.bf16.mxu1 %v4493_v2 }
 0x59c   :  { %2719 = vmatpush1.bf16.msra.mxu0 %v5173_v48  ;;  %v4316_v48 = vld [vmem:[%s5749_s5 + $0x28] sm:$0xff]  }
 0x59d   :  { %2720 = vmatprep.subr.bf16.mxu0 %v5184_v10  ;;  %4044 = vmatpush3.bf16.msra.mxu1 %v4313_v7  ;;  %v4317_v10 = vld [vmem:[%s5749_s5 + $0x30] sm:$0xff]  }
 0x59e   :  { %4045 = vmatprep.subr.bf16.mxu1 %v4493_v2  ;;  %v4338_v7 = vld [vmem:[%s5747_s3 + $0x34] ss:$12 sps:$4 sm:$0xff]  }
 0x5a0   :  { %2721 = vmatpush1.bf16.msra.mxu0 %v5189_v11  ;;  %v4318_v11 = vld [vmem:[%s5749_s5 + $0x38] sm:$0xff]  }
 0x5a1   :  { %2722 = vmatprep.subr.bf16.mxu0 %v5200_v13  ;;  %4046 = vmatpush3.bf16.msra.mxu1 %v4314_v44  ;;  %v3532_v13 = vld [vmem:[%s5744_s0 + $0x78] sm:$0xff] }
 0x5a2   :  { %4047 = vmatprep.subr.bf16.mxu1 %v4493_v2  ;;  %v4336_v44 = vld [vmem:[%s5747_s3 + $0x30] ss:$12 sps:$4 sm:$0xff]  }
 0x5a4   :  { %2723 = vmatpush1.bf16.msra.mxu0 %v5205_v14  ;;  %v3533_v14 = vld [vmem:[%s5744_s0 + $0x80] sm:$0xff] }
 0x5a5   :  { %2724 = vmatprep.subr.bf16.mxu0 %v5214_v16  ;;  %4048 = vmatpush3.bf16.msra.mxu1 %v4315_v47  ;;  %v2174_v16 = vadd.f32 %v3532_v13, %v4822_v60  ;;  %v4339_v47 = vld [vmem:[%s5749_s5 + $0x18] sm:$0xff]   ;;  %v4346_v13 = vld [vmem:[%s5747_s3 + $0x64] ss:$12 sps:$4 sm:$0xff]  }
 0x5a6   :  { %4049 = vmatprep.subr.bf16.mxu1 %v4493_v2 }
 0x5a8   :  { %2725 = vmatpush1.bf16.msra.mxu0 %v5221_v17 }
 0x5a9   :  { %2726 = vmatprep.subr.bf16.mxu0 %v5227_v18  ;;  %4050 = vmatpush3.bf16.msra.mxu1 %v4316_v48  ;;  %v4342_v48 = vld [vmem:[%s5747_s3 + $0x4c] ss:$12 sps:$4 sm:$0xff]  }
 0x5aa   :  { %4051 = vmatprep.subr.bf16.mxu1 %v4493_v2 }
 0x5ac   :  { %2727 = vmatpush1.bf16.msra.mxu0 %v5237_v20  ;;  %v2175_v20 = vadd.f32 %v3533_v14, %v4824_v61  ;;  %v4344_v14 = vld [vmem:[%s5747_s3 + $0x60] ss:$12 sps:$4 sm:$0xff]  }
 0x5ad   :  { %2728 = vmatprep.subr.bf16.mxu0 %v5243_v21  ;;  %4052 = vmatpush3.bf16.msra.mxu1 %v4317_v10  ;;  %v4340_v10 = vld [vmem:[%s5747_s3 + $0x48] ss:$12 sps:$4 sm:$0xff]  }
 0x5ae   :  { %4053 = vmatprep.subr.bf16.mxu1 %v4493_v2 }
 0x5b0   :  { %2729 = vmatpush1.bf16.msra.mxu0 %v5253_v24 }
 0x5b1   :  { %4079 = vmatprep.subr.bf16.mxu0 %v4493_v2  ;;  %4054 = vmatpush3.bf16.msra.mxu1 %v4318_v11  ;;  %v4343_v11 = vld [vmem:[%s5749_s5 + $0x20] sm:$0xff]  }
 0x5b2   :  { %4059 = vmatprep.subr.bf16.mxu1 %v4493_v2 }
 0x646   :  { %v2162_v17 = vpop.f32.mrb[32].mxu0  ;;  %v2371_v18 = vpop.f32.mrb[32].mxu1 }
 0x647   :  { %v2163_v21 = vadd.f32 %v4945_v41, %v2162_v17  ;;  %v2418_v24 = vadd.f32 %v2371_v18, %v2174_v16  ;;  %v4017_v55 = vpop.f32.mrb[33].mxu0  ;;  %v2373_v62 = vpop.f32.mrb[33].mxu1  ;;  %v4347_v16 = vld [vmem:[%s5749_s5 + $0x28] sm:$0xff]   ;;  %v4348_v18 = vld [vmem:[%s5747_s3 + $0x78] ss:$12 sps:$4 sm:$0xff]  }
 0x648   :  { %v2425_v63 = vadd.f32 %v2373_v62, %v2175_v20  ;;  %v2165_v1 = vpop.f32.mrb[34].mxu0  ;;  %v2375_v4 = vpop.f32.mrb[34].mxu1  ;;  %v4350_v17 = vld [vmem:[%s5747_s3 + $0x7c] ss:$12 sps:$4 sm:$0xff]   ;;  %v4354_v20 = vld [vmem:[%s5747_s3 + $0x94] ss:$12 sps:$4 sm:$0xff]  }
 0x649   :  { %3531 = vst [vmem:[%s5751_s7 + $0x20] sm:$0xff] %v2163_v21  ;;  %v3559_v25 = vmul.f32 -1.442695, %v2418_v24  ;;  %v4018_v29 = vpop.f32.mrb[35].mxu0  ;;  %v2376_v30 = vpop.f32.mrb[35].mxu1  ;;  %v4351_v21 = vld [vmem:[%s5749_s5 + $0x30] sm:$0xff]  }
 0x64a   :  { %v3560_v32 = vmul.f32 -1.442695, %v2425_v63  ;;  %v4352_v24 = vld [vmem:[%s5747_s3 + $0x90] ss:$12 sps:$4 sm:$0xff]   ;;  %v4358_v55 = vld [vmem:[%s5747_s3 + $0xac] ss:$12 sps:$4 sm:$0xff]  }
 0x64b   :  { %4425 = vpow2.f32 %v3559_v25  ;;  %v4355_v62 = vld [vmem:[%s5749_s5 + $0x38] sm:$0xff]   ;;  %v4356_v63 = vld [vmem:[%s5747_s3 + $0xa8] ss:$12 sps:$4 sm:$0xff]  }
 0x64c   :  { %4427 = vpow2.f32 %v3560_v32  ;;  %v3570_v1 = vld [vmem:[%s5744_s0 + $0x90] sm:$0xff]  ;;  %v3571_v4 = vld [vmem:[%s5744_s0 + $0x98] sm:$0xff] }
 0x64d   :  { %v2551_v25 = vadd.f32 %v3570_v1, %v4822_v60  ;;  %v2552_v32 = vadd.f32 %v3571_v4, %v4824_v61 }
 0x655   :  { %v4426_v57 = vpop.eup %4425 }
 0x656   :  { %v2422_v33 = vadd.f32 1.0, %v4426_v57  ;;  %v4428_v41 = vpop.eup %4427  ;;  %v5628_v57 = vld [vmem:[%s5750_s6] ss:$0 sm:$0xff] }
 0x657   :  { %v2429_v35 = vadd.f32 1.0, %v4428_v41 }
 0x658   :  { %4429 = vrcp.f32 %v2422_v33 }
 0x659   :  { %4431 = vrcp.f32 %v2429_v35 }
 0x662   :  { %v4430_v45 = vpop.eup %4429 }
 0x663   :  { %v4432_v26 = vpop.eup %4431 }
 0x664   :  { %v2436_v31 = vsub.f32 1.0, %v4432_v26  ;;  %v2438_v40 = vmul.f32 %v4432_v26, %v5384_v51  ;;  %v4321_v51 = vld [vmem:[%s5747_s3 + $0x38] ss:$12 sps:$4 sm:$0xff]  }
 0x666   :  { %v2412_v38 = vpop.f32.mrb[36].mxu0 }
 0x667   :  { %v2432_v42 = vadd.f32 %v5491_v39, %v2412_v38  ;;  %v4037_v8 = vpop.f32.mrb[37].mxu0 }
 0x668   :  { %v2415_v9 = vpop.f32.mrb[38].mxu0 }
 0x669   :  { %v2433_v19 = vmul.f32 %v4430_v45, %v2432_v42  ;;  %v4038_v22 = vpop.f32.mrb[39].mxu0 }
 0x66b   :  { %v2434_v27 = vadd.f32 %v2433_v19, %v2176_v15 }
 0x66d   :  { %4433 = vtanh.f32 %v2434_v27 }
 0x677   :  { %v4434_v34 = vpop.eup %4433 }
 0x678   :  { %v2437_v37 = vmul.f32 %v4434_v34, %v2436_v31  ;;  %v3572_v34 = vld [vmem:[%s5744_s0 + $0xa0] sm:$0xff] }
 0x67a   :  { %v5496_v43 = vadd.f32 %v2438_v40, %v2437_v37 }
 0x67c   :  { %v2440_v49 = vpack.c.bf16 %v5496_v43, %v5496_v43 }
 0x67e   :  { %4056 = vmatmul.mubr.bf16.vlgmr.msra.gmra.mrb[36].mxu1 %v2440_v49  ;;  %2747 = vmatmul.mubr.bf16.vlgmr.msra.gmra.mrb[40].mxu0 %v2440_v49 }
 0x67f   :  { %4060 = vmatpush3.bf16.msra.mxu1 %v4319_v46  ;;  %4075 = vmatprep.mubr.msk.bf16.mxu1 %vm4495_vm0, %v4493_v2 }
 0x680   :  { %4061 = vmatprep.subr.bf16.mxu1 %v4493_v2  ;;  %4095 = vmatprep.mubr.msk.bf16.mxu0 %vm4495_vm0, %v4493_v2 }
 0x681   :  { %4080 = vmatpush3.bf16.msra.mxu0 %v4327_v56 }
 0x682   :  { %4081 = vmatprep.subr.bf16.mxu0 %v4493_v2 }
 0x683   :  { %4062 = vmatpush3.bf16.msra.mxu1 %v4320_v50 }
 0x684   :  { %4063 = vmatprep.subr.bf16.mxu1 %v4493_v2 }
 0x687   :  { %4064 = vmatpush3.bf16.msra.mxu1 %v4321_v51  ;;  %v2553_v51 = vadd.f32 %v3572_v34, %v4826_v0 }
 0x688   :  { %4065 = vmatprep.subr.bf16.mxu1 %v4493_v2 }
 0x68b   :  { %4066 = vmatpush3.bf16.msra.mxu1 %v4322_v28 }
 0x68c   :  { %4067 = vmatprep.subr.bf16.mxu1 %v4493_v2 }
 0x68f   :  { %4068 = vmatpush3.bf16.msra.mxu1 %v4323_v52 }
 0x690   :  { %4069 = vmatprep.subr.bf16.mxu1 %v4493_v2 }
 0x693   :  { %4070 = vmatpush3.bf16.msra.mxu1 %v4324_v53 }
 0x694   :  { %4071 = vmatprep.subr.bf16.mxu1 %v4493_v2 }
 0x697   :  { %4072 = vmatpush3.bf16.msra.mxu1 %v4325_v12 }
 0x698   :  { %4073 = vmatprep.subr.bf16.mxu1 %v4493_v2 }
 0x69b   :  { %4074 = vmatpush3.bf16.msra.mxu1 %v4326_v54 }
 0x69c   :  { %3091 = vmatprep.subr.bf16.mxu1 %v4330_v23 }
 0x69e   :  { %4076 = vmatmul.mubr.bf16.vlgmr.msra.gmra.mrb[40].mxu1 %v2440_v49 }
 0x69f   :  { %3123 = vmatprep.mubr.bf16.mxu1 %v4494_v3  ;;  %v4331_v3 = vld [vmem:[%s5749_s5 + $0x8] sm:$0xff]   ;;  %3092 = vmatpush1.bf16.msra.mxu1 %v4328_v58 }
 0x6a0   :  { %3093 = vmatprep.subr.bf16.mxu1 %v4334_v59  ;;  %4082 = vmatpush3.bf16.msra.mxu0 %v4331_v3  ;;  %v4359_v3 = vld [vmem:[%s5747_s3 + $0x8] ss:$12 sps:$4 sm:$0xff]  }
 0x6a1   :  { %4083 = vmatprep.subr.bf16.mxu0 %v4493_v2 }
 0x6a3   :  { %3094 = vmatpush1.bf16.msra.mxu1 %v4332_v5 }
 0x6a4   :  { %4084 = vmatpush3.bf16.msra.mxu0 %v4335_v6  ;;  %3095 = vmatprep.subr.bf16.mxu1 %v4338_v7  ;;  %v4360_v6 = vld [vmem:[%s5747_s3 + $0x20] ss:$12 sps:$4 sm:$0xff]   ;;  %v4362_v7 = vld [vmem:[%s5747_s3 + $0x50] ss:$12 sps:$4 sm:$0xff]  }
 0x6a5   :  { %4085 = vmatprep.subr.bf16.mxu0 %v4493_v2 }
 0x6a7   :  { %3096 = vmatpush1.bf16.msra.mxu1 %v4336_v44  ;;  %v4363_v44 = vld [vmem:[%s5747_s3 + $0x68] ss:$12 sps:$4 sm:$0xff]  }
 0x6a8   :  { %4086 = vmatpush3.bf16.msra.mxu0 %v4339_v47  ;;  %3097 = vmatprep.subr.bf16.mxu1 %v4342_v48  ;;  %v4364_v47 = vld [vmem:[%s5747_s3 + $0x80] ss:$12 sps:$4 sm:$0xff]   ;;  %v4365_v48 = vld [vmem:[%s5747_s3 + $0x98] ss:$12 sps:$4 sm:$0xff]  }
 0x6a9   :  { %4087 = vmatprep.subr.bf16.mxu0 %v4493_v2 }
 0x6ab   :  { %3098 = vmatpush1.bf16.msra.mxu1 %v4340_v10  ;;  %v4366_v10 = vld [vmem:[%s5747_s3 + $0xb0] ss:$12 sps:$4 sm:$0xff]  }
 0x6ac   :  { %4088 = vmatpush3.bf16.msra.mxu0 %v4343_v11  ;;  %3099 = vmatprep.subr.bf16.mxu1 %v4346_v13  ;;  %v4367_v11 = vld [vmem:[%s5749_s5] sm:$0xff]   ;;  %v4368_v13 = vld [vmem:[%s5749_s5 + $0x8] sm:$0xff]  }
 0x6ad   :  { %4089 = vmatprep.subr.bf16.mxu0 %v4493_v2 }
 0x6af   :  { %3100 = vmatpush1.bf16.msra.mxu1 %v4344_v14  ;;  %v4369_v14 = vld [vmem:[%s5749_s5 + $0x10] sm:$0xff]  }
 0x6b0   :  { %3101 = vmatprep.subr.bf16.mxu1 %v4350_v17  ;;  %4090 = vmatpush3.bf16.msra.mxu0 %v4347_v16  ;;  %v4370_v16 = vld [vmem:[%s5749_s5 + $0x18] sm:$0xff]   ;;  %v4371_v17 = vld [vmem:[%s5749_s5 + $0x20] sm:$0xff]  }
 0x6b1   :  { %4091 = vmatprep.subr.bf16.mxu0 %v4493_v2 }
 0x6b3   :  { %3102 = vmatpush1.bf16.msra.mxu1 %v4348_v18  ;;  %v4372_v18 = vld [vmem:[%s5749_s5 + $0x28] sm:$0xff]  }
 0x6b4   :  { %3103 = vmatprep.subr.bf16.mxu1 %v4354_v20  ;;  %4092 = vmatpush3.bf16.msra.mxu0 %v4351_v21  ;;  %v4373_v20 = vld [vmem:[%s5749_s5 + $0x30] sm:$0xff]   ;;  %v4374_v21 = vld [vmem:[%s5749_s5 + $0x38] sm:$0xff]  }
 0x6b5   :  { %4093 = vmatprep.subr.bf16.mxu0 %v4493_v2 }
 0x6b7   :  { %3104 = vmatpush1.bf16.msra.mxu1 %v4352_v24  ;;  %v3608_v24 = vld [vmem:[%s5744_s0 + $0xa8] sm:$0xff] }
 0x6b8   :  { %3105 = vmatprep.subr.bf16.mxu1 %v4358_v55  ;;  %4094 = vmatpush3.bf16.msra.mxu0 %v4355_v62  ;;  %v3609_v55 = vld [vmem:[%s5744_s0 + $0xb0] sm:$0xff]  ;;  %v2928_v62 = vadd.f32 %v3608_v24, %v4822_v60 }
 0x6b9   :  { %4099 = vmatprep.subr.bf16.mxu0 %v4493_v2  ;;  %v2929_v4 = vadd.f32 %v3609_v55, %v4824_v61 }
 0x6bb   :  { %3106 = vmatpush1.bf16.msra.mxu1 %v4356_v63 }
 0x6bc   :  { %4119 = vmatprep.subr.bf16.mxu1 %v4493_v2 }
 0x751   :  { %v2539_v29 = vpop.f32.mrb[36].mxu1  ;;  %v2748_v30 = vpop.f32.mrb[40].mxu0 }
 0x752   :  { %v2540_v33 = vadd.f32 %v5628_v57, %v2539_v29  ;;  %v2795_v41 = vadd.f32 %v2748_v30, %v2551_v25  ;;  %v4057_v35 = vpop.f32.mrb[37].mxu1  ;;  %v2750_v36 = vpop.f32.mrb[41].mxu0 }
 0x753   :  { %v2802_v38 = vadd.f32 %v2750_v36, %v2552_v32  ;;  %v2542_v42 = vpop.f32.mrb[38].mxu1  ;;  %v2752_v8 = vpop.f32.mrb[42].mxu0 }
 0x754   :  { %3569 = vst [vmem:[%s5751_s7 + $0x28] sm:$0xff] %v2540_v33  ;;  %v3597_v45 = vmul.f32 -1.442695, %v2795_v41  ;;  %v4058_v9 = vpop.f32.mrb[39].mxu1  ;;  %v2753_v15 = vpop.f32.mrb[43].mxu0 }
 0x755   :  { %v3598_v19 = vmul.f32 -1.442695, %v2802_v38  ;;  %v3610_v9 = vld [vmem:[%s5744_s0 + $0xb8] sm:$0xff]  ;;  %s4496_s0 = smov [#allocation2]  }
 0x756   :  { %4435 = vpow2.f32 %v3597_v45  ;;  %s3310_s15 = sshll.u32 %s4496_s0, 4  ;;  %s3311_s15 = int_to_ptr.vmem [resolvable:$true] %s3310_s15 }
 0x757   :  { %4437 = vpow2.f32 %v3598_v19  ;;  %s4469_s16 = scalar_lea.vmem %s3311_s15, 128  ;;  %p4474_p1 = scmp.lt.s32.totalorder %s3311_s15, %s3311_s15 }
 0x758   :  { %p4470_p0 = scmp.ne.s32.totalorder %s3311_s15, %s4469_s16  ;;  %p4475_p2 = scmp.lt.s32.totalorder %s4469_s16, %s4469_s16 }
 0x75a   :  { %p4476_p3 = por %p4475_p2, %p4474_p1 }
 0x75c   :  { %p4477_p4 = pnand %p4476_p3, %p4470_p0 }
 0x760   :  { %v4436_v22 = vpop.eup %4435 }
 0x761   :  { %v2799_v27 = vadd.f32 1.0, %v4436_v22  ;;  %v4438_v26 = vpop.eup %4437 }
 0x762   :  { %v2806_v31 = vadd.f32 1.0, %v4438_v26 }
 0x763   :  { %4439 = vrcp.f32 %v2799_v27 }
 0x764   :  { %4441 = vrcp.f32 %v2806_v31  ;;  %v2930_v31 = vadd.f32 %v3610_v9, %v4826_v0 }
 0x76d   :  { %v4440_v49 = vpop.eup %4439 }
 0x76e   :  { %v4442_v12 = vpop.eup %4441 }
 0x76f   :  { %v2813_v54 = vsub.f32 1.0, %v4442_v12  ;;  %v2815_v23 = vmul.f32 %v4442_v12, %v5496_v43  ;;  %v4361_v43 = vld [vmem:[%s5747_s3 + $0x38] ss:$12 sps:$4 sm:$0xff]  }
 0x771   :  { %v2789_v37 = vpop.f32.mrb[40].mxu1 }
 0x772   :  { %v2809_v40 = vadd.f32 %v5491_v39, %v2789_v37  ;;  %v4077_v46 = vpop.f32.mrb[41].mxu1 }
 0x773   :  { %v2792_v50 = vpop.f32.mrb[42].mxu1 }
 0x774   :  { %v2810_v28 = vmul.f32 %v4440_v49, %v2809_v40  ;;  %v4078_v52 = vpop.f32.mrb[43].mxu1 }
 0x776   :  { %v2811_v53 = vadd.f32 %v2810_v28, %v2553_v51 }
 0x778   :  { %4443 = vtanh.f32 %v2811_v53 }
 0x782   :  { %v4444_v56 = vpop.eup %4443 }
 0x783   :  { %v2814_v58 = vmul.f32 %v4444_v56, %v2813_v54 }
 0x785   :  { %v5640_v59 = vadd.f32 %v2815_v23, %v2814_v58 }
 0x787   :  { %v2817_v5 = vpack.c.bf16 %v5640_v59, %v5640_v59 }
 0x789   :  { %4096 = vmatmul.mubr.bf16.vlgmr.msra.gmra.mrb[44].mxu0 %v2817_v5  ;;  %3124 = vmatmul.mubr.bf16.vlgmr.msra.gmra.mrb[44].mxu1 %v2817_v5 }
 0x78a   :  { %4100 = vmatpush3.bf16.msra.mxu0 %v4359_v3  ;;  %4115 = vmatprep.mubr.msk.bf16.mxu0 %vm4495_vm0, %v4493_v2 }
 0x78b   :  { %4101 = vmatprep.subr.bf16.mxu0 %v4493_v2  ;;  %4135 = vmatprep.mubr.msk.bf16.mxu1 %vm4495_vm0, %v4493_v2 }
 0x78c   :  { %4120 = vmatpush3.bf16.msra.mxu1 %v4367_v11 }
 0x78d   :  { %4121 = vmatprep.subr.bf16.mxu1 %v4493_v2 }
 0x78e   :  { %4102 = vmatpush3.bf16.msra.mxu0 %v4360_v6 }
 0x78f   :  { %4103 = vmatprep.subr.bf16.mxu0 %v4493_v2 }
 0x790   :  { %4122 = vmatpush3.bf16.msra.mxu1 %v4368_v13 }
 0x791   :  { %4123 = vmatprep.subr.bf16.mxu1 %v4493_v2 }
 0x792   :  { %4104 = vmatpush3.bf16.msra.mxu0 %v4361_v43 }
 0x793   :  { %4105 = vmatprep.subr.bf16.mxu0 %v4493_v2 }
 0x794   :  { %4124 = vmatpush3.bf16.msra.mxu1 %v4369_v14 }
 0x795   :  { %4125 = vmatprep.subr.bf16.mxu1 %v4493_v2 }
 0x796   :  { %4106 = vmatpush3.bf16.msra.mxu0 %v4362_v7 }
 0x797   :  { %4107 = vmatprep.subr.bf16.mxu0 %v4493_v2 }
 0x798   :  { %4126 = vmatpush3.bf16.msra.mxu1 %v4370_v16 }
 0x799   :  { %4127 = vmatprep.subr.bf16.mxu1 %v4493_v2 }
 0x79a   :  { %4108 = vmatpush3.bf16.msra.mxu0 %v4363_v44 }
 0x79b   :  { %4109 = vmatprep.subr.bf16.mxu0 %v4493_v2 }
 0x79c   :  { %4128 = vmatpush3.bf16.msra.mxu1 %v4371_v17 }
 0x79d   :  { %4129 = vmatprep.subr.bf16.mxu1 %v4493_v2 }
 0x79e   :  { %4110 = vmatpush3.bf16.msra.mxu0 %v4364_v47 }
 0x79f   :  { %4111 = vmatprep.subr.bf16.mxu0 %v4493_v2 }
 0x7a0   :  { %4130 = vmatpush3.bf16.msra.mxu1 %v4372_v18 }
 0x7a1   :  { %4131 = vmatprep.subr.bf16.mxu1 %v4493_v2 }
 0x7a2   :  { %4112 = vmatpush3.bf16.msra.mxu0 %v4365_v48 }
 0x7a3   :  { %4113 = vmatprep.subr.bf16.mxu0 %v4493_v2 }
 0x7a4   :  { %4132 = vmatpush3.bf16.msra.mxu1 %v4373_v20 }
 0x7a5   :  { %4133 = vmatprep.subr.bf16.mxu1 %v4493_v2 }
 0x7a6   :  { %4114 = vmatpush3.bf16.msra.mxu0 %v4366_v10 }
 0x7a8   :  { %4134 = vmatpush3.bf16.msra.mxu1 %v4374_v21 }
 0x7a9   :  { %4116 = vmatmul.mubr.bf16.vlgmr.msra.gmra.mrb[48].mxu0 %v2817_v5 }
 0x85c   :  { %v2916_v63 = vpop.f32.mrb[44].mxu0  ;;  %v3125_v1 = vpop.f32.mrb[44].mxu1 }
 0x85d   :  { %v2917_v25 = vadd.f32 %v5628_v57, %v2916_v63  ;;  %v3172_v29 = vadd.f32 %v3125_v1, %v2928_v62  ;;  %v4097_v30 = vpop.f32.mrb[45].mxu0  ;;  %v3127_v2 = vpop.f32.mrb[45].mxu1 }
 0x85e   :  { %v3179_v32 = vadd.f32 %v3127_v2, %v2929_v4  ;;  %v2919_v33 = vpop.f32.mrb[46].mxu0  ;;  %v3129_v41 = vpop.f32.mrb[46].mxu1 }
 0x85f   :  { %3607 = vst [vmem:[%s5751_s7 + $0x30] sm:$0xff] %v2917_v25  ;;  %v3635_v35 = vmul.f32 -1.442695, %v3172_v29  ;;  %v4098_v36 = vpop.f32.mrb[47].mxu0  ;;  %v3130_v38 = vpop.f32.mrb[47].mxu1 }
 0x860   :  { %v3636_v60 = vmul.f32 -1.442695, %v3179_v32 }
 0x861   :  { %4445 = vpow2.f32 %v3635_v35 }
 0x862   :  { %4447 = vpow2.f32 %v3636_v60 }
 0x86b   :  { %v4446_v42 = vpop.eup %4445 }
 0x86c   :  { %v3176_v61 = vadd.f32 1.0, %v4446_v42  ;;  %v4448_v8 = vpop.eup %4447 }
 0x86d   :  { %v3183_v45 = vadd.f32 1.0, %v4448_v8 }
 0x86e   :  { %4449 = vrcp.f32 %v3176_v61 }
 0x86f   :  { %4451 = vrcp.f32 %v3183_v45 }
 0x878   :  { %v4450_v27 = vpop.eup %4449 }
 0x879   :  { %v4452_v46 = vpop.eup %4451 }
 0x87a   :  { %v3190_v49 = vsub.f32 1.0, %v4452_v46  ;;  %v3192_v28 = vmul.f32 %v4452_v46, %v5640_v59 }
 0x87c   :  { %v3166_v15 = vpop.f32.mrb[48].mxu0 }
 0x87d   :  { %v3186_v19 = vadd.f32 %v5491_v39, %v3166_v15  ;;  %v4117_v22 = vpop.f32.mrb[49].mxu0 }
 0x87e   :  { %v3169_v26 = vpop.f32.mrb[50].mxu0 }
 0x87f   :  { %v3187_v34 = vmul.f32 %v4450_v27, %v3186_v19  ;;  %v4118_v37 = vpop.f32.mrb[51].mxu0 }
 0x881   :  { %v3188_v40 = vadd.f32 %v3187_v34, %v2930_v31 }
 0x883   :  { %4453 = vtanh.f32 %v3188_v40 }
 0x88d   :  { %v4454_v50 = vpop.eup %4453 }
 0x88e   :  { %v3191_v51 = vmul.f32 %v4454_v50, %v3190_v49 }
 0x890   :  { %v3193_v52 = vadd.f32 %v3192_v28, %v3191_v51 }
 0x892   :  { %v3194_v53 = vpack.c.bf16 %v3193_v52, %v3193_v52  ;;  %3301 = vst [vmem:[#allocation2] sm:$0xff] %v3193_v52 }
 0x894   :  { %4136 = vmatmul.mubr.bf16.vlgmr.msra.gmra.mrb[48].mxu1 %v3194_v53 }
 0x895   :  { %4480 = shalt.err (!%p4477_p4)
}
 0x896   :  { %s4481_s19 = scalar_lea.hbm %s5752_s8, 128 }
 0x897   :  { %p4482_p5 = scmp.ne.s32.totalorder %s5752_s8, %s4481_s19  ;;  %p4485_p6 = scmp.lt.u32.totalorder %s4481_s19, %s5752_s8 }
 0x899   :  { %p4487_p7 = pnand %p4485_p6, %p4482_p5 }
 0x89b   :  { %4490 = shalt.err (!%p4487_p7)
}
 0x89c   :  { %3313 = dma.vmem_to_hbm [thread:$0]  %s3311_s15, 128, %s5752_s8, [#allocation3]  }
 0x967   :  { %v3293_v0 = vpop.f32.mrb[48].mxu1 }
 0x968   :  { %v3294_v39 = vadd.f32 %v5628_v57, %v3293_v0  ;;  %v4137_v12 = vpop.f32.mrb[49].mxu1 }
 0x969   :  { %v3296_v54 = vpop.f32.mrb[50].mxu1 }
 0x96a   :  { %3645 = vst [vmem:[%s5751_s7 + $0x38] sm:$0xff] %v3294_v39  ;;  %v4138_v56 = vpop.f32.mrb[51].mxu1 }
 0x96b   :  { %4491 = dma.done.wait [#allocation3], 128  }
 0x96c   :  { %4492 = vsyncadd [#allocation3], 4294967168 }
 0x96d   :  { %3319 = vsyncpa [#allocation3], 1 }

</bundles_post_ra>
